<compile_context>
chip_gen: v6e
topology: v6e:2x2x1
jax: 0.10.0
libtpu: 0.0.40
codegen_flags: <defaults>
</compile_context>

<pallas_src>
import functools

import jax
import jax.numpy as jnp
import numpy as np
from jax import lax
from jax.experimental import pallas as pl
from jax.experimental.pallas import tpu as pltpu

LN_EPS = 1e-5  # PyTorch nn.LayerNorm default


# ------------------------------ small helpers --------------------------------

def _round_up(x, m):
    return (x + m - 1) // m * m


def _tpu_budgets():
    """(row-tile target, scoped-vmem request) chosen per TPU generation."""
    try:
        vmem = int(getattr(pltpu.get_tpu_info(), "vmem_capacity_bytes",
                           64 * 1024 * 1024))
    except Exception:                      # conservative default (v7x-sized VMEM)
        vmem = 64 * 1024 * 1024
    if vmem >= 96 * 1024 * 1024:           # v5e / v6e: 128 MiB VMEM
        return 1024, 96 * 1024 * 1024
    return 512, 40 * 1024 * 1024           # v7x: 64 MiB VMEM


def _pick_tile(m, target):
    """Row tile: multiple of 8 and <= target; callers pad rows to a tile multiple."""
    target = max(8, (target // 8) * 8)
    if m <= target:
        return _round_up(m, 8)
    for t in range(target, target // 2 - 1, -8):   # prefer an exact divisor (no padding)
        if m % t == 0:
            return t
    return target                                   # fixed tile + padded tail rows


def _pad_rows(x, mp):
    if x.shape[0] == mp:
        return x
    pad = [(0, mp - x.shape[0])] + [(0, 0)] * (x.ndim - 1)
    return jnp.pad(x, pad)


def _bcast_spec(shape, grid_ndim):
    """Full-extent block whose index never changes (weights / LN params / biases)."""
    zeros = (0,) * len(shape)
    if grid_ndim == 1:
        return pl.BlockSpec(shape, lambda i: zeros)
    return pl.BlockSpec(shape, lambda i, j: zeros)


def _ln(x, g, b):
    mu = jnp.mean(x, axis=-1, keepdims=True)
    var = jnp.mean((x - mu) ** 2, axis=-1, keepdims=True)
    return (x - mu) * lax.rsqrt(var + LN_EPS) * g + b


def _bf16(x):
    return x.astype(jnp.bfloat16)


# ----------------------------- Pallas kernels --------------------------------

def attn_fused_kernel(x_ref, g1_ref, b1_ref, wq_ref, kv_ref, wo_ref, bo_ref,
                      o_ref, *, num_heads, head_dim):
    # One (batch, query-tile) per grid step.
    #   x_ref  : (1, TQ, C) f32 raw residual-stream tokens
    #   wq_ref : (C, C) bf16, attention scale pre-folded
    #   kv_ref : (1, Nr, 2C) bf16, resident across the query-tile grid axis
    #   wo_ref : (C, C) bf16, bo_ref: (1, C) f32
    # Computes norm1 -> q -> softmax(q k^T) v per head -> out proj + bias + residual.
    C = num_heads * head_dim
    x = x_ref[0, :, :]                                        # (TQ, C) f32
    xn = _ln(x, g1_ref[...], b1_ref[...])
    q = jnp.dot(_bf16(xn), wq_ref[...],
                preferred_element_type=jnp.float32)           # (TQ, C); scale in wq
    # TODO(synk): for head_dim <= 64 pack several heads per >=128-lane slab (block-diag
    # mask) to fill the 256-wide MXU contraction; per-head loop kept for clarity here.
    heads = []
    for h in range(num_heads):
        lo, hi = h * head_dim, (h + 1) * head_dim
        qh = _bf16(q[:, lo:hi])                               # (TQ, hd)
        kh = kv_ref[0, :, lo:hi]                              # (Nr, hd) bf16
        vh = kv_ref[0, :, C + lo:C + hi]                      # (Nr, hd) bf16
        s = lax.dot_general(qh, kh, (((1,), (1,)), ((), ())),
                            preferred_element_type=jnp.float32)   # (TQ, Nr)
        s = s - jnp.max(s, axis=-1, keepdims=True)
        e = jnp.exp(s)
        denom = jnp.sum(e, axis=-1, keepdims=True)
        oh = jnp.dot(_bf16(e), vh, preferred_element_type=jnp.float32)
        heads.append(oh * pl.reciprocal(denom, approx=True))
    attn = heads[0] if num_heads == 1 else jnp.concatenate(heads, axis=-1)  # (TQ, C)
    o_ref[0, :, :] = (x
                      + jnp.dot(_bf16(attn), wo_ref[...],
                                preferred_element_type=jnp.float32)
                      + bo_ref[...])


def sr_kv_kernel(xp_ref, g1_ref, b1_ref, srw_ref, srb_ref, gs_ref, bs_ref,
                 wkv_ref, o_ref, *, taps):
    # One tile of reduced tokens per grid step.
    #   xp_ref : (TR, sr*sr, C) f32 im2col'd RAW tokens (layout done in the XLA wrapper)
    #   computes norm1 (per original token) -> Conv2d(C,C,k=sr,s=sr) as tap matmuls
    #            -> sr-LayerNorm -> kv projection, emitted bf16.
    g1, b1 = g1_ref[...], b1_ref[...]
    tr = xp_ref.shape[0]
    C = g1.shape[-1]
    acc = jnp.zeros((tr, C), jnp.float32)
    for k in range(taps):
        xn = _ln(xp_ref[:, k, :], g1, b1)                     # LN commutes with gather
        acc = acc + jnp.dot(_bf16(xn), srw_ref[k],
                            preferred_element_type=jnp.float32)
    xr = _ln(acc + srb_ref[...], gs_ref[...], bs_ref[...])
    o_ref[...] = jnp.dot(_bf16(xr), wkv_ref[...],
                         preferred_element_type=jnp.float32).astype(o_ref.dtype)


def ln_mlp_residual_kernel(x_ref, g_ref, b_ref, w1_ref, b1_ref, w2_ref, b2_ref,
                           o_ref):
    # fused norm2 + MLP(fc1 -> exact-erf GELU -> fc2) + residual; w1/w2 are bf16.
    x = x_ref[...]
    xn = _ln(x, g_ref[...], b_ref[...])
    h = jnp.dot(_bf16(xn), w1_ref[...],
                preferred_element_type=jnp.float32) + b1_ref[...]
    # exact erf GELU to match nn.GELU() semantics
    # TODO(synk): tanh-approx GELU would move this onto the EUP slot if parity not needed
    h = 0.5 * h * (1.0 + lax.erf(h * 0.7071067811865476))
    o_ref[...] = (x
                  + jnp.dot(_bf16(h), w2_ref[...],
                            preferred_element_type=jnp.float32)
                  + b2_ref[...])


# -------------------------------- wrappers ------------------------------------

def sr_kv_projection(x, p, srw_bf, wkv_bf, H, W, sr, tile_target, vmem_limit):
    B, N, C = x.shape
    Hr, Wr = H // sr, W // sr
    Nr = Hr * Wr
    taps = sr * sr
    # im2col of the raw tokens: pure XLA layout plumbing (no compute); norm1 is still
    # fused in-kernel because LN is per-token and commutes with the gather.
    xp = (x.reshape(B, Hr, sr, Wr, sr, C)
           .transpose(0, 1, 3, 2, 4, 5)
           .reshape(B * Nr, taps, C))
    M = B * Nr
    tr = _pick_tile(M, tile_target)
    Mp = _round_up(M, tr)
    xp = _pad_rows(xp, Mp)
    kernel = functools.partial(sr_kv_kernel, taps=taps)
    kv = pl.pallas_call(
        kernel,
        out_shape=jax.ShapeDtypeStruct((Mp, 2 * C), jnp.bfloat16),
        grid=(Mp // tr,),
        in_specs=[pl.BlockSpec((tr, taps, C), lambda i: (i, 0, 0)),
                  _bcast_spec(p["norm1_g"].shape, 1),
                  _bcast_spec(p["norm1_b"].shape, 1),
                  _bcast_spec(srw_bf.shape, 1),
                  _bcast_spec(p["sr_b"].shape, 1),
                  _bcast_spec(p["srnorm_g"].shape, 1),
                  _bcast_spec(p["srnorm_b"].shape, 1),
                  _bcast_spec(wkv_bf.shape, 1)],
        out_specs=pl.BlockSpec((tr, 2 * C), lambda i: (i, 0)),
        compiler_params=pltpu.CompilerParams(
            dimension_semantics=("parallel",),
            vmem_limit_bytes=vmem_limit),
    )(xp, p["norm1_g"], p["norm1_b"], srw_bf, p["sr_b"],
      p["srnorm_g"], p["srnorm_b"], wkv_bf)
    return kv[:M].reshape(B, Nr, 2 * C)


def fused_attention(x, kv, p, wq_s, wo_bf, num_heads, tile_target, vmem_limit):
    B, N, C = x.shape
    Nr = kv.shape[1]
    hd = C // num_heads
    tq = _pick_tile(N, tile_target)
    Np = _round_up(N, tq)
    xq = x if Np == N else jnp.pad(x, ((0, 0), (0, Np - N), (0, 0)))
    kernel = functools.partial(attn_fused_kernel, num_heads=num_heads,
                               head_dim=hd)
    out = pl.pallas_call(
        kernel,
        out_shape=jax.ShapeDtypeStruct((B, Np, C), jnp.float32),
        grid=(B, Np // tq),
        in_specs=[pl.BlockSpec((1, tq, C), lambda b, i: (b, i, 0)),
                  _bcast_spec(p["norm1_g"].shape, 2),
                  _bcast_spec(p["norm1_b"].shape, 2),
                  _bcast_spec(wq_s.shape, 2),
                  pl.BlockSpec((1, Nr, 2 * C), lambda b, i: (b, 0, 0)),
                  _bcast_spec(wo_bf.shape, 2),
                  _bcast_spec(p["bo"].shape, 2)],
        out_specs=pl.BlockSpec((1, tq, C), lambda b, i: (b, i, 0)),
        compiler_params=pltpu.CompilerParams(
            dimension_semantics=("parallel", "parallel"),
            vmem_limit_bytes=vmem_limit),
    )(xq, p["norm1_g"], p["norm1_b"], wq_s, kv, wo_bf, p["bo"])
    return out if Np == N else out[:, :N]


def mlp_residual(x2, p, w1_bf, w2_bf, tile_target, vmem_limit):
    M, C = x2.shape
    tm = _pick_tile(M, tile_target)
    Mp = _round_up(M, tm)
    xpad = _pad_rows(x2, Mp)
    out = pl.pallas_call(
        ln_mlp_residual_kernel,
        out_shape=jax.ShapeDtypeStruct((Mp, C), jnp.float32),
        grid=(Mp // tm,),
        in_specs=[pl.BlockSpec((tm, C), lambda i: (i, 0)),
                  _bcast_spec(p["norm2_g"].shape, 1),
                  _bcast_spec(p["norm2_b"].shape, 1),
                  _bcast_spec(w1_bf.shape, 1),
                  _bcast_spec(p["b1"].shape, 1),
                  _bcast_spec(w2_bf.shape, 1),
                  _bcast_spec(p["b2"].shape, 1)],
        out_specs=pl.BlockSpec((tm, C), lambda i: (i, 0)),
        compiler_params=pltpu.CompilerParams(
            dimension_semantics=("parallel",),
            vmem_limit_bytes=vmem_limit),
    )(xpad, p["norm2_g"], p["norm2_b"], w1_bf, p["b1"], w2_bf, p["b2"])
    return out[:M]


@functools.partial(jax.jit, static_argnums=(1, 2, 4, 5))
def encode_block_forward(x, H, W, p, num_heads, sr_ratio):
    B, N, C = x.shape
    assert sr_ratio > 1 and N == H * W, "only the 'self' / sr_ratio>1 path is implemented"
    hd = C // num_heads
    scale = hd ** -0.5
    tile_target, vmem_limit = _tpu_budgets()

    # Pre-cast weights to bf16 once (halves weight DMA / VMEM, removes per-step casts);
    # fold the attention scale into wq.  Biases / LN params stay f32.
    wq_s = _bf16(p["wq"] * scale)
    wkv_bf = _bf16(p["wkv"])
    wo_bf = _bf16(p["wo"])
    srw_bf = _bf16(p["sr_w"])
    w1_bf = _bf16(p["w1"])
    w2_bf = _bf16(p["w2"])

    # norm1 -> sequence-reduction conv -> LayerNorm -> kv projection  (bf16 out)
    kv = sr_kv_projection(x, p, srw_bf, wkv_bf, H, W, sr_ratio,
                          tile_target, vmem_limit)            # (B, Nr, 2C) bf16

    # norm1 -> q proj -> attention -> out proj + bias -> +residual   (one kernel)
    x_res = fused_attention(x, kv, p, wq_s, wo_bf, num_heads,
                            tile_target, vmem_limit)          # (B, N, C) f32

    # norm2 -> MLP -> +residual
    out = mlp_residual(x_res.reshape(B * N, C), p, w1_bf, w2_bf,
                       tile_target, vmem_limit)
    return out.reshape(B, N, C)


# -------------------------- reference (plain JAX) ------------------------------

def reference_forward(x, H, W, p, num_heads, sr):
    B, N, C = x.shape
    hd = C // num_heads
    scale = hd ** -0.5
    x2 = x.reshape(B * N, C)
    xn1 = _ln(x2, p["norm1_g"], p["norm1_b"])
    q = (xn1 @ p["wq"]).reshape(B, N, num_heads, hd).transpose(0, 2, 1, 3)
    Hr, Wr = H // sr, W // sr
    Nr = Hr * Wr
    patches = xn1.reshape(B, Hr, sr, Wr, sr, C).transpose(0, 1, 3, 2, 4, 5)
    patches = patches.reshape(B, Nr, sr * sr, C)
    xr = jnp.einsum("bnkc,kcd->bnd", patches, p["sr_w"]) + p["sr_b"]
    xr = _ln(xr, p["srnorm_g"], p["srnorm_b"])
    kv = (xr.reshape(B * Nr, C) @ p["wkv"]).reshape(B, Nr, 2, num_heads, hd)
    kv = kv.transpose(2, 0, 3, 1, 4)
    k, v = kv[0], kv[1]
    s = jnp.einsum("bhqd,bhkd->bhqk", q, k) * scale
    pm = jax.nn.softmax(s, axis=-1)
    ao = jnp.einsum("bhqk,bhkd->bhqd", pm, v).transpose(0, 2, 1, 3)
    ao = ao.reshape(B * N, C)
    xr1 = x2 + ao @ p["wo"] + p["bo"]
    xn2 = _ln(xr1, p["norm2_g"], p["norm2_b"])
    h = jax.nn.gelu(xn2 @ p["w1"] + p["b1"], approximate=False)
    return (xr1 + h @ p["w2"] + p["b2"]).reshape(B, N, C)


# --------------------------------- setup ---------------------------------------

def make_params(key, C, num_heads, sr_ratio, hidden):
    ks = jax.random.split(key, 8)
    f32 = jnp.float32
    std = 0.02
    return {
        "norm1_g": jnp.ones((1, C), f32), "norm1_b": jnp.zeros((1, C), f32),
        "wq": jax.random.normal(ks[0], (C, C), f32) * std,
        # Conv2d(C, C, k=sr, s=sr) weight stored as (sr*sr, Cin, Cout), tap
        # index k = di*sr + dj (row offset di, column offset dj).
        "sr_w": jax.random.normal(ks[1], (sr_ratio * sr_ratio, C, C), f32) * std,
        "sr_b": jax.random.normal(ks[2], (1, C), f32) * std,
        "srnorm_g": jnp.ones((1, C), f32), "srnorm_b": jnp.zeros((1, C), f32),
        "wkv": jax.random.normal(ks[3], (C, 2 * C), f32) * std,
        "wo": jax.random.normal(ks[4], (C, C), f32) * std,
        "bo": jax.random.normal(ks[5], (1, C), f32) * std,
        "norm2_g": jnp.ones((1, C), f32), "norm2_b": jnp.zeros((1, C), f32),
        "w1": jax.random.normal(ks[6], (C, hidden), f32) * std,
        "b1": jnp.zeros((1, hidden), f32),
        "w2": jax.random.normal(ks[7], (hidden, C), f32) * std,
        "b2": jnp.zeros((1, C), f32),
    }


if __name__ == "__main__":
    B, H, W, C = 2, 8, 8, 32
    num_heads, sr_ratio, mlp_ratio = 2, 2, 4
    N = H * W
    hidden = C * mlp_ratio

    key = jax.random.PRNGKey(0)
    kx, kp = jax.random.split(key)
    x = jax.random.normal(kx, (B, N, C), jnp.float32)
    params = make_params(kp, C, num_heads, sr_ratio, hidden)

    out = jax.block_until_ready(
        encode_block_forward(x, H, W, params, num_heads, sr_ratio))
    ref = jax.block_until_ready(
        reference_forward(x, H, W, params, num_heads, sr_ratio))

    assert out.shape == (B, N, C)
    # bf16 MXU operands + bf16 kv + approx reciprocal vs f32 reference -> looser tol
    np.testing.assert_allclose(np.asarray(out), np.asarray(ref),
                               atol=2e-2, rtol=2e-2)
    print("KERNEL_OK")
</pallas_src>

<mosaic_0001>
module attributes {stable_mosaic.version = 11 : i64} {
  func.func @sr_kv_kernel(%arg0: i32, %arg1: memref<32x4x32xf32, #tpu.memory_space<vmem>>, %arg2: memref<1x32xf32, #tpu.memory_space<vmem>>, %arg3: memref<1x32xf32, #tpu.memory_space<vmem>>, %arg4: memref<4x32x32xbf16, #tpu.memory_space<vmem>>, %arg5: memref<1x32xf32, #tpu.memory_space<vmem>>, %arg6: memref<1x32xf32, #tpu.memory_space<vmem>>, %arg7: memref<1x32xf32, #tpu.memory_space<vmem>>, %arg8: memref<32x64xbf16, #tpu.memory_space<vmem>>, %arg9: memref<32x64xbf16, #tpu.memory_space<vmem>>) attributes {dimension_semantics = [#tpu.dimension_semantics<parallel>], iteration_bounds = array<i64: 1>, scalar_prefetch = 0 : i64, scratch_operands = 0 : i64, tpu.core_type = #tpu.core_type<tc>, window_params = [{transform_indices = @transform_0, window_bounds = array<i64: 32, 4, 32>}, {pipeline_mode = #tpu.pipeline_mode<synchronous>, transform_indices = @transform_1, window_bounds = array<i64: 1, 32>}, {pipeline_mode = #tpu.pipeline_mode<synchronous>, transform_indices = @transform_2, window_bounds = array<i64: 1, 32>}, {pipeline_mode = #tpu.pipeline_mode<synchronous>, transform_indices = @transform_3, window_bounds = array<i64: 4, 32, 32>}, {pipeline_mode = #tpu.pipeline_mode<synchronous>, transform_indices = @transform_4, window_bounds = array<i64: 1, 32>}, {pipeline_mode = #tpu.pipeline_mode<synchronous>, transform_indices = @transform_5, window_bounds = array<i64: 1, 32>}, {pipeline_mode = #tpu.pipeline_mode<synchronous>, transform_indices = @transform_6, window_bounds = array<i64: 1, 32>}, {pipeline_mode = #tpu.pipeline_mode<synchronous>, transform_indices = @transform_7, window_bounds = array<i64: 32, 64>}, {transform_indices = @transform_8, window_bounds = array<i64: 32, 64>}]} {
    %c0 = arith.constant 0 : index
    %c0_0 = arith.constant 0 : index
    %0 = vector.load %arg2[%c0, %c0_0] : memref<1x32xf32, #tpu.memory_space<vmem>>, vector<1x32xf32>
    %c0_1 = arith.constant 0 : index
    %c0_2 = arith.constant 0 : index
    %1 = vector.load %arg3[%c0_1, %c0_2] : memref<1x32xf32, #tpu.memory_space<vmem>>, vector<1x32xf32>
    %cst = arith.constant 0.000000e+00 : f32
    %2 = vector.broadcast %cst : f32 to vector<32x32xf32>
    %c0_3 = arith.constant 0 : index
    %c0_4 = arith.constant 0 : index
    %c0_5 = arith.constant 0 : index
    %3 = vector.load %arg1[%c0_3, %c0_4, %c0_5] : memref<32x4x32xf32, #tpu.memory_space<vmem>>, vector<32x1x32xf32>
    %4 = vector.shape_cast %3 : vector<32x1x32xf32> to vector<32x32xf32>
    %cst_6 = arith.constant dense<0.000000e+00> : vector<32xf32>
    %5 = vector.multi_reduction <add>, %4, %cst_6 [1] : vector<32x32xf32> to vector<32xf32>
    %6 = vector.shape_cast %5 : vector<32xf32> to vector<32x1xf32>
    %cst_7 = arith.constant 3.200000e+01 : f32
    %7 = vector.broadcast %cst_7 : f32 to vector<32x1xf32>
    %8 = arith.divf %6, %7 : vector<32x1xf32>
    %9 = vector.broadcast %8 : vector<32x1xf32> to vector<32x32xf32>
    %10 = arith.subf %4, %9 : vector<32x32xf32>
    %11 = arith.mulf %10, %10 : vector<32x32xf32>
    %cst_8 = arith.constant dense<0.000000e+00> : vector<32xf32>
    %12 = vector.multi_reduction <add>, %11, %cst_8 [1] : vector<32x32xf32> to vector<32xf32>
    %13 = vector.shape_cast %12 : vector<32xf32> to vector<32x1xf32>
    %cst_9 = arith.constant 3.200000e+01 : f32
    %14 = vector.broadcast %cst_9 : f32 to vector<32x1xf32>
    %15 = arith.divf %13, %14 : vector<32x1xf32>
    %16 = vector.broadcast %8 : vector<32x1xf32> to vector<32x32xf32>
    %17 = arith.subf %4, %16 : vector<32x32xf32>
    %cst_10 = arith.constant 9.99999974E-6 : f32
    %18 = vector.broadcast %cst_10 : f32 to vector<32x1xf32>
    %19 = arith.addf %15, %18 : vector<32x1xf32>
    %20 = math.rsqrt %19 : vector<32x1xf32>
    %21 = vector.broadcast %20 : vector<32x1xf32> to vector<32x32xf32>
    %22 = arith.mulf %17, %21 : vector<32x32xf32>
    %23 = vector.broadcast %0 : vector<1x32xf32> to vector<32x32xf32>
    %24 = arith.mulf %22, %23 : vector<32x32xf32>
    %25 = vector.broadcast %1 : vector<1x32xf32> to vector<32x32xf32>
    %26 = arith.addf %24, %25 : vector<32x32xf32>
    %27 = arith.truncf %26 : vector<32x32xf32> to vector<32x32xbf16>
    %c0_11 = arith.constant 0 : index
    %c0_12 = arith.constant 0 : index
    %c0_13 = arith.constant 0 : index
    %28 = vector.load %arg4[%c0_11, %c0_12, %c0_13] : memref<4x32x32xbf16, #tpu.memory_space<vmem>>, vector<1x32x32xbf16>
    %29 = vector.shape_cast %28 : vector<1x32x32xbf16> to vector<32x32xbf16>
    %cst_14 = arith.constant dense<0.000000e+00> : vector<32x32xf32>
    %30 = tpu.matmul %27, %29, %cst_14 {dimension_numbers = #tpu.dot_dimension_numbers<[1], [0], [0], [1], [0, 0, 1, 1], [], []>} : vector<32x32xbf16>, vector<32x32xbf16>, vector<32x32xf32> -> vector<32x32xf32>
    %31 = arith.addf %2, %30 : vector<32x32xf32>
    %c0_15 = arith.constant 0 : index
    %c1 = arith.constant 1 : index
    %c0_16 = arith.constant 0 : index
    %32 = vector.load %arg1[%c0_15, %c1, %c0_16] : memref<32x4x32xf32, #tpu.memory_space<vmem>>, vector<32x1x32xf32>
    %33 = vector.shape_cast %32 : vector<32x1x32xf32> to vector<32x32xf32>
    %cst_17 = arith.constant dense<0.000000e+00> : vector<32xf32>
    %34 = vector.multi_reduction <add>, %33, %cst_17 [1] : vector<32x32xf32> to vector<32xf32>
    %35 = vector.shape_cast %34 : vector<32xf32> to vector<32x1xf32>
    %cst_18 = arith.constant 3.200000e+01 : f32
    %36 = vector.broadcast %cst_18 : f32 to vector<32x1xf32>
    %37 = arith.divf %35, %36 : vector<32x1xf32>
    %38 = vector.broadcast %37 : vector<32x1xf32> to vector<32x32xf32>
    %39 = arith.subf %33, %38 : vector<32x32xf32>
    %40 = arith.mulf %39, %39 : vector<32x32xf32>
    %cst_19 = arith.constant dense<0.000000e+00> : vector<32xf32>
    %41 = vector.multi_reduction <add>, %40, %cst_19 [1] : vector<32x32xf32> to vector<32xf32>
    %42 = vector.shape_cast %41 : vector<32xf32> to vector<32x1xf32>
    %cst_20 = arith.constant 3.200000e+01 : f32
    %43 = vector.broadcast %cst_20 : f32 to vector<32x1xf32>
    %44 = arith.divf %42, %43 : vector<32x1xf32>
    %45 = vector.broadcast %37 : vector<32x1xf32> to vector<32x32xf32>
    %46 = arith.subf %33, %45 : vector<32x32xf32>
    %cst_21 = arith.constant 9.99999974E-6 : f32
    %47 = vector.broadcast %cst_21 : f32 to vector<32x1xf32>
    %48 = arith.addf %44, %47 : vector<32x1xf32>
    %49 = math.rsqrt %48 : vector<32x1xf32>
    %50 = vector.broadcast %49 : vector<32x1xf32> to vector<32x32xf32>
    %51 = arith.mulf %46, %50 : vector<32x32xf32>
    %52 = vector.broadcast %0 : vector<1x32xf32> to vector<32x32xf32>
    %53 = arith.mulf %51, %52 : vector<32x32xf32>
    %54 = vector.broadcast %1 : vector<1x32xf32> to vector<32x32xf32>
    %55 = arith.addf %53, %54 : vector<32x32xf32>
    %56 = arith.truncf %55 : vector<32x32xf32> to vector<32x32xbf16>
    %c1_22 = arith.constant 1 : index
    %c0_23 = arith.constant 0 : index
    %c0_24 = arith.constant 0 : index
    %57 = vector.load %arg4[%c1_22, %c0_23, %c0_24] : memref<4x32x32xbf16, #tpu.memory_space<vmem>>, vector<1x32x32xbf16>
    %58 = vector.shape_cast %57 : vector<1x32x32xbf16> to vector<32x32xbf16>
    %cst_25 = arith.constant dense<0.000000e+00> : vector<32x32xf32>
    %59 = tpu.matmul %56, %58, %cst_25 {dimension_numbers = #tpu.dot_dimension_numbers<[1], [0], [0], [1], [0, 0, 1, 1], [], []>} : vector<32x32xbf16>, vector<32x32xbf16>, vector<32x32xf32> -> vector<32x32xf32>
    %60 = arith.addf %31, %59 : vector<32x32xf32>
    %c0_26 = arith.constant 0 : index
    %c2 = arith.constant 2 : index
    %c0_27 = arith.constant 0 : index
    %61 = vector.load %arg1[%c0_26, %c2, %c0_27] : memref<32x4x32xf32, #tpu.memory_space<vmem>>, vector<32x1x32xf32>
    %62 = vector.shape_cast %61 : vector<32x1x32xf32> to vector<32x32xf32>
    %cst_28 = arith.constant dense<0.000000e+00> : vector<32xf32>
    %63 = vector.multi_reduction <add>, %62, %cst_28 [1] : vector<32x32xf32> to vector<32xf32>
    %64 = vector.shape_cast %63 : vector<32xf32> to vector<32x1xf32>
    %cst_29 = arith.constant 3.200000e+01 : f32
    %65 = vector.broadcast %cst_29 : f32 to vector<32x1xf32>
    %66 = arith.divf %64, %65 : vector<32x1xf32>
    %67 = vector.broadcast %66 : vector<32x1xf32> to vector<32x32xf32>
    %68 = arith.subf %62, %67 : vector<32x32xf32>
    %69 = arith.mulf %68, %68 : vector<32x32xf32>
    %cst_30 = arith.constant dense<0.000000e+00> : vector<32xf32>
    %70 = vector.multi_reduction <add>, %69, %cst_30 [1] : vector<32x32xf32> to vector<32xf32>
    %71 = vector.shape_cast %70 : vector<32xf32> to vector<32x1xf32>
    %cst_31 = arith.constant 3.200000e+01 : f32
    %72 = vector.broadcast %cst_31 : f32 to vector<32x1xf32>
    %73 = arith.divf %71, %72 : vector<32x1xf32>
    %74 = vector.broadcast %66 : vector<32x1xf32> to vector<32x32xf32>
    %75 = arith.subf %62, %74 : vector<32x32xf32>
    %cst_32 = arith.constant 9.99999974E-6 : f32
    %76 = vector.broadcast %cst_32 : f32 to vector<32x1xf32>
    %77 = arith.addf %73, %76 : vector<32x1xf32>
    %78 = math.rsqrt %77 : vector<32x1xf32>
    %79 = vector.broadcast %78 : vector<32x1xf32> to vector<32x32xf32>
    %80 = arith.mulf %75, %79 : vector<32x32xf32>
    %81 = vector.broadcast %0 : vector<1x32xf32> to vector<32x32xf32>
    %82 = arith.mulf %80, %81 : vector<32x32xf32>
    %83 = vector.broadcast %1 : vector<1x32xf32> to vector<32x32xf32>
    %84 = arith.addf %82, %83 : vector<32x32xf32>
    %85 = arith.truncf %84 : vector<32x32xf32> to vector<32x32xbf16>
    %c2_33 = arith.constant 2 : index
    %c0_34 = arith.constant 0 : index
    %c0_35 = arith.constant 0 : index
    %86 = vector.load %arg4[%c2_33, %c0_34, %c0_35] : memref<4x32x32xbf16, #tpu.memory_space<vmem>>, vector<1x32x32xbf16>
    %87 = vector.shape_cast %86 : vector<1x32x32xbf16> to vector<32x32xbf16>
    %cst_36 = arith.constant dense<0.000000e+00> : vector<32x32xf32>
    %88 = tpu.matmul %85, %87, %cst_36 {dimension_numbers = #tpu.dot_dimension_numbers<[1], [0], [0], [1], [0, 0, 1, 1], [], []>} : vector<32x32xbf16>, vector<32x32xbf16>, vector<32x32xf32> -> vector<32x32xf32>
    %89 = arith.addf %60, %88 : vector<32x32xf32>
    %c0_37 = arith.constant 0 : index
    %c3 = arith.constant 3 : index
    %c0_38 = arith.constant 0 : index
    %90 = vector.load %arg1[%c0_37, %c3, %c0_38] : memref<32x4x32xf32, #tpu.memory_space<vmem>>, vector<32x1x32xf32>
    %91 = vector.shape_cast %90 : vector<32x1x32xf32> to vector<32x32xf32>
    %cst_39 = arith.constant dense<0.000000e+00> : vector<32xf32>
    %92 = vector.multi_reduction <add>, %91, %cst_39 [1] : vector<32x32xf32> to vector<32xf32>
    %93 = vector.shape_cast %92 : vector<32xf32> to vector<32x1xf32>
    %cst_40 = arith.constant 3.200000e+01 : f32
    %94 = vector.broadcast %cst_40 : f32 to vector<32x1xf32>
    %95 = arith.divf %93, %94 : vector<32x1xf32>
    %96 = vector.broadcast %95 : vector<32x1xf32> to vector<32x32xf32>
    %97 = arith.subf %91, %96 : vector<32x32xf32>
    %98 = arith.mulf %97, %97 : vector<32x32xf32>
    %cst_41 = arith.constant dense<0.000000e+00> : vector<32xf32>
    %99 = vector.multi_reduction <add>, %98, %cst_41 [1] : vector<32x32xf32> to vector<32xf32>
    %100 = vector.shape_cast %99 : vector<32xf32> to vector<32x1xf32>
    %cst_42 = arith.constant 3.200000e+01 : f32
    %101 = vector.broadcast %cst_42 : f32 to vector<32x1xf32>
    %102 = arith.divf %100, %101 : vector<32x1xf32>
    %103 = vector.broadcast %95 : vector<32x1xf32> to vector<32x32xf32>
    %104 = arith.subf %91, %103 : vector<32x32xf32>
    %cst_43 = arith.constant 9.99999974E-6 : f32
    %105 = vector.broadcast %cst_43 : f32 to vector<32x1xf32>
    %106 = arith.addf %102, %105 : vector<32x1xf32>
    %107 = math.rsqrt %106 : vector<32x1xf32>
    %108 = vector.broadcast %107 : vector<32x1xf32> to vector<32x32xf32>
    %109 = arith.mulf %104, %108 : vector<32x32xf32>
    %110 = vector.broadcast %0 : vector<1x32xf32> to vector<32x32xf32>
    %111 = arith.mulf %109, %110 : vector<32x32xf32>
    %112 = vector.broadcast %1 : vector<1x32xf32> to vector<32x32xf32>
    %113 = arith.addf %111, %112 : vector<32x32xf32>
    %114 = arith.truncf %113 : vector<32x32xf32> to vector<32x32xbf16>
    %c3_44 = arith.constant 3 : index
    %c0_45 = arith.constant 0 : index
    %c0_46 = arith.constant 0 : index
    %115 = vector.load %arg4[%c3_44, %c0_45, %c0_46] : memref<4x32x32xbf16, #tpu.memory_space<vmem>>, vector<1x32x32xbf16>
    %116 = vector.shape_cast %115 : vector<1x32x32xbf16> to vector<32x32xbf16>
    %cst_47 = arith.constant dense<0.000000e+00> : vector<32x32xf32>
    %117 = tpu.matmul %114, %116, %cst_47 {dimension_numbers = #tpu.dot_dimension_numbers<[1], [0], [0], [1], [0, 0, 1, 1], [], []>} : vector<32x32xbf16>, vector<32x32xbf16>, vector<32x32xf32> -> vector<32x32xf32>
    %118 = arith.addf %89, %117 : vector<32x32xf32>
    %c0_48 = arith.constant 0 : index
    %c0_49 = arith.constant 0 : index
    %119 = vector.load %arg5[%c0_48, %c0_49] : memref<1x32xf32, #tpu.memory_space<vmem>>, vector<1x32xf32>
    %120 = vector.broadcast %119 : vector<1x32xf32> to vector<32x32xf32>
    %121 = arith.addf %118, %120 : vector<32x32xf32>
    %c0_50 = arith.constant 0 : index
    %c0_51 = arith.constant 0 : index
    %122 = vector.load %arg6[%c0_50, %c0_51] : memref<1x32xf32, #tpu.memory_space<vmem>>, vector<1x32xf32>
    %c0_52 = arith.constant 0 : index
    %c0_53 = arith.constant 0 : index
    %123 = vector.load %arg7[%c0_52, %c0_53] : memref<1x32xf32, #tpu.memory_space<vmem>>, vector<1x32xf32>
    %cst_54 = arith.constant dense<0.000000e+00> : vector<32xf32>
    %124 = vector.multi_reduction <add>, %121, %cst_54 [1] : vector<32x32xf32> to vector<32xf32>
    %125 = vector.shape_cast %124 : vector<32xf32> to vector<32x1xf32>
    %cst_55 = arith.constant 3.200000e+01 : f32
    %126 = vector.broadcast %cst_55 : f32 to vector<32x1xf32>
    %127 = arith.divf %125, %126 : vector<32x1xf32>
    %128 = vector.broadcast %127 : vector<32x1xf32> to vector<32x32xf32>
    %129 = arith.subf %121, %128 : vector<32x32xf32>
    %130 = arith.mulf %129, %129 : vector<32x32xf32>
    %cst_56 = arith.constant dense<0.000000e+00> : vector<32xf32>
    %131 = vector.multi_reduction <add>, %130, %cst_56 [1] : vector<32x32xf32> to vector<32xf32>
    %132 = vector.shape_cast %131 : vector<32xf32> to vector<32x1xf32>
    %cst_57 = arith.constant 3.200000e+01 : f32
    %133 = vector.broadcast %cst_57 : f32 to vector<32x1xf32>
    %134 = arith.divf %132, %133 : vector<32x1xf32>
    %135 = vector.broadcast %127 : vector<32x1xf32> to vector<32x32xf32>
    %136 = arith.subf %121, %135 : vector<32x32xf32>
    %cst_58 = arith.constant 9.99999974E-6 : f32
    %137 = vector.broadcast %cst_58 : f32 to vector<32x1xf32>
    %138 = arith.addf %134, %137 : vector<32x1xf32>
    %139 = math.rsqrt %138 : vector<32x1xf32>
    %140 = vector.broadcast %139 : vector<32x1xf32> to vector<32x32xf32>
    %141 = arith.mulf %136, %140 : vector<32x32xf32>
    %142 = vector.broadcast %122 : vector<1x32xf32> to vector<32x32xf32>
    %143 = arith.mulf %141, %142 : vector<32x32xf32>
    %144 = vector.broadcast %123 : vector<1x32xf32> to vector<32x32xf32>
    %145 = arith.addf %143, %144 : vector<32x32xf32>
    %146 = arith.truncf %145 : vector<32x32xf32> to vector<32x32xbf16>
    %c0_59 = arith.constant 0 : index
    %c0_60 = arith.constant 0 : index
    %147 = vector.load %arg8[%c0_59, %c0_60] : memref<32x64xbf16, #tpu.memory_space<vmem>>, vector<32x64xbf16>
    %cst_61 = arith.constant dense<0.000000e+00> : vector<32x64xf32>
    %148 = tpu.matmul %146, %147, %cst_61 {dimension_numbers = #tpu.dot_dimension_numbers<[1], [0], [0], [1], [0, 0, 1, 1], [], []>} : vector<32x32xbf16>, vector<32x64xbf16>, vector<32x64xf32> -> vector<32x64xf32>
    %149 = arith.truncf %148 : vector<32x64xf32> to vector<32x64xbf16>
    %c0_62 = arith.constant 0 : index
    %c0_63 = arith.constant 0 : index
    %150 = vector.load %arg9[%c0_62, %c0_63] : memref<32x64xbf16, #tpu.memory_space<vmem>>, vector<32x64xbf16>
    tpu.vector_store %arg9[%c0_62, %c0_63], %149 {strides = array<i32>} : memref<32x64xbf16, #tpu.memory_space<vmem>>, vector<32x64xbf16>,
    return
  }
  func.func @transform_0(%arg0: i32) -> (i32, i32, i32) {
    %c0_i32 = arith.constant 0 : i32
    %c0_i32_0 = arith.constant 0 : i32
    %c0_i32_1 = arith.constant 0 : i32
    return %arg0, %c0_i32, %c0_i32_0 : i32, i32, i32
  }
  func.func @transform_1(%arg0: i32) -> (i32, i32) {
    %c0_i32 = arith.constant 0 : i32
    %c0_i32_0 = arith.constant 0 : i32
    %c0_i32_1 = arith.constant 0 : i32
    return %c0_i32, %c0_i32_0 : i32, i32
  }
  func.func @transform_2(%arg0: i32) -> (i32, i32) {
    %c0_i32 = arith.constant 0 : i32
    %c0_i32_0 = arith.constant 0 : i32
    %c0_i32_1 = arith.constant 0 : i32
    return %c0_i32, %c0_i32_0 : i32, i32
  }
  func.func @transform_3(%arg0: i32) -> (i32, i32, i32) {
    %c0_i32 = arith.constant 0 : i32
    %c0_i32_0 = arith.constant 0 : i32
    %c0_i32_1 = arith.constant 0 : i32
    %c0_i32_2 = arith.constant 0 : i32
    return %c0_i32, %c0_i32_0, %c0_i32_1 : i32, i32, i32
  }
  func.func @transform_4(%arg0: i32) -> (i32, i32) {
    %c0_i32 = arith.constant 0 : i32
    %c0_i32_0 = arith.constant 0 : i32
    %c0_i32_1 = arith.constant 0 : i32
    return %c0_i32, %c0_i32_0 : i32, i32
  }
  func.func @transform_5(%arg0: i32) -> (i32, i32) {
    %c0_i32 = arith.constant 0 : i32
    %c0_i32_0 = arith.constant 0 : i32
    %c0_i32_1 = arith.constant 0 : i32
    return %c0_i32, %c0_i32_0 : i32, i32
  }
  func.func @transform_6(%arg0: i32) -> (i32, i32) {
    %c0_i32 = arith.constant 0 : i32
    %c0_i32_0 = arith.constant 0 : i32
    %c0_i32_1 = arith.constant 0 : i32
    return %c0_i32, %c0_i32_0 : i32, i32
  }
  func.func @transform_7(%arg0: i32) -> (i32, i32) {
    %c0_i32 = arith.constant 0 : i32
    %c0_i32_0 = arith.constant 0 : i32
    %c0_i32_1 = arith.constant 0 : i32
    return %c0_i32, %c0_i32_0 : i32, i32
  }
  func.func @transform_8(%arg0: i32) -> (i32, i32) {
    %c0_i32 = arith.constant 0 : i32
    %c0_i32_0 = arith.constant 0 : i32
    return %arg0, %c0_i32 : i32, i32
  }
}

module attributes {stable_mosaic.version = 11 : i64} {
  func.func @attn_fused_kernel(%arg0: i32, %arg1: i32, %arg2: memref<1x64x32xf32, #tpu.memory_space<vmem>>, %arg3: memref<1x32xf32, #tpu.memory_space<vmem>>, %arg4: memref<1x32xf32, #tpu.memory_space<vmem>>, %arg5: memref<32x32xbf16, #tpu.memory_space<vmem>>, %arg6: memref<1x16x64xbf16, #tpu.memory_space<vmem>>, %arg7: memref<32x32xbf16, #tpu.memory_space<vmem>>, %arg8: memref<1x32xf32, #tpu.memory_space<vmem>>, %arg9: memref<1x64x32xf32, #tpu.memory_space<vmem>>) attributes {dimension_semantics = [#tpu.dimension_semantics<parallel>, #tpu.dimension_semantics<parallel>], iteration_bounds = array<i64: 2, 1>, scalar_prefetch = 0 : i64, scratch_operands = 0 : i64, tpu.core_type = #tpu.core_type<tc>, window_params = [{transform_indices = @transform_0, window_bounds = array<i64: 1, 64, 32>}, {pipeline_mode = #tpu.pipeline_mode<synchronous>, transform_indices = @transform_1, window_bounds = array<i64: 1, 32>}, {pipeline_mode = #tpu.pipeline_mode<synchronous>, transform_indices = @transform_2, window_bounds = array<i64: 1, 32>}, {pipeline_mode = #tpu.pipeline_mode<synchronous>, transform_indices = @transform_3, window_bounds = array<i64: 32, 32>}, {transform_indices = @transform_4, window_bounds = array<i64: 1, 16, 64>}, {pipeline_mode = #tpu.pipeline_mode<synchronous>, transform_indices = @transform_5, window_bounds = array<i64: 32, 32>}, {pipeline_mode = #tpu.pipeline_mode<synchronous>, transform_indices = @transform_6, window_bounds = array<i64: 1, 32>}, {transform_indices = @transform_7, window_bounds = array<i64: 1, 64, 32>}]} {
    %c0 = arith.constant 0 : index
    %c0_0 = arith.constant 0 : index
    %c0_1 = arith.constant 0 : index
    %0 = vector.load %arg2[%c0, %c0_0, %c0_1] : memref<1x64x32xf32, #tpu.memory_space<vmem>>, vector<1x64x32xf32>
    %1 = vector.shape_cast %0 : vector<1x64x32xf32> to vector<64x32xf32>
    %c0_2 = arith.constant 0 : index
    %c0_3 = arith.constant 0 : index
    %2 = vector.load %arg3[%c0_2, %c0_3] : memref<1x32xf32, #tpu.memory_space<vmem>>, vector<1x32xf32>
    %c0_4 = arith.constant 0 : index
    %c0_5 = arith.constant 0 : index
    %3 = vector.load %arg4[%c0_4, %c0_5] : memref<1x32xf32, #tpu.memory_space<vmem>>, vector<1x32xf32>
    %cst = arith.constant dense<0.000000e+00> : vector<64xf32>
    %4 = vector.multi_reduction <add>, %1, %cst [1] : vector<64x32xf32> to vector<64xf32>
    %5 = vector.shape_cast %4 : vector<64xf32> to vector<64x1xf32>
    %cst_6 = arith.constant 3.200000e+01 : f32
    %6 = vector.broadcast %cst_6 : f32 to vector<64x1xf32>
    %7 = arith.divf %5, %6 : vector<64x1xf32>
    %8 = vector.broadcast %7 : vector<64x1xf32> to vector<64x32xf32>
    %9 = arith.subf %1, %8 : vector<64x32xf32>
    %10 = arith.mulf %9, %9 : vector<64x32xf32>
    %cst_7 = arith.constant dense<0.000000e+00> : vector<64xf32>
    %11 = vector.multi_reduction <add>, %10, %cst_7 [1] : vector<64x32xf32> to vector<64xf32>
    %12 = vector.shape_cast %11 : vector<64xf32> to vector<64x1xf32>
    %cst_8 = arith.constant 3.200000e+01 : f32
    %13 = vector.broadcast %cst_8 : f32 to vector<64x1xf32>
    %14 = arith.divf %12, %13 : vector<64x1xf32>
    %15 = vector.broadcast %7 : vector<64x1xf32> to vector<64x32xf32>
    %16 = arith.subf %1, %15 : vector<64x32xf32>
    %cst_9 = arith.constant 9.99999974E-6 : f32
    %17 = vector.broadcast %cst_9 : f32 to vector<64x1xf32>
    %18 = arith.addf %14, %17 : vector<64x1xf32>
    %19 = math.rsqrt %18 : vector<64x1xf32>
    %20 = vector.broadcast %19 : vector<64x1xf32> to vector<64x32xf32>
    %21 = arith.mulf %16, %20 : vector<64x32xf32>
    %22 = vector.broadcast %2 : vector<1x32xf32> to vector<64x32xf32>
    %23 = arith.mulf %21, %22 : vector<64x32xf32>
    %24 = vector.broadcast %3 : vector<1x32xf32> to vector<64x32xf32>
    %25 = arith.addf %23, %24 : vector<64x32xf32>
    %26 = arith.truncf %25 : vector<64x32xf32> to vector<64x32xbf16>
    %c0_10 = arith.constant 0 : index
    %c0_11 = arith.constant 0 : index
    %27 = vector.load %arg5[%c0_10, %c0_11] : memref<32x32xbf16, #tpu.memory_space<vmem>>, vector<32x32xbf16>
    %cst_12 = arith.constant dense<0.000000e+00> : vector<64x32xf32>
    %28 = tpu.matmul %26, %27, %cst_12 {dimension_numbers = #tpu.dot_dimension_numbers<[1], [0], [0], [1], [0, 0, 1, 1], [], []>} : vector<64x32xbf16>, vector<32x32xbf16>, vector<64x32xf32> -> vector<64x32xf32>
    %29 = vector.extract_strided_slice %28 {offsets = [0, 0], sizes = [64, 16], strides = [1, 1]} : vector<64x32xf32> to vector<64x16xf32>
    %30 = arith.truncf %29 : vector<64x16xf32> to vector<64x16xbf16>
    %c0_13 = arith.constant 0 : index
    %c0_14 = arith.constant 0 : index
    %c0_15 = arith.constant 0 : index
    %31 = vector.load %arg6[%c0_13, %c0_14, %c0_15] : memref<1x16x64xbf16, #tpu.memory_space<vmem>>, vector<1x16x16xbf16>
    %32 = vector.shape_cast %31 : vector<1x16x16xbf16> to vector<16x16xbf16>
    %c0_16 = arith.constant 0 : index
    %c0_17 = arith.constant 0 : index
    %c32 = arith.constant 32 : index
    %33 = vector.load %arg6[%c0_16, %c0_17, %c32] : memref<1x16x64xbf16, #tpu.memory_space<vmem>>, vector<1x16x16xbf16>
    %34 = vector.shape_cast %33 : vector<1x16x16xbf16> to vector<16x16xbf16>
    %cst_18 = arith.constant dense<0.000000e+00> : vector<64x16xf32>
    %35 = tpu.matmul %30, %32, %cst_18 {dimension_numbers = #tpu.dot_dimension_numbers<[1], [1], [0], [0], [0, 0, 1, 0], [], []>} : vector<64x16xbf16>, vector<16x16xbf16>, vector<64x16xf32> -> vector<64x16xf32>
    %cst_19 = arith.constant dense<0xFF800000> : vector<64xf32>
    %36 = vector.multi_reduction <maximumf>, %35, %cst_19 [1] : vector<64x16xf32> to vector<64xf32>
    %37 = vector.shape_cast %36 : vector<64xf32> to vector<64x1xf32>
    %38 = vector.broadcast %37 : vector<64x1xf32> to vector<64x16xf32>
    %39 = arith.subf %35, %38 : vector<64x16xf32>
    %40 = math.exp %39 : vector<64x16xf32>
    %cst_20 = arith.constant dense<0.000000e+00> : vector<64xf32>
    %41 = vector.multi_reduction <add>, %40, %cst_20 [1] : vector<64x16xf32> to vector<64xf32>
    %42 = vector.shape_cast %41 : vector<64xf32> to vector<64x1xf32>
    %43 = arith.truncf %40 : vector<64x16xf32> to vector<64x16xbf16>
    %cst_21 = arith.constant dense<0.000000e+00> : vector<64x16xf32>
    %44 = tpu.matmul %43, %34, %cst_21 {dimension_numbers = #tpu.dot_dimension_numbers<[1], [0], [0], [1], [0, 0, 1, 1], [], []>} : vector<64x16xbf16>, vector<16x16xbf16>, vector<64x16xf32> -> vector<64x16xf32>
    %45 = tpu.reciprocal %42 {approx = true} : vector<64x1xf32> -> vector<64x1xf32>
    %46 = vector.broadcast %45 : vector<64x1xf32> to vector<64x16xf32>
    %47 = arith.mulf %44, %46 : vector<64x16xf32>
    %48 = vector.extract_strided_slice %28 {offsets = [0, 16], sizes = [64, 16], strides = [1, 1]} : vector<64x32xf32> to vector<64x16xf32>
    %49 = arith.truncf %48 : vector<64x16xf32> to vector<64x16xbf16>
    %c0_22 = arith.constant 0 : index
    %c0_23 = arith.constant 0 : index
    %c16 = arith.constant 16 : index
    %50 = vector.load %arg6[%c0_22, %c0_23, %c16] : memref<1x16x64xbf16, #tpu.memory_space<vmem>>, vector<1x16x16xbf16>
    %51 = vector.shape_cast %50 : vector<1x16x16xbf16> to vector<16x16xbf16>
    %c0_24 = arith.constant 0 : index
    %c0_25 = arith.constant 0 : index
    %c48 = arith.constant 48 : index
    %52 = vector.load %arg6[%c0_24, %c0_25, %c48] : memref<1x16x64xbf16, #tpu.memory_space<vmem>>, vector<1x16x16xbf16>
    %53 = vector.shape_cast %52 : vector<1x16x16xbf16> to vector<16x16xbf16>
    %cst_26 = arith.constant dense<0.000000e+00> : vector<64x16xf32>
    %54 = tpu.matmul %49, %51, %cst_26 {dimension_numbers = #tpu.dot_dimension_numbers<[1], [1], [0], [0], [0, 0, 1, 0], [], []>} : vector<64x16xbf16>, vector<16x16xbf16>, vector<64x16xf32> -> vector<64x16xf32>
    %cst_27 = arith.constant dense<0xFF800000> : vector<64xf32>
    %55 = vector.multi_reduction <maximumf>, %54, %cst_27 [1] : vector<64x16xf32> to vector<64xf32>
    %56 = vector.shape_cast %55 : vector<64xf32> to vector<64x1xf32>
    %57 = vector.broadcast %56 : vector<64x1xf32> to vector<64x16xf32>
    %58 = arith.subf %54, %57 : vector<64x16xf32>
    %59 = math.exp %58 : vector<64x16xf32>
    %cst_28 = arith.constant dense<0.000000e+00> : vector<64xf32>
    %60 = vector.multi_reduction <add>, %59, %cst_28 [1] : vector<64x16xf32> to vector<64xf32>
    %61 = vector.shape_cast %60 : vector<64xf32> to vector<64x1xf32>
    %62 = arith.truncf %59 : vector<64x16xf32> to vector<64x16xbf16>
    %cst_29 = arith.constant dense<0.000000e+00> : vector<64x16xf32>
    %63 = tpu.matmul %62, %53, %cst_29 {dimension_numbers = #tpu.dot_dimension_numbers<[1], [0], [0], [1], [0, 0, 1, 1], [], []>} : vector<64x16xbf16>, vector<16x16xbf16>, vector<64x16xf32> -> vector<64x16xf32>
    %64 = tpu.reciprocal %61 {approx = true} : vector<64x1xf32> -> vector<64x1xf32>
    %65 = vector.broadcast %64 : vector<64x1xf32> to vector<64x16xf32>
    %66 = arith.mulf %63, %65 : vector<64x16xf32>
    %67 = tpu.concatenate %47, %66 in 1 : vector<64x16xf32>, vector<64x16xf32> -> vector<64x32xf32>
    %68 = arith.truncf %67 : vector<64x32xf32> to vector<64x32xbf16>
    %c0_30 = arith.constant 0 : index
    %c0_31 = arith.constant 0 : index
    %69 = vector.load %arg7[%c0_30, %c0_31] : memref<32x32xbf16, #tpu.memory_space<vmem>>, vector<32x32xbf16>
    %cst_32 = arith.constant dense<0.000000e+00> : vector<64x32xf32>
    %70 = tpu.matmul %68, %69, %cst_32 {dimension_numbers = #tpu.dot_dimension_numbers<[1], [0], [0], [1], [0, 0, 1, 1], [], []>} : vector<64x32xbf16>, vector<32x32xbf16>, vector<64x32xf32> -> vector<64x32xf32>
    %71 = arith.addf %1, %70 : vector<64x32xf32>
    %c0_33 = arith.constant 0 : index
    %c0_34 = arith.constant 0 : index
    %72 = vector.load %arg8[%c0_33, %c0_34] : memref<1x32xf32, #tpu.memory_space<vmem>>, vector<1x32xf32>
    %73 = vector.broadcast %72 : vector<1x32xf32> to vector<64x32xf32>
    %74 = arith.addf %71, %73 : vector<64x32xf32>
    %c0_35 = arith.constant 0 : index
    %c0_36 = arith.constant 0 : index
    %c0_37 = arith.constant 0 : index
    %75 = vector.load %arg9[%c0_35, %c0_36, %c0_37] : memref<1x64x32xf32, #tpu.memory_space<vmem>>, vector<1x64x32xf32>
    %76 = vector.shape_cast %75 : vector<1x64x32xf32> to vector<64x32xf32>
    %77 = vector.shape_cast %74 : vector<64x32xf32> to vector<1x64x32xf32>
    tpu.vector_store %arg9[%c0_35, %c0_36, %c0_37], %77 {strides = array<i32>} : memref<1x64x32xf32, #tpu.memory_space<vmem>>, vector<1x64x32xf32>,
    return
  }
  func.func @transform_0(%arg0: i32, %arg1: i32) -> (i32, i32, i32) {
    %c0_i32 = arith.constant 0 : i32
    %c0_i32_0 = arith.constant 0 : i32
    return %arg0, %arg1, %c0_i32 : i32, i32, i32
  }
  func.func @transform_1(%arg0: i32, %arg1: i32) -> (i32, i32) {
    %c0_i32 = arith.constant 0 : i32
    %c0_i32_0 = arith.constant 0 : i32
    %c0_i32_1 = arith.constant 0 : i32
    return %c0_i32, %c0_i32_0 : i32, i32
  }
  func.func @transform_2(%arg0: i32, %arg1: i32) -> (i32, i32) {
    %c0_i32 = arith.constant 0 : i32
    %c0_i32_0 = arith.constant 0 : i32
    %c0_i32_1 = arith.constant 0 : i32
    return %c0_i32, %c0_i32_0 : i32, i32
  }
  func.func @transform_3(%arg0: i32, %arg1: i32) -> (i32, i32) {
    %c0_i32 = arith.constant 0 : i32
    %c0_i32_0 = arith.constant 0 : i32
    %c0_i32_1 = arith.constant 0 : i32
    return %c0_i32, %c0_i32_0 : i32, i32
  }
  func.func @transform_4(%arg0: i32, %arg1: i32) -> (i32, i32, i32) {
    %c0_i32 = arith.constant 0 : i32
    %c0_i32_0 = arith.constant 0 : i32
    %c0_i32_1 = arith.constant 0 : i32
    return %arg0, %c0_i32, %c0_i32_0 : i32, i32, i32
  }
  func.func @transform_5(%arg0: i32, %arg1: i32) -> (i32, i32) {
    %c0_i32 = arith.constant 0 : i32
    %c0_i32_0 = arith.constant 0 : i32
    %c0_i32_1 = arith.constant 0 : i32
    return %c0_i32, %c0_i32_0 : i32, i32
  }
  func.func @transform_6(%arg0: i32, %arg1: i32) -> (i32, i32) {
    %c0_i32 = arith.constant 0 : i32
    %c0_i32_0 = arith.constant 0 : i32
    %c0_i32_1 = arith.constant 0 : i32
    return %c0_i32, %c0_i32_0 : i32, i32
  }
  func.func @transform_7(%arg0: i32, %arg1: i32) -> (i32, i32, i32) {
    %c0_i32 = arith.constant 0 : i32
    %c0_i32_0 = arith.constant 0 : i32
    return %arg0, %arg1, %c0_i32 : i32, i32, i32
  }
}

module attributes {stable_mosaic.version = 11 : i64} {
  func.func @ln_mlp_residual_kernel(%arg0: i32, %arg1: memref<128x32xf32, #tpu.memory_space<vmem>>, %arg2: memref<1x32xf32, #tpu.memory_space<vmem>>, %arg3: memref<1x32xf32, #tpu.memory_space<vmem>>, %arg4: memref<32x128xbf16, #tpu.memory_space<vmem>>, %arg5: memref<1x128xf32, #tpu.memory_space<vmem>>, %arg6: memref<128x32xbf16, #tpu.memory_space<vmem>>, %arg7: memref<1x32xf32, #tpu.memory_space<vmem>>, %arg8: memref<128x32xf32, #tpu.memory_space<vmem>>) attributes {dimension_semantics = [#tpu.dimension_semantics<parallel>], iteration_bounds = array<i64: 1>, scalar_prefetch = 0 : i64, scratch_operands = 0 : i64, tpu.core_type = #tpu.core_type<tc>, window_params = [{transform_indices = @transform_0, window_bounds = array<i64: 128, 32>}, {pipeline_mode = #tpu.pipeline_mode<synchronous>, transform_indices = @transform_1, window_bounds = array<i64: 1, 32>}, {pipeline_mode = #tpu.pipeline_mode<synchronous>, transform_indices = @transform_2, window_bounds = array<i64: 1, 32>}, {pipeline_mode = #tpu.pipeline_mode<synchronous>, transform_indices = @transform_3, window_bounds = array<i64: 32, 128>}, {pipeline_mode = #tpu.pipeline_mode<synchronous>, transform_indices = @transform_4, window_bounds = array<i64: 1, 128>}, {pipeline_mode = #tpu.pipeline_mode<synchronous>, transform_indices = @transform_5, window_bounds = array<i64: 128, 32>}, {pipeline_mode = #tpu.pipeline_mode<synchronous>, transform_indices = @transform_6, window_bounds = array<i64: 1, 32>}, {transform_indices = @transform_7, window_bounds = array<i64: 128, 32>}]} {
    %c0 = arith.constant 0 : index
    %c0_0 = arith.constant 0 : index
    %0 = vector.load %arg1[%c0, %c0_0] : memref<128x32xf32, #tpu.memory_space<vmem>>, vector<128x32xf32>
    %c0_1 = arith.constant 0 : index
    %c0_2 = arith.constant 0 : index
    %1 = vector.load %arg2[%c0_1, %c0_2] : memref<1x32xf32, #tpu.memory_space<vmem>>, vector<1x32xf32>
    %c0_3 = arith.constant 0 : index
    %c0_4 = arith.constant 0 : index
    %2 = vector.load %arg3[%c0_3, %c0_4] : memref<1x32xf32, #tpu.memory_space<vmem>>, vector<1x32xf32>
    %cst = arith.constant dense<0.000000e+00> : vector<128xf32>
    %3 = vector.multi_reduction <add>, %0, %cst [1] : vector<128x32xf32> to vector<128xf32>
    %4 = vector.shape_cast %3 : vector<128xf32> to vector<128x1xf32>
    %cst_5 = arith.constant 3.200000e+01 : f32
    %5 = vector.broadcast %cst_5 : f32 to vector<128x1xf32>
    %6 = arith.divf %4, %5 : vector<128x1xf32>
    %7 = vector.broadcast %6 : vector<128x1xf32> to vector<128x32xf32>
    %8 = arith.subf %0, %7 : vector<128x32xf32>
    %9 = arith.mulf %8, %8 : vector<128x32xf32>
    %cst_6 = arith.constant dense<0.000000e+00> : vector<128xf32>
    %10 = vector.multi_reduction <add>, %9, %cst_6 [1] : vector<128x32xf32> to vector<128xf32>
    %11 = vector.shape_cast %10 : vector<128xf32> to vector<128x1xf32>
    %cst_7 = arith.constant 3.200000e+01 : f32
    %12 = vector.broadcast %cst_7 : f32 to vector<128x1xf32>
    %13 = arith.divf %11, %12 : vector<128x1xf32>
    %14 = vector.broadcast %6 : vector<128x1xf32> to vector<128x32xf32>
    %15 = arith.subf %0, %14 : vector<128x32xf32>
    %cst_8 = arith.constant 9.99999974E-6 : f32
    %16 = vector.broadcast %cst_8 : f32 to vector<128x1xf32>
    %17 = arith.addf %13, %16 : vector<128x1xf32>
    %18 = math.rsqrt %17 : vector<128x1xf32>
    %19 = vector.broadcast %18 : vector<128x1xf32> to vector<128x32xf32>
    %20 = arith.mulf %15, %19 : vector<128x32xf32>
    %21 = vector.broadcast %1 : vector<1x32xf32> to vector<128x32xf32>
    %22 = arith.mulf %20, %21 : vector<128x32xf32>
    %23 = vector.broadcast %2 : vector<1x32xf32> to vector<128x32xf32>
    %24 = arith.addf %22, %23 : vector<128x32xf32>
    %25 = arith.truncf %24 : vector<128x32xf32> to vector<128x32xbf16>
    %c0_9 = arith.constant 0 : index
    %c0_10 = arith.constant 0 : index
    %26 = vector.load %arg4[%c0_9, %c0_10] : memref<32x128xbf16, #tpu.memory_space<vmem>>, vector<32x128xbf16>
    %cst_11 = arith.constant dense<0.000000e+00> : vector<128x128xf32>
    %27 = tpu.matmul %25, %26, %cst_11 {dimension_numbers = #tpu.dot_dimension_numbers<[1], [0], [0], [1], [0, 0, 1, 1], [], []>} : vector<128x32xbf16>, vector<32x128xbf16>, vector<128x128xf32> -> vector<128x128xf32>
    %c0_12 = arith.constant 0 : index
    %c0_13 = arith.constant 0 : index
    %28 = vector.load %arg5[%c0_12, %c0_13] : memref<1x128xf32, #tpu.memory_space<vmem>>, vector<1x128xf32>
    %29 = vector.broadcast %28 : vector<1x128xf32> to vector<128x128xf32>
    %30 = arith.addf %27, %29 : vector<128x128xf32>
    %cst_14 = arith.constant 5.000000e-01 : f32
    %31 = vector.broadcast %cst_14 : f32 to vector<128x128xf32>
    %32 = arith.mulf %31, %30 : vector<128x128xf32>
    %cst_15 = arith.constant 0.707106769 : f32
    %33 = vector.broadcast %cst_15 : f32 to vector<128x128xf32>
    %34 = arith.mulf %30, %33 : vector<128x128xf32>
    %35 = math.erf %34 : vector<128x128xf32>
    %cst_16 = arith.constant 1.000000e+00 : f32
    %36 = vector.broadcast %cst_16 : f32 to vector<128x128xf32>
    %37 = arith.addf %36, %35 : vector<128x128xf32>
    %38 = arith.mulf %32, %37 : vector<128x128xf32>
    %39 = arith.truncf %38 : vector<128x128xf32> to vector<128x128xbf16>
    %c0_17 = arith.constant 0 : index
    %c0_18 = arith.constant 0 : index
    %40 = vector.load %arg6[%c0_17, %c0_18] : memref<128x32xbf16, #tpu.memory_space<vmem>>, vector<128x32xbf16>
    %cst_19 = arith.constant dense<0.000000e+00> : vector<128x32xf32>
    %41 = tpu.matmul %39, %40, %cst_19 {dimension_numbers = #tpu.dot_dimension_numbers<[1], [0], [0], [1], [0, 0, 1, 1], [], []>} : vector<128x128xbf16>, vector<128x32xbf16>, vector<128x32xf32> -> vector<128x32xf32>
    %42 = arith.addf %0, %41 : vector<128x32xf32>
    %c0_20 = arith.constant 0 : index
    %c0_21 = arith.constant 0 : index
    %43 = vector.load %arg7[%c0_20, %c0_21] : memref<1x32xf32, #tpu.memory_space<vmem>>, vector<1x32xf32>
    %44 = vector.broadcast %43 : vector<1x32xf32> to vector<128x32xf32>
    %45 = arith.addf %42, %44 : vector<128x32xf32>
    %c0_22 = arith.constant 0 : index
    %c0_23 = arith.constant 0 : index
    %46 = vector.load %arg8[%c0_22, %c0_23] : memref<128x32xf32, #tpu.memory_space<vmem>>, vector<128x32xf32>
    tpu.vector_store %arg8[%c0_22, %c0_23], %45 {strides = array<i32>} : memref<128x32xf32, #tpu.memory_space<vmem>>, vector<128x32xf32>,
    return
  }
  func.func @transform_0(%arg0: i32) -> (i32, i32) {
    %c0_i32 = arith.constant 0 : i32
    %c0_i32_0 = arith.constant 0 : i32
    return %arg0, %c0_i32 : i32, i32
  }
  func.func @transform_1(%arg0: i32) -> (i32, i32) {
    %c0_i32 = arith.constant 0 : i32
    %c0_i32_0 = arith.constant 0 : i32
    %c0_i32_1 = arith.constant 0 : i32
    return %c0_i32, %c0_i32_0 : i32, i32
  }
  func.func @transform_2(%arg0: i32) -> (i32, i32) {
    %c0_i32 = arith.constant 0 : i32
    %c0_i32_0 = arith.constant 0 : i32
    %c0_i32_1 = arith.constant 0 : i32
    return %c0_i32, %c0_i32_0 : i32, i32
  }
  func.func @transform_3(%arg0: i32) -> (i32, i32) {
    %c0_i32 = arith.constant 0 : i32
    %c0_i32_0 = arith.constant 0 : i32
    %c0_i32_1 = arith.constant 0 : i32
    return %c0_i32, %c0_i32_0 : i32, i32
  }
  func.func @transform_4(%arg0: i32) -> (i32, i32) {
    %c0_i32 = arith.constant 0 : i32
    %c0_i32_0 = arith.constant 0 : i32
    %c0_i32_1 = arith.constant 0 : i32
    return %c0_i32, %c0_i32_0 : i32, i32
  }
  func.func @transform_5(%arg0: i32) -> (i32, i32) {
    %c0_i32 = arith.constant 0 : i32
    %c0_i32_0 = arith.constant 0 : i32
    %c0_i32_1 = arith.constant 0 : i32
    return %c0_i32, %c0_i32_0 : i32, i32
  }
  func.func @transform_6(%arg0: i32) -> (i32, i32) {
    %c0_i32 = arith.constant 0 : i32
    %c0_i32_0 = arith.constant 0 : i32
    %c0_i32_1 = arith.constant 0 : i32
    return %c0_i32, %c0_i32_0 : i32, i32
  }
  func.func @transform_7(%arg0: i32) -> (i32, i32) {
    %c0_i32 = arith.constant 0 : i32
    %c0_i32_0 = arith.constant 0 : i32
    return %arg0, %c0_i32 : i32, i32
  }
}

</mosaic_0001>

<bundles_post_ra>
// kernel: encode_block_forward.5
= control target key start
LH: loop header
LB: loop body
LE: loop exit
PB: predicated region body
PF: predicated region fallthrough
CT: control target
= control target key end

     0   :  { %vm45_vm0 = vcmask 261120   ;;  %s1469_s0 = inlined_call_operand.vmem [shape: f32[128,32], index: 0, kind: input, shape index: {}]   ;;  %s1470_s3 = inlined_call_operand.vmem [shape: bf16[32,128], index: 3, kind: input, shape index: {}]   ;;  %s1471_s1 = inlined_call_operand.vmem [shape: f32[1,32], index: 1, kind: input, shape index: {}]   ;;  %s1472_s2 = inlined_call_operand.vmem [shape: f32[1,32], index: 2, kind: input, shape index: {}]   ;;  %s1473_s5 = inlined_call_operand.vmem [shape: bf16[128,32], index: 5, kind: input, shape index: {}]   ;;  %s1474_s4 = inlined_call_operand.vmem [shape: f32[1,128], index: 4, kind: input, shape index: {}]   ;;  %s1475_s6 = inlined_call_operand.vmem [shape: f32[1,32], index: 6, kind: input, shape index: {}]   ;;  %s1476_s7 = inlined_call_operand.vmem [shape: f32[128,32], index: 7, kind: output, shape index: {}]  }
   0x1   :  { %v27_v0 = vld [vmem:[%s1469_s0] sm:$0xff]  ;;  %v1009_v1 = vld [vmem:[%s1469_s0 + $0x10] sm:$0xff]  ;;  %v28_v2 = vld [vmem:[%s1469_s0 + $0x8] sm:$0xff] }
   0x2   :  { %v46_v3 = vsel %vm45_vm0, %v27_v0, 0.0  ;;  %v52_v4 = vsel %vm45_vm0, %v1009_v1, 0.0  ;;  %v30_v5 = vld [vmem:[%s1469_s0 + $0x18] sm:$0xff]  ;;  %v49_v6 = vsel %vm45_vm0, %v28_v2, 0.0  ;;  %v31_v8 = vld [vmem:[%s1469_s0 + $0x20] sm:$0xff]  ;;  %v32_v9 = vld [vmem:[%s1469_s0 + $0x28] sm:$0xff] }
   0x3   :  { %47 = vadd.xlane.f32.xlu0 %v46_v3  ;;  %53 = vadd.xlane.f32.xlu1 %v52_v4  ;;  %v55_v7 = vsel %vm45_vm0, %v30_v5, 0.0  ;;  %v58_v10 = vsel %vm45_vm0, %v31_v8, 0.0  ;;  %v61_v11 = vsel %vm45_vm0, %v32_v9, 0.0  ;;  %v1033_v12 = vld [vmem:[%s1469_s0 + $0x30] sm:$0xff]  ;;  %v1038_v13 = vld [vmem:[%s1469_s0 + $0x38] sm:$0xff]  ;;  %v1047_v16 = vld [vmem:[%s1469_s0 + $0x40] sm:$0xff] }
   0x4   :  { %v64_v14 = vsel %vm45_vm0, %v1033_v12, 0.0  ;;  %v67_v15 = vsel %vm45_vm0, %v1038_v13, 0.0  ;;  %v1052_v17 = vld [vmem:[%s1469_s0 + $0x48] sm:$0xff]  ;;  %v70_v18 = vsel %vm45_vm0, %v1047_v16, 0.0  ;;  %v1061_v20 = vld [vmem:[%s1469_s0 + $0x50] sm:$0xff]  ;;  %v1066_v21 = vld [vmem:[%s1469_s0 + $0x58] sm:$0xff] }
   0x5   :  { %v73_v19 = vsel %vm45_vm0, %v1052_v17, 0.0  ;;  %v76_v22 = vsel %vm45_vm0, %v1061_v20, 0.0  ;;  %v79_v23 = vsel %vm45_vm0, %v1066_v21, 0.0  ;;  %v1075_v24 = vld [vmem:[%s1469_s0 + $0x60] sm:$0xff]  ;;  %v1080_v25 = vld [vmem:[%s1469_s0 + $0x68] sm:$0xff]  ;;  %v1089_v28 = vld [vmem:[%s1469_s0 + $0x70] sm:$0xff] }
   0x6   :  { %v82_v26 = vsel %vm45_vm0, %v1075_v24, 0.0  ;;  %v85_v27 = vsel %vm45_vm0, %v1080_v25, 0.0  ;;  %v1094_v29 = vld [vmem:[%s1469_s0 + $0x78] sm:$0xff]  ;;  %v88_v30 = vsel %vm45_vm0, %v1089_v28, 0.0 }
   0x7   :  { %50 = vadd.xlane.f32.xlu0 %v49_v6  ;;  %56 = vadd.xlane.f32.xlu1 %v55_v7  ;;  %v91_v31 = vsel %vm45_vm0, %v1094_v29, 0.0 }
   0xb   :  { %59 = vadd.xlane.f32.xlu0 %v58_v10  ;;  %62 = vadd.xlane.f32.xlu1 %v61_v11 }
   0xf   :  { %65 = vadd.xlane.f32.xlu0 %v64_v14  ;;  %68 = vadd.xlane.f32.xlu1 %v67_v15 }
  0x13   :  { %71 = vadd.xlane.f32.xlu0 %v70_v18  ;;  %74 = vadd.xlane.f32.xlu1 %v73_v19 }
  0x17   :  { %77 = vadd.xlane.f32.xlu0 %v76_v22  ;;  %80 = vadd.xlane.f32.xlu1 %v79_v23 }
  0x1b   :  { %83 = vadd.xlane.f32.xlu0 %v82_v26  ;;  %86 = vadd.xlane.f32.xlu1 %v85_v27 }
  0x1f   :  { %89 = vadd.xlane.f32.xlu0 %v88_v30  ;;  %92 = vadd.xlane.f32.xlu1 %v91_v31 }
  0x8c   :  { %v48_v32 = vpop.xlane.xlu0 %47  ;;  %v54_v33 = vpop.xlane.xlu1 %53 }
  0x8d   :  { %v95_v34 = vmul.f32 0.03125, %v48_v32  ;;  %v97_v35 = vmul.f32 0.03125, %v54_v33 }
  0x8f   :  { %v1100_v36 = vsub.f32 %v27_v0, %v95_v34  ;;  %v1103_v37 = vsub.f32 %v1009_v1, %v97_v35 }
  0x90   :  { %v51_v38 = vpop.xlane.xlu0 %50  ;;  %v57_v39 = vpop.xlane.xlu1 %56 }
  0x91   :  { %v96_v40 = vmul.f32 0.03125, %v51_v38  ;;  %v98_v41 = vmul.f32 0.03125, %v57_v39  ;;  %v127_v42 = vmul.f32 %v1100_v36, %v1100_v36  ;;  %v129_v43 = vmul.f32 %v1103_v37, %v1103_v37 }
  0x93   :  { %v1109_v44 = vsub.f32 %v28_v2, %v96_v40  ;;  %v1111_v45 = vsub.f32 %v30_v5, %v98_v41  ;;  %v143_v46 = vsel %vm45_vm0, %v127_v42, 0.0  ;;  %v149_v49 = vsel %vm45_vm0, %v129_v43, 0.0 }
  0x94   :  { %144 = vadd.xlane.f32.xlu0 %v143_v46  ;;  %v60_v47 = vpop.xlane.xlu0 %59  ;;  %v63_v48 = vpop.xlane.xlu1 %62 }
  0x95   :  { %v99_v50 = vmul.f32 0.03125, %v60_v47  ;;  %v100_v51 = vmul.f32 0.03125, %v63_v48  ;;  %v128_v52 = vmul.f32 %v1109_v44, %v1109_v44  ;;  %v130_v53 = vmul.f32 %v1111_v45, %v1111_v45 }
  0x97   :  { %v1119_v54 = vsub.f32 %v31_v8, %v99_v50  ;;  %v1121_v55 = vsub.f32 %v32_v9, %v100_v51  ;;  %v146_v56 = vsel %vm45_vm0, %v128_v52, 0.0  ;;  %v152_v59 = vsel %vm45_vm0, %v130_v53, 0.0 }
  0x98   :  { %150 = vadd.xlane.f32.xlu0 %v149_v49  ;;  %147 = vadd.xlane.f32.xlu1 %v146_v56  ;;  %v66_v57 = vpop.xlane.xlu0 %65  ;;  %v69_v58 = vpop.xlane.xlu1 %68 }
  0x99   :  { %v101_v60 = vmul.f32 0.03125, %v66_v57  ;;  %v102_v61 = vmul.f32 0.03125, %v69_v58  ;;  %v131_v62 = vmul.f32 %v1119_v54, %v1119_v54  ;;  %v132_v63 = vmul.f32 %v1121_v55, %v1121_v55  ;;  %v876_v57 = vld [vmem:[%s1470_s3] sm:$0xff]  }
  0x9b   :  { %v1130_v0 = vsub.f32 %v1033_v12, %v101_v60  ;;  %v1133_v2 = vsub.f32 %v1038_v13, %v102_v61  ;;  %v155_v3 = vsel %vm45_vm0, %v131_v62, 0.0  ;;  %v158_v6 = vsel %vm45_vm0, %v132_v63, 0.0 }
  0x9c   :  { %153 = vadd.xlane.f32.xlu1 %v152_v59  ;;  %156 = vadd.xlane.f32.xlu0 %v155_v3  ;;  %v72_v4 = vpop.xlane.xlu0 %71  ;;  %v75_v5 = vpop.xlane.xlu1 %74 }
  0x9d   :  { %v103_v7 = vmul.f32 0.03125, %v72_v4  ;;  %v104_v8 = vmul.f32 0.03125, %v75_v5  ;;  %v133_v9 = vmul.f32 %v1130_v0, %v1130_v0  ;;  %v134_v10 = vmul.f32 %v1133_v2, %v1133_v2 }
  0x9f   :  { %v1142_v11 = vsub.f32 %v1047_v16, %v103_v7  ;;  %v1145_v13 = vsub.f32 %v1052_v17, %v104_v8  ;;  %v161_v14 = vsel %vm45_vm0, %v133_v9, 0.0  ;;  %v164_v19 = vsel %vm45_vm0, %v134_v10, 0.0 }
  0xa0   :  { %159 = vadd.xlane.f32.xlu1 %v158_v6  ;;  %162 = vadd.xlane.f32.xlu0 %v161_v14  ;;  %v78_v15 = vpop.xlane.xlu0 %77  ;;  %v81_v18 = vpop.xlane.xlu1 %80 }
  0xa1   :  { %v105_v22 = vmul.f32 0.03125, %v78_v15  ;;  %v106_v23 = vmul.f32 0.03125, %v81_v18  ;;  %v135_v26 = vmul.f32 %v1142_v11, %v1142_v11  ;;  %v136_v16 = vmul.f32 %v1145_v13, %v1145_v13 }
  0xa3   :  { %v1154_v27 = vsub.f32 %v1061_v20, %v105_v22  ;;  %v1157_v17 = vsub.f32 %v1066_v21, %v106_v23  ;;  %v167_v30 = vsel %vm45_vm0, %v135_v26, 0.0  ;;  %v170_v33 = vsel %vm45_vm0, %v136_v16, 0.0 }
  0xa4   :  { %165 = vadd.xlane.f32.xlu1 %v164_v19  ;;  %168 = vadd.xlane.f32.xlu0 %v167_v30  ;;  %v84_v31 = vpop.xlane.xlu0 %83  ;;  %v87_v32 = vpop.xlane.xlu1 %86 }
  0xa5   :  { %v107_v34 = vmul.f32 0.03125, %v84_v31  ;;  %v108_v35 = vmul.f32 0.03125, %v87_v32  ;;  %v137_v38 = vmul.f32 %v1154_v27, %v1154_v27  ;;  %v138_v20 = vmul.f32 %v1157_v17, %v1157_v17 }
  0xa7   :  { %v1166_v39 = vsub.f32 %v1075_v24, %v107_v34  ;;  %v1169_v21 = vsub.f32 %v1080_v25, %v108_v35  ;;  %v173_v40 = vsel %vm45_vm0, %v137_v38, 0.0  ;;  %v176_v43 = vsel %vm45_vm0, %v138_v20, 0.0  ;;  %v1200_v38 = vld [vmem:[%s1471_s1] ss:$0 sm:$0xff] }
  0xa8   :  { %171 = vadd.xlane.f32.xlu1 %v170_v33  ;;  %174 = vadd.xlane.f32.xlu0 %v173_v40  ;;  %v90_v41 = vpop.xlane.xlu0 %89  ;;  %v93_v42 = vpop.xlane.xlu1 %92 }
  0xa9   :  { %v109_v46 = vmul.f32 0.03125, %v90_v41  ;;  %v110_v47 = vmul.f32 0.03125, %v93_v42  ;;  %v139_v48 = vmul.f32 %v1166_v39, %v1166_v39  ;;  %v140_v24 = vmul.f32 %v1169_v21, %v1169_v21 }
  0xab   :  { %v1178_v49 = vsub.f32 %v1089_v28, %v109_v46  ;;  %v1181_v25 = vsub.f32 %v1094_v29, %v110_v47  ;;  %v179_v50 = vsel %vm45_vm0, %v139_v48, 0.0  ;;  %v182_v51 = vsel %vm45_vm0, %v140_v24, 0.0  ;;  %v875_v29 = vld [vmem:[%s1470_s3 + $0x8] sm:$0xff]  }
  0xac   :  { %177 = vadd.xlane.f32.xlu1 %v176_v43  ;;  %180 = vadd.xlane.f32.xlu0 %v179_v50 }
  0xad   :  { %v141_v52 = vmul.f32 %v1178_v49, %v1178_v49  ;;  %v142_v53 = vmul.f32 %v1181_v25, %v1181_v25  ;;  %807 = vmatprep.subr.bf16.mxu0 %v875_v29 }
  0xae   :  { %808 = vmatpush3.bf16.msra.mxu0 %v875_v29 }
  0xaf   :  { %v185_v56 = vsel %vm45_vm0, %v141_v52, 0.0  ;;  %v188_v28 = vsel %vm45_vm0, %v142_v53, 0.0  ;;  %809 = vmatprep.subr.bf16.mxu0 %v876_v57 }
  0xb0   :  { %183 = vadd.xlane.f32.xlu1 %v182_v51  ;;  %186 = vadd.xlane.f32.xlu0 %v185_v56  ;;  %v1207_v51 = vld [vmem:[%s1472_s2] ss:$0 sm:$0xff] }
  0xb2   :  { %810 = vmatpush3.bf16.msra.mxu0 %v876_v57 }
  0xb4   :  { %189 = vadd.xlane.f32.xlu1 %v188_v28 }
 0x11d   :  { %v145_v58 = vpop.xlane.xlu0 %144 }
 0x11e   :  { %v191_v59 = vmul.f32 0.03125, %v145_v58 }
 0x120   :  { %v207_v60 = vadd.f32 1e-05, %v191_v59 }
 0x121   :  { %v148_v61 = vpop.xlane.xlu1 %147  ;;  %v151_v62 = vpop.xlane.xlu0 %150 }
 0x122   :  { %885 = vrsqrt.f32 %v207_v60  ;;  %v192_v63 = vmul.f32 0.03125, %v148_v61  ;;  %v193_v3 = vmul.f32 0.03125, %v151_v62 }
 0x124   :  { %v208_v4 = vadd.f32 1e-05, %v192_v63  ;;  %v209_v5 = vadd.f32 1e-05, %v193_v3 }
 0x125   :  { %v154_v6 = vpop.xlane.xlu1 %153  ;;  %v157_v7 = vpop.xlane.xlu0 %156 }
 0x126   :  { %887 = vrsqrt.f32 %v208_v4  ;;  %v194_v8 = vmul.f32 0.03125, %v154_v6  ;;  %v195_v9 = vmul.f32 0.03125, %v157_v7 }
 0x127   :  { %889 = vrsqrt.f32 %v209_v5 }
 0x128   :  { %v210_v10 = vadd.f32 1e-05, %v194_v8  ;;  %v211_v14 = vadd.f32 1e-05, %v195_v9 }
 0x129   :  { %v160_v15 = vpop.xlane.xlu1 %159  ;;  %v163_v18 = vpop.xlane.xlu0 %162 }
 0x12a   :  { %891 = vrsqrt.f32 %v210_v10  ;;  %v196_v19 = vmul.f32 0.03125, %v160_v15  ;;  %v197_v22 = vmul.f32 0.03125, %v163_v18 }
 0x12b   :  { %893 = vrsqrt.f32 %v211_v14 }
 0x12c   :  { %v212_v23 = vadd.f32 1e-05, %v196_v19  ;;  %v213_v26 = vadd.f32 1e-05, %v197_v22 }
 0x12d   :  { %v166_v16 = vpop.xlane.xlu1 %165  ;;  %v169_v30 = vpop.xlane.xlu0 %168 }
 0x12e   :  { %895 = vrsqrt.f32 %v212_v23  ;;  %v198_v31 = vmul.f32 0.03125, %v166_v16  ;;  %v199_v32 = vmul.f32 0.03125, %v169_v30 }
 0x12f   :  { %v886_v33 = vpop.eup %885  ;;  %897 = vrsqrt.f32 %v213_v26 }
 0x130   :  { %v214_v34 = vadd.f32 1e-05, %v198_v31  ;;  %v215_v35 = vadd.f32 1e-05, %v199_v32  ;;  %v239_v20 = vmul.f32 %v886_v33, %v1100_v36 }
 0x131   :  { %v172_v40 = vpop.xlane.xlu1 %171  ;;  %v175_v41 = vpop.xlane.xlu0 %174 }
 0x132   :  { %899 = vrsqrt.f32 %v214_v34  ;;  %v200_v42 = vmul.f32 0.03125, %v172_v40  ;;  %v201_v43 = vmul.f32 0.03125, %v175_v41  ;;  %v261_v47 = vmul.f32 %v1200_v38, %v239_v20 }
 0x133   :  { %v888_v46 = vpop.eup %887  ;;  %901 = vrsqrt.f32 %v215_v35 }
 0x134   :  { %v890_v48 = vpop.eup %889  ;;  %v216_v24 = vadd.f32 1e-05, %v200_v42  ;;  %v217_v50 = vadd.f32 1e-05, %v201_v43  ;;  %v240_v52 = vmul.f32 %v888_v46, %v1109_v44  ;;  %v283_v59 = vadd.f32 %v1207_v51, %v261_v47 }
 0x135   :  { %v178_v36 = vpop.xlane.xlu1 %177  ;;  %v181_v53 = vpop.xlane.xlu0 %180  ;;  %v241_v56 = vmul.f32 %v890_v48, %v1103_v37 }
 0x136   :  { %903 = vrsqrt.f32 %v216_v24  ;;  %v202_v28 = vmul.f32 0.03125, %v178_v36  ;;  %v203_v29 = vmul.f32 0.03125, %v181_v53  ;;  %v262_v57 = vmul.f32 %v1200_v38, %v240_v52 }
 0x137   :  { %v892_v58 = vpop.eup %891  ;;  %905 = vrsqrt.f32 %v217_v50  ;;  %v263_v37 = vmul.f32 %v1200_v38, %v241_v56 }
 0x138   :  { %v894_v60 = vpop.eup %893  ;;  %v218_v61 = vadd.f32 1e-05, %v202_v28  ;;  %v219_v62 = vadd.f32 1e-05, %v203_v29  ;;  %v284_v63 = vadd.f32 %v1207_v51, %v262_v57  ;;  %v242_v44 = vmul.f32 %v892_v58, %v1111_v45 }
 0x139   :  { %v184_v3 = vpop.xlane.xlu1 %183  ;;  %v187_v4 = vpop.xlane.xlu0 %186  ;;  %v243_v5 = vmul.f32 %v894_v60, %v1119_v54  ;;  %v285_v54 = vadd.f32 %v1207_v51, %v263_v37 }
 0x13a   :  { %907 = vrsqrt.f32 %v218_v61  ;;  %v204_v6 = vmul.f32 0.03125, %v184_v3  ;;  %v205_v7 = vmul.f32 0.03125, %v187_v4  ;;  %v299_v8 = vpack.c.bf16 %v284_v63, %v283_v59 }
 0x13b   :  { %v896_v9 = vpop.eup %895  ;;  %909 = vrsqrt.f32 %v219_v62  ;;  %v264_v10 = vmul.f32 %v1200_v38, %v242_v44  ;;  %v265_v14 = vmul.f32 %v1200_v38, %v243_v5 }
 0x13c   :  { %v898_v15 = vpop.eup %897  ;;  %v220_v18 = vadd.f32 1e-05, %v204_v6  ;;  %v221_v19 = vadd.f32 1e-05, %v205_v7  ;;  %811 = vmatprep.mubr.msk.bf16.mxu0 %vm45_vm0, %v299_v8  ;;  %v244_v45 = vmul.f32 %v896_v9, %v1121_v55 }
 0x13d   :  { %v190_v22 = vpop.xlane.xlu1 %189  ;;  %v286_v23 = vadd.f32 %v1207_v51, %v264_v10  ;;  %v245_v26 = vmul.f32 %v898_v15, %v1130_v0  ;;  %v287_v33 = vadd.f32 %v1207_v51, %v265_v14  ;;  %v880_v14 = vld [vmem:[%s1473_s5 + $0x20] sm:$0xff]   ;;  %v881_v15 = vld [vmem:[%s1473_s5 + $0x18] sm:$0xff]  }
 0x13e   :  { %911 = vrsqrt.f32 %v220_v18  ;;  %v206_v16 = vmul.f32 0.03125, %v190_v22  ;;  %v266_v30 = vmul.f32 %v1200_v38, %v244_v45  ;;  %v882_v18 = vld [vmem:[%s1473_s5 + $0x10] sm:$0xff]   ;;  %v884_v45 = vld [vmem:[%s1473_s5] sm:$0xff]  }
 0x13f   :  { %v900_v31 = vpop.eup %899  ;;  %913 = vrsqrt.f32 %v221_v19  ;;  %v300_v32 = vpack.c.bf16 %v286_v23, %v285_v54  ;;  %v267_v40 = vmul.f32 %v1200_v38, %v245_v26  ;;  %v883_v19 = vld [vmem:[%s1473_s5 + $0x8] sm:$0xff]   ;;  %v1290_v22 = vld [vmem:[%s1474_s4] ss:$0 sm:$0xff] }
 0x140   :  { %v902_v34 = vpop.eup %901  ;;  %v222_v35 = vadd.f32 1e-05, %v206_v16  ;;  %v288_v55 = vadd.f32 %v1207_v51, %v266_v30  ;;  %v246_v20 = vmul.f32 %v900_v31, %v1133_v2 }
 0x141   :  { %812 = vmatmul.mubr.msk.bf16.vlgmr.msra.gmra.mxu0 %vm45_vm0, %v300_v32  ;;  %v247_v0 = vmul.f32 %v902_v34, %v1142_v11  ;;  %v289_v47 = vadd.f32 %v1207_v51, %v267_v40 }
 0x142   :  { %915 = vrsqrt.f32 %v222_v35  ;;  %v301_v41 = vpack.c.bf16 %v288_v55, %v287_v33  ;;  %v268_v42 = vmul.f32 %v1200_v38, %v246_v20 }
 0x143   :  { %v904_v43 = vpop.eup %903  ;;  %v269_v24 = vmul.f32 %v1200_v38, %v247_v0 }
 0x144   :  { %v906_v46 = vpop.eup %905  ;;  %815 = vmatprep.mubr.msk.bf16.mxu0 %vm45_vm0, %v301_v41  ;;  %v290_v48 = vadd.f32 %v1207_v51, %v268_v42  ;;  %v248_v2 = vmul.f32 %v904_v43, %v1145_v13 }
 0x145   :  { %v249_v50 = vmul.f32 %v906_v46, %v1154_v27  ;;  %v291_v56 = vadd.f32 %v1207_v51, %v269_v24 }
 0x146   :  { %v302_v52 = vpack.c.bf16 %v290_v48, %v289_v47  ;;  %v270_v11 = vmul.f32 %v1200_v38, %v248_v2 }
 0x147   :  { %v908_v36 = vpop.eup %907  ;;  %v271_v57 = vmul.f32 %v1200_v38, %v249_v50 }
 0x148   :  { %v910_v53 = vpop.eup %909  ;;  %v292_v28 = vadd.f32 %v1207_v51, %v270_v11  ;;  %v250_v29 = vmul.f32 %v908_v36, %v1157_v17 }
 0x149   :  { %816 = vmatmul.mubr.msk.bf16.gmra.mxu0 %vm45_vm0, %v302_v52  ;;  %v251_v13 = vmul.f32 %v910_v53, %v1166_v39  ;;  %v293_v61 = vadd.f32 %v1207_v51, %v271_v57 }
 0x14a   :  { %v303_v58 = vpack.c.bf16 %v292_v28, %v291_v56  ;;  %v272_v27 = vmul.f32 %v1200_v38, %v250_v29 }
 0x14b   :  { %v912_v59 = vpop.eup %911  ;;  %v273_v17 = vmul.f32 %v1200_v38, %v251_v13 }
 0x14c   :  { %v914_v60 = vpop.eup %913  ;;  %819 = vmatprep.mubr.msk.bf16.mxu0 %vm45_vm0, %v303_v58  ;;  %v294_v62 = vadd.f32 %v1207_v51, %v272_v27  ;;  %v252_v63 = vmul.f32 %v912_v59, %v1169_v21 }
 0x14d   :  { %v253_v44 = vmul.f32 %v914_v60, %v1178_v49  ;;  %v295_v37 = vadd.f32 %v1207_v51, %v273_v17 }
 0x14e   :  { %v304_v3 = vpack.c.bf16 %v294_v62, %v293_v61  ;;  %v274_v39 = vmul.f32 %v1200_v38, %v252_v63 }
 0x14f   :  { %v916_v4 = vpop.eup %915  ;;  %v275_v7 = vmul.f32 %v1200_v38, %v253_v44 }
 0x150   :  { %v296_v5 = vadd.f32 %v1207_v51, %v274_v39  ;;  %v254_v6 = vmul.f32 %v916_v4, %v1181_v25  ;;  %v877_v25 = vld [vmem:[%s1473_s5 + $0x38] sm:$0xff]  }
 0x151   :  { %820 = vmatmul.mubr.msk.bf16.gmra.mxu0 %vm45_vm0, %v304_v3  ;;  %v297_v49 = vadd.f32 %v1207_v51, %v275_v7  ;;  %827 = vmatprep.subr.bf16.mxu0 %v877_v25 }
 0x152   :  { %v305_v8 = vpack.c.bf16 %v296_v5, %v295_v37  ;;  %v276_v21 = vmul.f32 %v1200_v38, %v254_v6  ;;  %859 = vmatprep.subr.bf16.mxu1 %v877_v25  ;;  %828 = vmatpush3.bf16.msra.mxu0 %v877_v25  ;;  %v878_v38 = vld [vmem:[%s1473_s5 + $0x30] sm:$0xff]  }
 0x153   :  { %867 = vmatpush3.bf16.msra.mxu1 %v877_v25  ;;  %829 = vmatprep.subr.bf16.mxu0 %v878_v38 }
 0x154   :  { %823 = vmatprep.mubr.msk.bf16.mxu0 %vm45_vm0, %v305_v8  ;;  %v298_v9 = vadd.f32 %v1207_v51, %v276_v21  ;;  %860 = vmatprep.subr.bf16.mxu1 %v878_v38  ;;  %v879_v51 = vld [vmem:[%s1473_s5 + $0x28] sm:$0xff]  }
 0x156   :  { %v306_v10 = vpack.c.bf16 %v298_v9, %v297_v49  ;;  %830 = vmatpush3.bf16.msra.mxu0 %v878_v38 }
 0x157   :  { %868 = vmatpush3.bf16.msra.mxu1 %v878_v38  ;;  %831 = vmatprep.subr.bf16.mxu0 %v879_v51 }
 0x158   :  { %861 = vmatprep.subr.bf16.mxu1 %v879_v51 }
 0x159   :  { %824 = vmatmul.mubr.msk.bf16.gmra.mxu0 %vm45_vm0, %v306_v10 }
 0x15a   :  { %832 = vmatpush3.bf16.msra.mxu0 %v879_v51 }
 0x15b   :  { %869 = vmatpush3.bf16.msra.mxu1 %v879_v51  ;;  %833 = vmatprep.subr.bf16.mxu0 %v880_v14 }
 0x15c   :  { %862 = vmatprep.subr.bf16.mxu1 %v880_v14 }
 0x15e   :  { %834 = vmatpush3.bf16.msra.mxu0 %v880_v14 }
 0x15f   :  { %870 = vmatpush3.bf16.msra.mxu1 %v880_v14  ;;  %835 = vmatprep.subr.bf16.mxu0 %v881_v15 }
 0x160   :  { %863 = vmatprep.subr.bf16.mxu1 %v881_v15 }
 0x162   :  { %836 = vmatpush3.bf16.msra.mxu0 %v881_v15 }
 0x163   :  { %871 = vmatpush3.bf16.msra.mxu1 %v881_v15  ;;  %837 = vmatprep.subr.bf16.mxu0 %v882_v18 }
 0x164   :  { %864 = vmatprep.subr.bf16.mxu1 %v882_v18 }
 0x166   :  { %838 = vmatpush3.bf16.msra.mxu0 %v882_v18 }
 0x167   :  { %872 = vmatpush3.bf16.msra.mxu1 %v882_v18  ;;  %839 = vmatprep.subr.bf16.mxu0 %v883_v19 }
 0x168   :  { %865 = vmatprep.subr.bf16.mxu1 %v883_v19 }
 0x16a   :  { %840 = vmatpush3.bf16.msra.mxu0 %v883_v19 }
 0x16b   :  { %873 = vmatpush3.bf16.msra.mxu1 %v883_v19  ;;  %841 = vmatprep.subr.bf16.mxu0 %v884_v45 }
 0x16c   :  { %866 = vmatprep.subr.bf16.mxu1 %v884_v45 }
 0x16e   :  { %842 = vmatpush3.bf16.msra.mxu0 %v884_v45 }
 0x16f   :  { %874 = vmatpush3.bf16.msra.mxu1 %v884_v45 }
 0x201   :  { %v813_v54 = vpop.f32.mrf.mxu0 }
 0x202   :  { %v397_v23 = vadd.f32 %v813_v54, %v1290_v22 }
 0x203   :  { %v388_v26 = vpop.f32.mrf.mxu0 }
 0x204   :  { %v389_v16 = vadd.f32 %v1290_v22, %v388_v26  ;;  %v469_v30 = vmul.f32 0.70710677, %v397_v23  ;;  %v453_v8 = vmul.f32 0.5, %v397_v23 }
 0x205   :  { %v814_v31 = vpop.f32.mrf.mxu0 }
 0x206   :  { %v467_v32 = vmul.f32 0.70710677, %v389_v16  ;;  %v400_v33 = vadd.f32 %v814_v31, %v1290_v22  ;;  %v451_v59 = vmul.f32 0.5, %v389_v16 }
 0x207   :  { %v391_v34 = vpop.f32.mrf.mxu0 }
 0x208   :  { %917 = verf.f32 %v467_v32  ;;  %v470_v35 = vmul.f32 0.70710677, %v400_v33  ;;  %v392_v55 = vadd.f32 %v1290_v22, %v391_v34  ;;  %v454_v39 = vmul.f32 0.5, %v400_v33 }
 0x209   :  { %919 = verf.f32 %v469_v30  ;;  %v817_v20 = vpop.f32.mrf.mxu0 }
 0x20a   :  { %921 = verf.f32 %v470_v35  ;;  %v468_v40 = vmul.f32 0.70710677, %v392_v55  ;;  %v1297_v0 = vadd.f32 %v817_v20, %v1290_v22  ;;  %v452_v5 = vmul.f32 0.5, %v392_v55 }
 0x20b   :  { %v404_v41 = vpop.f32.mrf.mxu0 }
 0x20c   :  { %923 = verf.f32 %v468_v40  ;;  %v473_v42 = vmul.f32 0.70710677, %v1297_v0  ;;  %v1301_v43 = vadd.f32 %v1290_v22, %v404_v41 }
 0x20d   :  { %v818_v46 = vpop.f32.mrf.mxu0 }
 0x20e   :  { %v471_v47 = vmul.f32 0.70710677, %v1301_v43  ;;  %v1305_v48 = vadd.f32 %v818_v46, %v1290_v22  ;;  %925 = verf.f32 %v473_v42  ;;  %v455_v41 = vmul.f32 0.5, %v1301_v43 }
 0x20f   :  { %v407_v2 = vpop.f32.mrf.mxu0 }
 0x210   :  { %v474_v24 = vmul.f32 0.70710677, %v1305_v48  ;;  %v1309_v50 = vadd.f32 %v1290_v22, %v407_v2  ;;  %927 = verf.f32 %v471_v47  ;;  %v458_v20 = vmul.f32 0.5, %v1305_v48 }
 0x211   :  { %v821_v52 = vpop.f32.mrf.mxu0  ;;  %v457_v47 = vmul.f32 0.5, %v1297_v0 }
 0x212   :  { %929 = verf.f32 %v474_v24  ;;  %v472_v11 = vmul.f32 0.70710677, %v1309_v50  ;;  %v1313_v36 = vadd.f32 %v821_v52, %v1290_v22  ;;  %v456_v42 = vmul.f32 0.5, %v1309_v50 }
 0x213   :  { %v420_v53 = vpop.f32.mrf.mxu0 }
 0x214   :  { %931 = verf.f32 %v472_v11  ;;  %v477_v56 = vmul.f32 0.70710677, %v1313_v36  ;;  %v1317_v29 = vadd.f32 %v1290_v22, %v420_v53 }
 0x215   :  { %v918_v28 = vpop.eup %917  ;;  %v822_v57 = vpop.f32.mrf.mxu0 }
 0x216   :  { %v920_v13 = vpop.eup %919  ;;  %v1320_v58 = vadd.f32 %v822_v57, %v1290_v22  ;;  %v475_v60 = vmul.f32 0.70710677, %v1317_v29  ;;  %v499_v62 = vadd.f32 1.0, %v918_v28  ;;  %933 = verf.f32 %v477_v56 }
 0x217   :  { %v922_v27 = vpop.eup %921  ;;  %v423_v61 = vpop.f32.mrf.mxu0  ;;  %v501_v3 = vadd.f32 1.0, %v920_v13  ;;  %v459_v0 = vmul.f32 0.5, %v1317_v29 }
 0x218   :  { %v502_v63 = vadd.f32 1.0, %v922_v27  ;;  %v478_v17 = vmul.f32 0.70710677, %v1320_v58  ;;  %935 = verf.f32 %v475_v60  ;;  %v424_v4 = vadd.f32 %v1290_v22, %v423_v61 }
 0x219   :  { %v924_v44 = vpop.eup %923  ;;  %v825_v37 = vpop.f32.mrf.mxu0  ;;  %v515_v10 = vmul.f32 %v499_v62, %v451_v59  ;;  %v517_v51 = vmul.f32 %v501_v3, %v453_v8  ;;  %v462_v50 = vmul.f32 0.5, %v1320_v58  ;;  %v461_v61 = vmul.f32 0.5, %v1313_v36 }
 0x21a   :  { %v500_v6 = vadd.f32 1.0, %v924_v44  ;;  %937 = verf.f32 %v478_v17  ;;  %v1326_v7 = vadd.f32 %v825_v37, %v1290_v22  ;;  %v518_v21 = vmul.f32 %v502_v63, %v454_v39 }
 0x21b   :  { %v476_v49 = vmul.f32 0.70710677, %v424_v4  ;;  %v436_v9 = vpop.f32.mrf.mxu0  ;;  %v926_v38 = vpop.eup %925  ;;  %v460_v59 = vmul.f32 0.5, %v424_v4 }
 0x21c   :  { %v516_v25 = vmul.f32 %v500_v6, %v452_v5  ;;  %v481_v14 = vmul.f32 0.70710677, %v1326_v7  ;;  %v437_v15 = vadd.f32 %v1290_v22, %v436_v9  ;;  %v532_v16 = vpack.c.bf16 %v518_v21, %v517_v51 }
 0x21d   :  { %939 = verf.f32 %v476_v49  ;;  %v826_v18 = vpop.f32.mrf.mxu0  ;;  %v928_v19 = vpop.eup %927  ;;  %v505_v55 = vadd.f32 1.0, %v926_v38  ;;  %v465_v36 = vmul.f32 0.5, %v1326_v7  ;;  %v949_v7 = vld [vmem:[%s1469_s0] sm:$0xff] }
 0x21e   :  { %v448_v45 = vadd.f32 %v826_v18, %v1290_v22  ;;  %v531_v54 = vpack.c.bf16 %v516_v25, %v515_v10  ;;  %v479_v23 = vmul.f32 0.70710677, %v437_v15  ;;  %941 = verf.f32 %v481_v14 }
 0x21f   :  { %v930_v26 = vpop.eup %929  ;;  %v439_v30 = vpop.f32.mrf.mxu0  ;;  %v503_v35 = vadd.f32 1.0, %v928_v19  ;;  %v521_v53 = vmul.f32 %v505_v55, %v457_v47  ;;  %v463_v58 = vmul.f32 0.5, %v437_v15  ;;  %v1343_v15 = vld [vmem:[%s1475_s6] ss:$0 sm:$0xff] }
 0x220   :  { %v506_v31 = vadd.f32 1.0, %v930_v26  ;;  %v482_v32 = vmul.f32 0.70710677, %v448_v45  ;;  %v440_v33 = vadd.f32 %v1290_v22, %v439_v30  ;;  %843 = vmatprep.mubr.bf16.mxu0 %v531_v54  ;;  %943 = verf.f32 %v479_v23  ;;  %v952_v47 = vld [vmem:[%s1469_s0 + $0x20] sm:$0xff] }
 0x221   :  { %v932_v34 = vpop.eup %931  ;;  %844 = vmatmul.mubr.bf16.vlgmr.msra.gmra.mxu0 %v532_v16  ;;  %v519_v24 = vmul.f32 %v503_v35, %v455_v41  ;;  %v466_v29 = vmul.f32 0.5, %v448_v45  ;;  %v951_v35 = vld [vmem:[%s1469_s0 + $0x8] sm:$0xff] }
 0x222   :  { %945 = verf.f32 %v482_v32  ;;  %v480_v40 = vmul.f32 0.70710677, %v440_v33  ;;  %v504_v46 = vadd.f32 1.0, %v932_v34  ;;  %v522_v2 = vmul.f32 %v506_v31, %v458_v20 }
 0x223   :  { %v934_v22 = vpop.eup %933  ;;  %v464_v4 = vmul.f32 0.5, %v440_v33 }
 0x224   :  { %947 = verf.f32 %v480_v40  ;;  %v520_v52 = vmul.f32 %v504_v46, %v456_v42  ;;  %v534_v48 = vpack.c.bf16 %v522_v2, %v521_v53  ;;  %v509_v43 = vadd.f32 1.0, %v934_v22 }
 0x225   :  { %v936_v11 = vpop.eup %935 }
 0x226   :  { %v533_v28 = vpack.c.bf16 %v520_v52, %v519_v24  ;;  %v507_v13 = vadd.f32 1.0, %v936_v11  ;;  %v525_v39 = vmul.f32 %v509_v43, %v461_v61  ;;  %v953_v24 = vld [vmem:[%s1469_s0 + $0x38] sm:$0xff] }
 0x227   :  { %v938_v56 = vpop.eup %937 }
 0x228   :  { %v510_v57 = vadd.f32 1.0, %v938_v56  ;;  %847 = vmatprep.mubr.bf16.mxu1 %v533_v28  ;;  %v523_v17 = vmul.f32 %v507_v13, %v459_v0  ;;  %v954_v56 = vld [vmem:[%s1469_s0 + $0x28] sm:$0xff]  ;;  %v955_v13 = vld [vmem:[%s1469_s0 + $0x50] sm:$0xff]  ;;  %v956_v0 = vld [vmem:[%s1469_s0 + $0x40] sm:$0xff] }
 0x229   :  { %848 = vmatmul.mubr.bf16.vlgmr.msra.gmra.mxu1 %v534_v48 }
 0x22a   :  { %v940_v27 = vpop.eup %939  ;;  %v526_v62 = vmul.f32 %v510_v57, %v462_v50 }
 0x22b   :  { %v508_v60 = vadd.f32 1.0, %v940_v27  ;;  %v942_v63 = vpop.eup %941 }
 0x22c   :  { %v536_v21 = vpack.c.bf16 %v526_v62, %v525_v39  ;;  %v513_v9 = vadd.f32 1.0, %v942_v63  ;;  %v957_v62 = vld [vmem:[%s1469_s0 + $0x58] sm:$0xff] }
 0x22d   :  { %v524_v44 = vmul.f32 %v508_v60, %v460_v59  ;;  %v944_v3 = vpop.eup %943 }
 0x22e   :  { %v511_v6 = vadd.f32 1.0, %v944_v3  ;;  %v529_v14 = vmul.f32 %v513_v9, %v465_v36  ;;  %v958_v3 = vld [vmem:[%s1469_s0 + $0x48] sm:$0xff] }
 0x22f   :  { %v946_v37 = vpop.eup %945  ;;  %v535_v5 = vpack.c.bf16 %v524_v44, %v523_v17 }
 0x230   :  { %v514_v8 = vadd.f32 1.0, %v946_v37  ;;  %v527_v25 = vmul.f32 %v511_v6, %v463_v58  ;;  %v959_v6 = vld [vmem:[%s1469_s0 + $0x70] sm:$0xff]  ;;  %v960_v58 = vld [vmem:[%s1469_s0 + $0x60] sm:$0xff] }
 0x231   :  { %v948_v49 = vpop.eup %947  ;;  %851 = vmatprep.mubr.bf16.mxu1 %v535_v5 }
 0x232   :  { %v512_v10 = vadd.f32 1.0, %v948_v49  ;;  %852 = vmatmul.mubr.bf16.gmra.mxu1 %v536_v21  ;;  %v530_v38 = vmul.f32 %v514_v8, %v466_v29 }
 0x234   :  { %v528_v51 = vmul.f32 %v512_v10, %v464_v4  ;;  %v538_v19 = vpack.c.bf16 %v530_v38, %v529_v14  ;;  %v961_v10 = vld [vmem:[%s1469_s0 + $0x78] sm:$0xff] }
 0x236   :  { %v537_v18 = vpack.c.bf16 %v528_v51, %v527_v25  ;;  %v962_v51 = vld [vmem:[%s1469_s0 + $0x68] sm:$0xff] }
 0x238   :  { %855 = vmatprep.mubr.bf16.mxu1 %v537_v18 }
 0x23a   :  { %856 = vmatmul.mubr.bf16.gmra.mxu1 %v538_v19 }
 0x2e1   :  { %v845_v54 = vpop.f32.mrf.mxu0 }
 0x2e2   :  { %v702_v45 = vadd.f32 %v845_v54, %v1009_v1  ;;  %v950_v1 = vld [vmem:[%s1469_s0 + $0x18] sm:$0xff] }
 0x2e3   :  { %v637_v26 = vpop.f32.mrf.mxu0 }
 0x2e4   :  { %v725_v16 = vadd.f32 %v1343_v15, %v702_v45  ;;  %v700_v23 = vadd.f32 %v949_v7, %v637_v26 }
 0x2e5   :  { %v846_v30 = vpop.f32.mrf.mxu0 }
 0x2e6   :  { %741 = vst.msk [vmem:[%s1476_s7 + $0x10] sm:$0xff] %vm45_vm0, %v725_v16  ;;  %v723_v31 = vadd.f32 %v1343_v15, %v700_v23  ;;  %v703_v32 = vadd.f32 %v950_v1, %v846_v30 }
 0x2e7   :  { %v640_v33 = vpop.f32.mrf.mxu0 }
 0x2e8   :  { %739 = vst.msk [vmem:[%s1476_s7] sm:$0xff] %vm45_vm0, %v723_v31  ;;  %v726_v34 = vadd.f32 %v1343_v15, %v703_v32  ;;  %v701_v55 = vadd.f32 %v951_v35, %v640_v33 }
 0x2e9   :  { %v849_v40 = vpop.f32.mrf.mxu1 }
 0x2ea   :  { %742 = vst.msk [vmem:[%s1476_s7 + $0x18] sm:$0xff] %vm45_vm0, %v726_v34  ;;  %v724_v20 = vadd.f32 %v1343_v15, %v701_v55  ;;  %v706_v41 = vadd.f32 %v849_v40, %v1033_v12 }
 0x2eb   :  { %v653_v42 = vpop.f32.mrf.mxu1 }
 0x2ec   :  { %740 = vst.msk [vmem:[%s1476_s7 + $0x8] sm:$0xff] %vm45_vm0, %v724_v20  ;;  %v729_v46 = vadd.f32 %v1343_v15, %v706_v41  ;;  %v704_v2 = vadd.f32 %v952_v47, %v653_v42 }
 0x2ed   :  { %v850_v22 = vpop.f32.mrf.mxu1 }
 0x2ee   :  { %745 = vst.msk [vmem:[%s1476_s7 + $0x30] sm:$0xff] %vm45_vm0, %v729_v46  ;;  %v727_v12 = vadd.f32 %v1343_v15, %v704_v2  ;;  %v707_v52 = vadd.f32 %v953_v24, %v850_v22 }
 0x2ef   :  { %v656_v11 = vpop.f32.mrf.mxu1 }
 0x2f0   :  { %743 = vst.msk [vmem:[%s1476_s7 + $0x20] sm:$0xff] %vm45_vm0, %v727_v12  ;;  %v730_v53 = vadd.f32 %v1343_v15, %v707_v52  ;;  %v705_v28 = vadd.f32 %v954_v56, %v656_v11 }
 0x2f2   :  { %v853_v57 = vpop.f32.mrf.mxu1  ;;  %746 = vst.msk [vmem:[%s1476_s7 + $0x38] sm:$0xff] %vm45_vm0, %v730_v53  ;;  %v728_v48 = vadd.f32 %v1343_v15, %v705_v28 }
 0x2f3   :  { %v710_v27 = vadd.f32 %v955_v13, %v853_v57 }
 0x2f4   :  { %v669_v43 = vpop.f32.mrf.mxu1  ;;  %744 = vst.msk [vmem:[%s1476_s7 + $0x28] sm:$0xff] %vm45_vm0, %v728_v48 }
 0x2f5   :  { %v733_v50 = vadd.f32 %v1343_v15, %v710_v27  ;;  %v708_v59 = vadd.f32 %v956_v0, %v669_v43 }
 0x2f6   :  { %v854_v60 = vpop.f32.mrf.mxu1 }
 0x2f7   :  { %749 = vst.msk [vmem:[%s1476_s7 + $0x50] sm:$0xff] %vm45_vm0, %v733_v50  ;;  %v731_v61 = vadd.f32 %v1343_v15, %v708_v59  ;;  %v711_v63 = vadd.f32 %v957_v62, %v854_v60 }
 0x2f8   :  { %v672_v17 = vpop.f32.mrf.mxu1 }
 0x2f9   :  { %747 = vst.msk [vmem:[%s1476_s7 + $0x40] sm:$0xff] %vm45_vm0, %v731_v61  ;;  %v734_v44 = vadd.f32 %v1343_v15, %v711_v63  ;;  %v709_v39 = vadd.f32 %v958_v3, %v672_v17 }
 0x2fa   :  { %v857_v37 = vpop.f32.mrf.mxu1 }
 0x2fb   :  { %750 = vst.msk [vmem:[%s1476_s7 + $0x58] sm:$0xff] %vm45_vm0, %v734_v44  ;;  %v732_v5 = vadd.f32 %v1343_v15, %v709_v39  ;;  %v714_v8 = vadd.f32 %v959_v6, %v857_v37 }
 0x2fc   :  { %v685_v21 = vpop.f32.mrf.mxu1 }
 0x2fd   :  { %748 = vst.msk [vmem:[%s1476_s7 + $0x48] sm:$0xff] %vm45_vm0, %v732_v5  ;;  %v737_v49 = vadd.f32 %v1343_v15, %v714_v8  ;;  %v712_v9 = vadd.f32 %v960_v58, %v685_v21 }
 0x2fe   :  { %v858_v29 = vpop.f32.mrf.mxu1 }
 0x2ff   :  { %753 = vst.msk [vmem:[%s1476_s7 + $0x70] sm:$0xff] %vm45_vm0, %v737_v49  ;;  %v735_v4 = vadd.f32 %v1343_v15, %v712_v9  ;;  %v715_v36 = vadd.f32 %v961_v10, %v858_v29 }
 0x300   :  { %v688_v25 = vpop.f32.mrf.mxu1 }
 0x301   :  { %751 = vst.msk [vmem:[%s1476_s7 + $0x60] sm:$0xff] %vm45_vm0, %v735_v4  ;;  %v738_v38 = vadd.f32 %v1343_v15, %v715_v36  ;;  %v713_v14 = vadd.f32 %v962_v51, %v688_v25 }
 0x303   :  { %754 = vst.msk [vmem:[%s1476_s7 + $0x78] sm:$0xff] %vm45_vm0, %v738_v38  ;;  %v736_v18 = vadd.f32 %v1343_v15, %v713_v14 }
 0x305   :  { %752 = vst.msk [vmem:[%s1476_s7 + $0x68] sm:$0xff] %vm45_vm0, %v736_v18 }

// kernel: encode_block_forward.4
= control target key start
LH: loop header
LB: loop body
LE: loop exit
PB: predicated region body
PF: predicated region fallthrough
CT: control target
= control target key end

     0   :  { %s1728_s24 = smov 0   ;;  %s1730_s25 = smov 0   ;;  %s2064_s0 = inlined_call_operand.vmem [shape: f32[2,64,32], index: 0, kind: input, shape index: {}]   ;;  %s2065_s1 = inlined_call_operand.vmem [shape: f32[1,32], index: 1, kind: input, shape index: {}]   ;;  %s2066_s2 = inlined_call_operand.vmem [shape: f32[1,32], index: 2, kind: input, shape index: {}]   ;;  %s2067_s3 = inlined_call_operand.vmem [shape: bf16[32,32], index: 3, kind: input, shape index: {}]   ;;  %s2068_s4 = inlined_call_operand.vmem [shape: bf16[2,16,64], index: 4, kind: input, shape index: {}]   ;;  %s2069_s5 = inlined_call_operand.vmem [shape: bf16[32,32], index: 5, kind: input, shape index: {}]   ;;  %s2070_s6 = inlined_call_operand.vmem [shape: f32[1,32], index: 6, kind: input, shape index: {}]   ;;  %s2071_s7 = inlined_call_operand.vmem [shape: f32[2,64,32], index: 7, kind: output, shape index: {}]  }
   0x1   :  { %s1732_s26 = smov 0  }
   0x2 LB: > { %s29_s27 = sadd.s32 1, %s1678_s25  ;;  %p1381_p0 = scmp.ge.s32.totalorder %s1682_s26, 1  ;;  %s1682_s26 = sphi %s1732_s26, %s17_s26   ;;  %s1678_s25 = sphi %s1730_s25, %s2073_s25   ;;  %s1674_s24 = sphi %s1728_s24, %s2072_s24  }
   0x3   : > { %p31_p1 = scmp.ge.s32.totalorder %s29_s27, 2  ;;  %p268_p2 = scmp.lt.s32.totalorder %s1682_s26, 3 }
   0x5   : > { %s2075_s27 = smov (%p31_p1, %s29_s27), 0  ;;  %p269_p3 = pnand %p1381_p0, %p268_p2 }
   0x6   : > { %p314_p4 = scmp.lt.s32.totalorder (!%p269_p3), %s1674_s24, 1  ;;  %s1684_s21 = smov (!%p269_p3), 112  }
   0x7   : > { %272 = sbr.rel (%p269_p3) target bundleno = 1561 (0x619), region = 48  ;;  %s1685_s22 = smov (!%p269_p3), 96  }
   0x8   : > { %s1686_s23 = smov (!%p269_p3), 80   ;;  %s1687_s11 = smov (!%p269_p3), 16  }
   0xc   : > { %s2077_s24 = smov (!%p314_p4, %s1674_s24), 1  ;;  %vm349_vm0 = vcmask 261120   ;;  %v1571_v56 = vld [vmem:[%s2067_s3 + $0x8] sm:$0xff]   ;;  %v1572_v57 = vld [vmem:[%s2067_s3] sm:$0xff]   ;;  %vm591_vm1 = vcmask 130048  }
   0xd   : > { %s1422_s28 = sshll.u32 %s2077_s24, 6  ;;  %1457 = vmatprep.subr.bf16.mxu0 %v1571_v56  ;;  %s1423_s17 = sshll.u32 %s2077_s24, 3 }
   0xe   : > { %s1754_s8 = scalar_lea.vmem %s2064_s0, %s1422_s28  ;;  %1458 = vmatpush3.bf16.msra.mxu0 %v1571_v56  ;;  %s327_s20 = scalar_lea.vmem %s2068_s4, %s1423_s17 }
   0xf   : > { %v1757_v0 = vld [vmem:[%s1754_s8] sm:$0xff]  ;;  %v1760_v1 = vld [vmem:[%s1754_s8 + $0x10] sm:$0xff]  ;;  %v340_v2 = vld [vmem:[%s1754_s8 + $0x8] sm:$0xff]  ;;  %1459 = vmatprep.subr.bf16.mxu0 %v1572_v57  ;;  %s2030_s16 = scalar_lea.vmem %s2071_s7, %s1422_s28 }
  0x10   : > { %v350_v3 = vsel %vm349_vm0, %v1757_v0, 0.0  ;;  %v356_v4 = vsel %vm349_vm0, %v1760_v1, 0.0  ;;  %v1768_v5 = vld [vmem:[%s1754_s8 + $0x18] sm:$0xff]  ;;  %v353_v6 = vsel %vm349_vm0, %v340_v2, 0.0  ;;  %v343_v8 = vld [vmem:[%s1754_s8 + $0x20] sm:$0xff]  ;;  %v344_v9 = vld [vmem:[%s1754_s8 + $0x28] sm:$0xff] }
  0x11   : > { %351 = vadd.xlane.f32.xlu0 %v350_v3  ;;  %357 = vadd.xlane.f32.xlu1 %v356_v4  ;;  %v359_v7 = vsel %vm349_vm0, %v1768_v5, 0.0  ;;  %v362_v10 = vsel %vm349_vm0, %v343_v8, 0.0  ;;  %v365_v11 = vsel %vm349_vm0, %v344_v9, 0.0  ;;  %v1778_v12 = vld [vmem:[%s1754_s8 + $0x30] sm:$0xff]  ;;  %v346_v13 = vld [vmem:[%s1754_s8 + $0x38] sm:$0xff] }
  0x12   : > { %v368_v14 = vsel %vm349_vm0, %v1778_v12, 0.0  ;;  %v371_v15 = vsel %vm349_vm0, %v346_v13, 0.0  ;;  %1460 = vmatpush3.bf16.msra.mxu0 %v1572_v57 }
  0x15   : > { %354 = vadd.xlane.f32.xlu0 %v353_v6  ;;  %360 = vadd.xlane.f32.xlu1 %v359_v7 }
  0x19   : > { %363 = vadd.xlane.f32.xlu0 %v362_v10  ;;  %366 = vadd.xlane.f32.xlu1 %v365_v11 }
  0x1d   : > { %369 = vadd.xlane.f32.xlu0 %v368_v14  ;;  %372 = vadd.xlane.f32.xlu1 %v371_v15 }
  0x9a   : > { %v352_v16 = vpop.xlane.xlu0 %351  ;;  %v358_v17 = vpop.xlane.xlu1 %357 }
  0x9b   : > { %v375_v18 = vmul.f32 0.03125, %v352_v16  ;;  %v377_v19 = vmul.f32 0.03125, %v358_v17 }
  0x9d   : > { %v1785_v20 = vsub.f32 %v1757_v0, %v375_v18  ;;  %v1788_v21 = vsub.f32 %v1760_v1, %v377_v19 }
  0x9e   : > { %v355_v22 = vpop.xlane.xlu0 %354  ;;  %v361_v23 = vpop.xlane.xlu1 %360 }
  0x9f   : > { %v376_v24 = vmul.f32 0.03125, %v355_v22  ;;  %v378_v25 = vmul.f32 0.03125, %v361_v23  ;;  %v391_v26 = vmul.f32 %v1785_v20, %v1785_v20  ;;  %v393_v27 = vmul.f32 %v1788_v21, %v1788_v21 }
  0xa1   : > { %v1794_v28 = vsub.f32 %v340_v2, %v376_v24  ;;  %v1797_v29 = vsub.f32 %v1768_v5, %v378_v25  ;;  %v399_v30 = vsel %vm349_vm0, %v391_v26, 0.0  ;;  %v405_v33 = vsel %vm349_vm0, %v393_v27, 0.0  ;;  %v1388_v26 = vld [vmem:[%s2065_s1] ss:$0 sm:$0xff] }
  0xa2   : > { %400 = vadd.xlane.f32.xlu0 %v399_v30  ;;  %v364_v31 = vpop.xlane.xlu0 %363  ;;  %v367_v32 = vpop.xlane.xlu1 %366 }
  0xa3   : > { %v379_v34 = vmul.f32 0.03125, %v364_v31  ;;  %v380_v35 = vmul.f32 0.03125, %v367_v32  ;;  %v392_v36 = vmul.f32 %v1794_v28, %v1794_v28  ;;  %v394_v37 = vmul.f32 %v1797_v29, %v1797_v29 }
  0xa5   : > { %v1805_v38 = vsub.f32 %v343_v8, %v379_v34  ;;  %v1807_v39 = vsub.f32 %v344_v9, %v380_v35  ;;  %v402_v40 = vsel %vm349_vm0, %v392_v36, 0.0  ;;  %v408_v43 = vsel %vm349_vm0, %v394_v37, 0.0 }
  0xa6   : > { %406 = vadd.xlane.f32.xlu0 %v405_v33  ;;  %403 = vadd.xlane.f32.xlu1 %v402_v40  ;;  %v370_v41 = vpop.xlane.xlu0 %369  ;;  %v373_v42 = vpop.xlane.xlu1 %372  ;;  %v1389_v33 = vld [vmem:[%s2066_s2] ss:$0 sm:$0xff] }
  0xa7   : > { %v381_v44 = vmul.f32 0.03125, %v370_v41  ;;  %v382_v45 = vmul.f32 0.03125, %v373_v42  ;;  %v395_v46 = vmul.f32 %v1805_v38, %v1805_v38  ;;  %v396_v47 = vmul.f32 %v1807_v39, %v1807_v39 }
  0xa9   : > { %v1816_v48 = vsub.f32 %v1778_v12, %v381_v44  ;;  %v1818_v49 = vsub.f32 %v346_v13, %v382_v45  ;;  %v411_v50 = vsel %vm349_vm0, %v395_v46, 0.0  ;;  %v414_v51 = vsel %vm349_vm0, %v396_v47, 0.0 }
  0xaa   : > { %409 = vadd.xlane.f32.xlu1 %v408_v43  ;;  %412 = vadd.xlane.f32.xlu0 %v411_v50 }
  0xab   : > { %v397_v52 = vmul.f32 %v1816_v48, %v1816_v48  ;;  %v398_v53 = vmul.f32 %v1818_v49, %v1818_v49 }
  0xad   : > { %v417_v54 = vsel %vm349_vm0, %v397_v52, 0.0  ;;  %v420_v55 = vsel %vm349_vm0, %v398_v53, 0.0 }
  0xae   : > { %415 = vadd.xlane.f32.xlu1 %v414_v51  ;;  %418 = vadd.xlane.f32.xlu0 %v417_v54 }
  0xb2   : > { %421 = vadd.xlane.f32.xlu1 %v420_v55 }
 0x12b   : > { %v401_v58 = vpop.xlane.xlu0 %400 }
 0x12c   : > { %v423_v59 = vmul.f32 0.03125, %v401_v58 }
 0x12e   : > { %v431_v60 = vadd.f32 1e-05, %v423_v59 }
 0x12f   : > { %v404_v61 = vpop.xlane.xlu1 %403  ;;  %v407_v62 = vpop.xlane.xlu0 %406 }
 0x130   : > { %1576 = vrsqrt.f32 %v431_v60  ;;  %v424_v63 = vmul.f32 0.03125, %v404_v61  ;;  %v425_v2 = vmul.f32 0.03125, %v407_v62 }
 0x132   : > { %v432_v3 = vadd.f32 1e-05, %v424_v63  ;;  %v433_v4 = vadd.f32 1e-05, %v425_v2 }
 0x133   : > { %v410_v6 = vpop.xlane.xlu1 %409  ;;  %v413_v7 = vpop.xlane.xlu0 %412 }
 0x134   : > { %1578 = vrsqrt.f32 %v432_v3  ;;  %v426_v8 = vmul.f32 0.03125, %v410_v6  ;;  %v427_v9 = vmul.f32 0.03125, %v413_v7 }
 0x135   : > { %1580 = vrsqrt.f32 %v433_v4 }
 0x136   : > { %v434_v10 = vadd.f32 1e-05, %v426_v8  ;;  %v435_v11 = vadd.f32 1e-05, %v427_v9 }
 0x137   : > { %v416_v13 = vpop.xlane.xlu1 %415  ;;  %v419_v14 = vpop.xlane.xlu0 %418 }
 0x138   : > { %1582 = vrsqrt.f32 %v434_v10  ;;  %v428_v15 = vmul.f32 0.03125, %v416_v13  ;;  %v429_v16 = vmul.f32 0.03125, %v419_v14 }
 0x139   : > { %1584 = vrsqrt.f32 %v435_v11 }
 0x13a   : > { %v436_v17 = vadd.f32 1e-05, %v428_v15  ;;  %v437_v18 = vadd.f32 1e-05, %v429_v16 }
 0x13b   : > { %v422_v19 = vpop.xlane.xlu1 %421 }
 0x13c   : > { %1586 = vrsqrt.f32 %v436_v17  ;;  %v430_v22 = vmul.f32 0.03125, %v422_v19 }
 0x13d   : > { %v1577_v23 = vpop.eup %1576  ;;  %1588 = vrsqrt.f32 %v437_v18 }
 0x13e   : > { %v438_v24 = vadd.f32 1e-05, %v430_v22  ;;  %v447_v25 = vmul.f32 %v1577_v23, %v1785_v20 }
 0x140   : > { %1590 = vrsqrt.f32 %v438_v24  ;;  %v461_v32 = vmul.f32 %v1388_v26, %v447_v25 }
 0x141   : > { %v1579_v27 = vpop.eup %1578 }
 0x142   : > { %v1581_v30 = vpop.eup %1580  ;;  %v448_v31 = vmul.f32 %v1579_v27, %v1794_v28  ;;  %v475_v20 = vadd.f32 %v1389_v33, %v461_v32 }
 0x143   : > { %v449_v34 = vmul.f32 %v1581_v30, %v1788_v21 }
 0x144   : > { %v462_v35 = vmul.f32 %v1388_v26, %v448_v31 }
 0x145   : > { %v1583_v36 = vpop.eup %1582  ;;  %v463_v42 = vmul.f32 %v1388_v26, %v449_v34 }
 0x146   : > { %v1585_v37 = vpop.eup %1584  ;;  %v476_v40 = vadd.f32 %v1389_v33, %v462_v35  ;;  %v450_v41 = vmul.f32 %v1583_v36, %v1797_v29 }
 0x147   : > { %v451_v43 = vmul.f32 %v1585_v37, %v1805_v38  ;;  %v477_v47 = vadd.f32 %v1389_v33, %v463_v42 }
 0x148   : > { %v483_v44 = vpack.c.bf16 %v476_v40, %v475_v20  ;;  %v464_v45 = vmul.f32 %v1388_v26, %v450_v41 }
 0x149   : > { %v1587_v28 = vpop.eup %1586  ;;  %v465_v51 = vmul.f32 %v1388_v26, %v451_v43 }
 0x14a   : > { %v1589_v46 = vpop.eup %1588  ;;  %1461 = vmatprep.mubr.msk.bf16.mxu0 %vm349_vm0, %v483_v44  ;;  %v478_v50 = vadd.f32 %v1389_v33, %v464_v45  ;;  %v452_v21 = vmul.f32 %v1587_v28, %v1807_v39 }
 0x14b   : > { %v453_v52 = vmul.f32 %v1589_v46, %v1816_v48  ;;  %v479_v38 = vadd.f32 %v1389_v33, %v465_v51  ;;  %v1856_v48 = vld [vmem:[%s327_s20] sm:$0xff]  }
 0x14c   : > { %v484_v53 = vpack.c.bf16 %v478_v50, %v477_v47  ;;  %v466_v54 = vmul.f32 %v1388_v26, %v452_v21  ;;  %1521 = vmatprep.subr.msk.bf16.mxu1 %vm591_vm1, %v1856_v48  ;;  %856 = vrot.lane.b32.xlu0 %v1856_v48, %s1684_s21 }
 0x14d   : > { %v1591_v29 = vpop.eup %1590  ;;  %v467_v57 = vmul.f32 %v1388_v26, %v453_v52 }
 0x14e   : > { %1462 = vmatmul.mubr.msk.bf16.vlgmr.msra.gmra.mxu0 %vm349_vm0, %v484_v53  ;;  %v480_v55 = vadd.f32 %v1389_v33, %v466_v54  ;;  %v454_v56 = vmul.f32 %v1591_v29, %v1818_v49  ;;  %v605_v49 = vsel %vm591_vm1, %v1856_v48, 0 }
 0x14f   : > { %v481_v60 = vadd.f32 %v1389_v33, %v467_v57  ;;  %1470 = vmatpush3.bf16.xpose.msra.mxu1 %v605_v49 }
 0x150   : > { %v485_v58 = vpack.c.bf16 %v480_v55, %v479_v38  ;;  %v468_v59 = vmul.f32 %v1388_v26, %v454_v56 }
 0x152   : > { %1465 = vmatprep.mubr.msk.bf16.mxu0 %vm349_vm0, %v485_v58  ;;  %v482_v39 = vadd.f32 %v1389_v33, %v468_v59 }
 0x154   : > { %v486_v61 = vpack.c.bf16 %v482_v39, %v481_v60 }
 0x156   : > { %1466 = vmatmul.mubr.msk.bf16.gmra.mxu0 %vm349_vm0, %v486_v61 }
 0x1be   : > { %v857_v62 = vpop.permute.xlu0 %856 }
 0x1bf   : > { %1522 = vmatprep.subr.msk.bf16.mxu1 %vm591_vm1, %v857_v62  ;;  %v871_v9 = vsel %vm591_vm1, %v857_v62, 0 }
 0x20e   : > { %v1463_v63 = vpop.f32.mrf.mxu0 }
 0x210   : > { %v549_v2 = vpop.f32.mrf.mxu0 }
 0x212   : > { %v1464_v3 = vpop.f32.mrf.mxu0 }
 0x213   : > { %v581_v7 = vpack.c.bf16 %v1464_v3, %v1463_v63 }
 0x214   : > { %v552_v4 = vpop.f32.mrf.mxu0 }
 0x215   : > { %v580_v6 = vpack.c.bf16 %v552_v4, %v549_v2 }
 0x216   : > { %v1467_v8 = vpop.f32.mrf.mxu0 }
 0x217   : > { %848 = vrot.lane.b32.xlu1 %v580_v6, %s1684_s21  ;;  %1471 = vmatprep.mubr.msk.bf16.mxu1 %vm591_vm1, %v580_v6 }
 0x218   : > { %v565_v10 = vpop.f32.mrf.mxu0  ;;  %1472 = vmatmul.mubr.msk.bf16.vlgmr.msra.gmra.mxu1 %vm591_vm1, %v581_v7 }
 0x219   : > { %1490 = vmatpush3.bf16.xpose.msra.mxu1 %v871_v9 }
 0x21a   : > { %v1468_v11 = vpop.f32.mrf.mxu0 }
 0x21b   : > { %v583_v13 = vpack.c.bf16 %v1468_v11, %v1467_v8  ;;  %850 = vrot.lane.b32.xlu1 %v581_v7, %s1684_s21 }
 0x21c   : > { %v568_v14 = vpop.f32.mrf.mxu0 }
 0x21d   : > { %v582_v15 = vpack.c.bf16 %v568_v14, %v565_v10  ;;  %854 = vrot.lane.b32.xlu0 %v583_v13, %s1684_s21 }
 0x21f   : > { %852 = vrot.lane.b32.xlu1 %v582_v15, %s1684_s21  ;;  %1475 = vmatprep.mubr.msk.bf16.mxu1 %vm591_vm1, %v582_v15 }
 0x220   : > { %1476 = vmatmul.mubr.msk.bf16.gmra.mxu1 %vm591_vm1, %v583_v13 }
 0x289   : > { %v849_v16 = vpop.permute.xlu1 %848 }
 0x28a   : > { %1491 = vmatprep.mubr.msk.bf16.mxu1 %vm591_vm1, %v849_v16 }
 0x28d   : > { %v851_v17 = vpop.permute.xlu1 %850 }
 0x28e   : > { %1492 = vmatmul.mubr.msk.bf16.vlgmr.msra.gmra.mxu1 %vm591_vm1, %v851_v17 }
 0x28f   : > { %v855_v19 = vpop.permute.xlu0 %854 }
 0x291   : > { %v853_v18 = vpop.permute.xlu1 %852 }
 0x292   : > { %1495 = vmatprep.mubr.msk.bf16.mxu1 %vm591_vm1, %v853_v18 }
 0x296   : > { %1496 = vmatmul.mubr.msk.bf16.gmra.mxu1 %vm591_vm1, %v855_v19 }
 0x2d8   : > { %v1473_v22 = vpop.f32.mrf.mxu1 }
 0x2d9   : > { %v678_v23 = vsel %vm591_vm1, %v1473_v22, -inf }
 0x2da   : > { %v641_v24 = vpop.f32.mrf.mxu1  ;;  %679 = vmax.xlane.f32.xlu0 %v678_v23 }
 0x2db   : > { %v672_v25 = vsel %vm591_vm1, %v641_v24, -inf }
 0x2dc   : > { %v1474_v26 = vpop.f32.mrf.mxu1  ;;  %673 = vmax.xlane.f32.xlu1 %v672_v25 }
 0x2dd   : > { %v681_v27 = vsel %vm591_vm1, %v1474_v26, -inf }
 0x2de   : > { %v644_v30 = vpop.f32.mrf.mxu1  ;;  %682 = vmax.xlane.f32.xlu0 %v681_v27 }
 0x2df   : > { %v675_v32 = vsel %vm591_vm1, %v644_v30, -inf }
 0x2e0   : > { %v1876_v31 = vpop.f32.mrf.mxu1 }
 0x2e1   : > { %v690_v33 = vsel %vm591_vm1, %v1876_v31, -inf }
 0x2e2   : > { %676 = vmax.xlane.f32.xlu0 %v675_v32  ;;  %691 = vmax.xlane.f32.xlu1 %v690_v33  ;;  %v1881_v34 = vpop.f32.mrf.mxu1 }
 0x2e3   : > { %v684_v36 = vsel %vm591_vm1, %v1881_v34, -inf }
 0x2e4   : > { %v1883_v35 = vpop.f32.mrf.mxu1 }
 0x2e5   : > { %v693_v37 = vsel %vm591_vm1, %v1883_v35, -inf }
 0x2e6   : > { %685 = vmax.xlane.f32.xlu1 %v684_v36  ;;  %694 = vmax.xlane.f32.xlu0 %v693_v37  ;;  %v660_v20 = vpop.f32.mrf.mxu1 }
 0x2e7   : > { %v687_v40 = vsel %vm591_vm1, %v660_v20, -inf }
 0x2ea   : > { %688 = vmax.xlane.f32.xlu0 %v687_v40 }
 0x34e   : > { %v1890_v41 = vpop.f32.mrf.mxu1 }
 0x34f   : > { %v944_v42 = vsel %vm591_vm1, %v1890_v41, -inf }
 0x350   : > { %945 = vmax.xlane.f32.xlu1 %v944_v42  ;;  %v1894_v43 = vpop.f32.mrf.mxu1 }
 0x351   : > { %v938_v45 = vsel %vm591_vm1, %v1894_v43, -inf }
 0x352   : > { %v1896_v44 = vpop.f32.mrf.mxu1 }
 0x353   : > { %v947_v28 = vsel %vm591_vm1, %v1896_v44, -inf }
 0x354   : > { %939 = vmax.xlane.f32.xlu1 %v938_v45  ;;  %948 = vmax.xlane.f32.xlu0 %v947_v28  ;;  %v1902_v46 = vpop.f32.mrf.mxu1 }
 0x355   : > { %v941_v50 = vsel %vm591_vm1, %v1902_v46, -inf }
 0x356   : > { %v1904_v47 = vpop.f32.mrf.mxu1 }
 0x357   : > { %v956_v21 = vsel %vm591_vm1, %v1904_v47, -inf }
 0x358   : > { %942 = vmax.xlane.f32.xlu0 %v941_v50  ;;  %957 = vmax.xlane.f32.xlu1 %v956_v21  ;;  %v1910_v51 = vpop.f32.mrf.mxu1 }
 0x359   : > { %v950_v53 = vsel %vm591_vm1, %v1910_v51, -inf }
 0x35a   : > { %v1912_v52 = vpop.f32.mrf.mxu1 }
 0x35b   : > { %v959_v54 = vsel %vm591_vm1, %v1912_v52, -inf }
 0x35c   : > { %951 = vmax.xlane.f32.xlu1 %v950_v53  ;;  %960 = vmax.xlane.f32.xlu0 %v959_v54  ;;  %v1918_v29 = vpop.f32.mrf.mxu1 }
 0x35d   : > { %v953_v38 = vsel %vm591_vm1, %v1918_v29, -inf }
 0x360   : > { %954 = vmax.xlane.f32.xlu0 %v953_v38 }
 0x363   : > { %v680_v55 = vpop.xlane.xlu0 %679 }
 0x364   : > { %v698_v56 = vsub.f32 %v1473_v22, %v680_v55 }
 0x365   : > { %v674_v57 = vpop.xlane.xlu1 %673 }
 0x366   : > { %v708_v58 = vmul.f32 1.442695, %v698_v56  ;;  %v696_v60 = vsub.f32 %v641_v24, %v674_v57 }
 0x367   : > { %v683_v59 = vpop.xlane.xlu0 %682 }
 0x368   : > { %v699_v39 = vsub.f32 %v1474_v26, %v683_v59  ;;  %1592 = vpow2.f32 %v708_v58  ;;  %v704_v62 = vmul.f32 1.442695, %v696_v60 }
 0x36a   : > { %v710_v61 = vmul.f32 1.442695, %v699_v39 }
 0x36b   : > { %v677_v49 = vpop.xlane.xlu0 %676  ;;  %v692_v11 = vpop.xlane.xlu1 %691 }
 0x36c   : > { %1594 = vpow2.f32 %v710_v61  ;;  %v697_v63 = vsub.f32 %v644_v30, %v677_v49  ;;  %v702_v25 = vsub.f32 %v1876_v31, %v692_v11 }
 0x36d   : > { %748 = vrot.lane.b32.xlu1 %v1856_v48, %s1685_s22  ;;  %1596 = vpow2.f32 %v704_v62 }
 0x36e   : > { %v706_v2 = vmul.f32 1.442695, %v697_v63  ;;  %v716_v37 = vmul.f32 1.442695, %v702_v25 }
 0x36f   : > { %v695_v10 = vpop.xlane.xlu0 %694 }
 0x370   : > { %1598 = vpow2.f32 %v706_v2  ;;  %v703_v19 = vsub.f32 %v1883_v35, %v695_v10 }
 0x372   : > { %v718_v27 = vmul.f32 1.442695, %v703_v19 }
 0x373   : > { %v689_v13 = vpop.xlane.xlu0 %688 }
 0x374   : > { %v701_v14 = vsub.f32 %v660_v20, %v689_v13 }
 0x375   : > { %v1924_v3 = vpop.eup %1592 }
 0x376   : > { %1014 = vrot.lane.b32.xlu0 %v1856_v48, %s1686_s23  ;;  %v686_v48 = vpop.xlane.xlu1 %685  ;;  %v714_v16 = vmul.f32 1.442695, %v701_v14 }
 0x377   : > { %v700_v15 = vsub.f32 %v1881_v34, %v686_v48 }
 0x378   : > { %1600 = vpow2.f32 %v714_v16 }
 0x379   : > { %v1926_v4 = vpop.eup %1594  ;;  %v712_v18 = vmul.f32 1.442695, %v700_v15 }
 0x37a   : > { %v745_v6 = vpack.c.bf16 %v1926_v4, %v1924_v3  ;;  %v1930_v7 = vpop.eup %1596 }
 0x37b   : > { %1602 = vpow2.f32 %v712_v18  ;;  %v720_v16 = vsel %vm591_vm1, %v1930_v7, 0.0  ;;  %v726_v18 = vsel %vm591_vm1, %v1924_v3, 0.0 }
 0x37d   : > { %v1932_v8 = vpop.eup %1598 }
 0x37e   : > { %v744_v9 = vpack.c.bf16 %v1932_v8, %v1930_v7  ;;  %v729_v7 = vsel %vm591_vm1, %v1926_v4, 0.0 }
 0x380   : > { %1481 = vmatprep.mubr.msk.bf16.mxu0 %vm591_vm1, %v744_v9 }
 0x3d9   : > { %v946_v17 = vpop.xlane.xlu1 %945 }
 0x3da   : > { %v964_v22 = vsub.f32 %v1890_v41, %v946_v17 }
 0x3dc   : > { %v974_v30 = vmul.f32 1.442695, %v964_v22  ;;  %v723_v22 = vsel %vm591_vm1, %v1932_v8, 0.0 }
 0x3dd   : > { %v940_v23 = vpop.xlane.xlu1 %939  ;;  %v949_v24 = vpop.xlane.xlu0 %948 }
 0x3de   : > { %v962_v26 = vsub.f32 %v1894_v43, %v940_v23  ;;  %v965_v33 = vsub.f32 %v1896_v44, %v949_v24 }
 0x3e0   : > { %v970_v32 = vmul.f32 1.442695, %v962_v26  ;;  %v976_v31 = vmul.f32 1.442695, %v965_v33 }
 0x3e1   : > { %v958_v34 = vpop.xlane.xlu1 %957  ;;  %v943_v36 = vpop.xlane.xlu0 %942 }
 0x3e2   : > { %1604 = vpow2.f32 %v970_v32  ;;  %v963_v35 = vsub.f32 %v1902_v46, %v943_v36  ;;  %v968_v20 = vsub.f32 %v1904_v47, %v958_v34  ;;  %v1947_v46 = vpop.eup %1600 }
 0x3e3   : > { %1606 = vpow2.f32 %v718_v27  ;;  %v1603_v53 = vpop.eup %1602  ;;  %v735_v3 = vsel %vm591_vm1, %v1947_v46, 0.0 }
 0x3e4   : > { %1608 = vpow2.f32 %v974_v30  ;;  %v972_v40 = vmul.f32 1.442695, %v963_v35  ;;  %v982_v45 = vmul.f32 1.442695, %v968_v20  ;;  %v732_v23 = vsel %vm591_vm1, %v1603_v53, 0.0  ;;  %v1574_v20 = vld [vmem:[%s2069_s5 + $0x8] sm:$0xff]  }
 0x3e5   : > { %v952_v41 = vpop.xlane.xlu1 %951  ;;  %v961_v42 = vpop.xlane.xlu0 %960  ;;  %1610 = vpow2.f32 %v716_v37  ;;  %1509 = vmatprep.subr.bf16.mxu1 %v1574_v20 }
 0x3e6   : > { %v966_v43 = vsub.f32 %v1910_v51, %v952_v41  ;;  %1612 = vpow2.f32 %v972_v40  ;;  %v969_v28 = vsub.f32 %v1912_v52, %v961_v42  ;;  %v746_v51 = vpack.c.bf16 %v1947_v46, %v1603_v53  ;;  %1510 = vmatpush3.bf16.msra.mxu1 %v1574_v20  ;;  %v1575_v42 = vld [vmem:[%s2069_s5] sm:$0xff]  }
 0x3e7   : > { %1614 = vpow2.f32 %v976_v31  ;;  %1511 = vmatprep.subr.bf16.mxu1 %v1575_v42 }
 0x3e8   : > { %v978_v44 = vmul.f32 1.442695, %v966_v43  ;;  %v984_v38 = vmul.f32 1.442695, %v969_v28 }
 0x3e9   : > { %v749_v50 = vpop.permute.xlu1 %748  ;;  %v955_v21 = vpop.xlane.xlu0 %954 }
 0x3ea   : > { %1616 = vpow2.f32 %v978_v44  ;;  %v967_v47 = vsub.f32 %v1918_v29, %v955_v21  ;;  %1479 = vmatprep.subr.bf16.mxu0 %v749_v50  ;;  %1512 = vmatpush3.bf16.msra.mxu1 %v1575_v42 }
 0x3eb   : > { %1480 = vmatpush3.bf16.msra.mxu0 %v749_v50  ;;  %1618 = vpow2.f32 %v982_v45 }
 0x3ec   : > { %v980_v54 = vmul.f32 1.442695, %v967_v47 }
 0x3ed   : > { %v1015_v55 = vpop.permute.xlu0 %1014 }
 0x3ee   : > { %1620 = vpow2.f32 %v980_v54  ;;  %1482 = vmatmul.mubr.msk.bf16.vlgmr.msra.gmra.mxu0 %vm591_vm1, %v745_v6  ;;  %1499 = vmatprep.subr.bf16.mxu0 %v1015_v55 }
 0x3ef   : > { %v1605_v52 = vpop.eup %1604  ;;  %1485 = vmatprep.mubr.msk.bf16.mxu0 %vm591_vm1, %v746_v51  ;;  %1500 = vmatpush3.bf16.msra.mxu0 %v1015_v55  ;;  %1622 = vpow2.f32 %v984_v38 }
 0x3f0   : > { %v1607_v56 = vpop.eup %1606  ;;  %v986_v29 = vsel %vm591_vm1, %v1605_v52, 0.0 }
 0x3f1   : > { %v1609_v57 = vpop.eup %1608  ;;  %987 = vadd.xlane.f32.xlu1 %v986_v29  ;;  %v741_v25 = vsel %vm591_vm1, %v1607_v56, 0.0 }
 0x3f2   : > { %v1611_v58 = vpop.eup %1610  ;;  %v992_v60 = vsel %vm591_vm1, %v1609_v57, 0.0 }
 0x3f3   : > { %v1613_v59 = vpop.eup %1612  ;;  %v747_v39 = vpack.c.bf16 %v1607_v56, %v1611_v58  ;;  %v738_v24 = vsel %vm591_vm1, %v1611_v58, 0.0 }
 0x3f4   : > { %v989_v61 = vsel %vm591_vm1, %v1613_v59, 0.0  ;;  %v1010_v49 = vpack.c.bf16 %v1613_v59, %v1605_v52  ;;  %v1615_v62 = vpop.eup %1614 }
 0x3f5   : > { %993 = vadd.xlane.f32.xlu1 %v992_v60  ;;  %990 = vadd.xlane.f32.xlu0 %v989_v61  ;;  %v995_v9 = vsel %vm591_vm1, %v1615_v62, 0.0  ;;  %v1011_v11 = vpack.c.bf16 %v1615_v62, %v1609_v57 }
 0x3f6   : > { %1486 = vmatmul.mubr.msk.bf16.gmra.mxu0 %vm591_vm1, %v747_v39 }
 0x3f7   : > { %v1617_v63 = vpop.eup %1616  ;;  %1501 = vmatprep.mubr.msk.bf16.mxu0 %vm591_vm1, %v1010_v49 }
 0x3f8   : > { %v998_v2 = vsel %vm591_vm1, %v1617_v63, 0.0  ;;  %v1619_v6 = vpop.eup %1618 }
 0x3f9   : > { %999 = vadd.xlane.f32.xlu1 %v998_v2  ;;  %996 = vadd.xlane.f32.xlu0 %v995_v9  ;;  %v1004_v13 = vsel %vm591_vm1, %v1619_v6, 0.0 }
 0x3fb   : > { %v1621_v10 = vpop.eup %1620 }
 0x3fc   : > { %v1001_v48 = vsel %vm591_vm1, %v1621_v10, 0.0  ;;  %v1012_v14 = vpack.c.bf16 %v1621_v10, %v1617_v63  ;;  %v1623_v15 = vpop.eup %1622 }
 0x3fd   : > { %1005 = vadd.xlane.f32.xlu1 %v1004_v13  ;;  %1002 = vadd.xlane.f32.xlu0 %v1001_v48  ;;  %v1007_v17 = vsel %vm591_vm1, %v1623_v15, 0.0  ;;  %v1013_v19 = vpack.c.bf16 %v1623_v15, %v1619_v6 }
 0x3fe   : > { %1502 = vmatmul.mubr.msk.bf16.vlgmr.msra.gmra.mxu0 %vm591_vm1, %v1011_v11 }
 0x3ff   : > { %1505 = vmatprep.mubr.msk.bf16.mxu0 %vm591_vm1, %v1012_v14 }
 0x401   : > { %721 = vadd.xlane.f32.xlu1 %v720_v16  ;;  %1008 = vadd.xlane.f32.xlu0 %v1007_v17 }
 0x405   : > { %727 = vadd.xlane.f32.xlu1 %v726_v18  ;;  %724 = vadd.xlane.f32.xlu0 %v723_v22 }
 0x406   : > { %1506 = vmatmul.mubr.msk.bf16.gmra.mxu0 %vm591_vm1, %v1013_v19 }
 0x409   : > { %733 = vadd.xlane.f32.xlu1 %v732_v23  ;;  %730 = vadd.xlane.f32.xlu0 %v729_v7 }
 0x40d   : > { %739 = vadd.xlane.f32.xlu1 %v738_v24  ;;  %736 = vadd.xlane.f32.xlu0 %v735_v3 }
 0x411   : > { %742 = vadd.xlane.f32.xlu0 %v741_v25 }
 0x47a   : > { %v988_v8 = vpop.xlane.xlu1 %987 }
 0x47e   : > { %v991_v26 = vpop.xlane.xlu0 %990  ;;  %v994_v32 = vpop.xlane.xlu1 %993 }
 0x47f   : > { %1624 = vrcp.f32 %v994_v32 }
 0x482   : > { %v997_v33 = vpop.xlane.xlu0 %996  ;;  %v1000_v40 = vpop.xlane.xlu1 %999 }
 0x483   : > { %1626 = vrcp.f32 %v997_v33 }
 0x484   : > { %1628 = vrcp.f32 %v988_v8 }
 0x485   : > { %1630 = vrcp.f32 %v991_v26 }
 0x486   : > { %v1003_v37 = vpop.xlane.xlu0 %1002  ;;  %1632 = vrcp.f32 %v1000_v40  ;;  %v1006_v44 = vpop.xlane.xlu1 %1005 }
 0x487   : > { %1634 = vrcp.f32 %v1003_v37 }
 0x48a   : > { %v1009_v43 = vpop.xlane.xlu0 %1008  ;;  %v722_v13 = vpop.xlane.xlu1 %721 }
 0x48b   : > { %1636 = vrcp.f32 %v1009_v43 }
 0x48c   : > { %v1625_v50 = vpop.eup %1624  ;;  %1638 = vrcp.f32 %v1006_v44 }
 0x48d   : > { %1640 = vrcp.f32 %v722_v13 }
 0x48e   : > { %v725_v48 = vpop.xlane.xlu0 %724  ;;  %v728_v14 = vpop.xlane.xlu1 %727 }
 0x48f   : > { %1642 = vrcp.f32 %v728_v14 }
 0x490   : > { %v1627_v21 = vpop.eup %1626 }
 0x491   : > { %v1629_v47 = vpop.eup %1628 }
 0x492   : > { %v1631_v38 = vpop.eup %1630  ;;  %v731_v15 = vpop.xlane.xlu0 %730 }
 0x493   : > { %v1633_v60 = vpop.eup %1632  ;;  %1644 = vrcp.f32 %v731_v15  ;;  %v734_v16 = vpop.xlane.xlu1 %733  ;;  %v1657_v15 = vld [vmem:[%s1754_s8 + $0x20] sm:$0xff] }
 0x494   : > { %v1635_v39 = vpop.eup %1634  ;;  %1646 = vrcp.f32 %v725_v48 }
 0x495   : > { %1648 = vrcp.f32 %v734_v16 }
 0x496   : > { %v737_v17 = vpop.xlane.xlu0 %736 }
 0x497   : > { %v740_v18 = vpop.xlane.xlu1 %739  ;;  %1650 = vrcp.f32 %v737_v17 }
 0x498   : > { %v1637_v63 = vpop.eup %1636  ;;  %1652 = vrcp.f32 %v740_v18 }
 0x499   : > { %v1639_v9 = vpop.eup %1638 }
 0x49a   : > { %v743_v19 = vpop.xlane.xlu0 %742  ;;  %v1641_v22 = vpop.eup %1640 }
 0x49b   : > { %1654 = vrcp.f32 %v743_v19  ;;  %v1658_v19 = vld [vmem:[%s1754_s8 + $0x38] sm:$0xff] }
 0x49c   : > { %v1643_v23 = vpop.eup %1642 }
 0x4a0   : > { %v1645_v7 = vpop.eup %1644 }
 0x4a1   : > { %v1647_v3 = vpop.eup %1646 }
 0x4ae   : > { %v1979_v27 = vpop.f32.mrf.mxu0 }
 0x4af   : > { %v838_v25 = vmul.f32 %v1643_v23, %v1979_v27 }
 0x4b0   : > { %v1981_v30 = vpop.f32.mrf.mxu0 }
 0x4b1   : > { %v836_v33 = vmul.f32 %v1641_v22, %v1981_v30 }
 0x4b2   : > { %v1983_v4 = vpop.f32.mrf.mxu0 }
 0x4b3   : > { %v839_v8 = vmul.f32 %v1645_v7, %v1983_v4  ;;  %v1649_v4 = vpop.eup %1648 }
 0x4b4   : > { %v1985_v34 = vpop.f32.mrf.mxu0  ;;  %v1651_v30 = vpop.eup %1650 }
 0x4b5   : > { %v837_v37 = vmul.f32 %v1647_v3, %v1985_v34 }
 0x4b6   : > { %v1987_v36 = vpop.f32.mrf.mxu0 }
 0x4b8   : > { %v1989_v35 = vpop.f32.mrf.mxu0 }
 0x4ba   : > { %v1994_v31 = vpop.f32.mrf.mxu0 }
 0x4bc   : > { %v1996_v41 = vpop.f32.mrf.mxu0 }
 0x4be   : > { %v1503_v45 = vpop.f32.mrf.mxu0 }
 0x4bf   : > { %v1104_v53 = vmul.f32 %v1625_v50, %v1503_v45 }
 0x4c0   : > { %v1063_v28 = vpop.f32.mrf.mxu0 }
 0x4c1   : > { %v1102_v55 = vmul.f32 %v1629_v47, %v1063_v28 }
 0x4c2   : > { %v1504_v46 = vpop.f32.mrf.mxu0 }
 0x4c3   : > { %v1105_v54 = vmul.f32 %v1627_v21, %v1504_v46  ;;  %v840_v21 = vmul.f32 %v1649_v4, %v1989_v35  ;;  %v841_v46 = vmul.f32 %v1651_v30, %v1996_v41 }
 0x4c4   : > { %v1066_v51 = vpop.f32.mrf.mxu0 }
 0x4c5   : > { %v1556_v52 = vpack.i.bf16 %v1105_v54, %v1104_v53  ;;  %v1103_v56 = vmul.f32 %v1631_v38, %v1066_v51  ;;  %v1653_v54 = vpop.eup %1652 }
 0x4c6   : > { %v1507_v29 = vpop.f32.mrf.mxu0  ;;  %v1655_v38 = vpop.eup %1654 }
 0x4c7   : > { %v1551_v57 = vpack.i.bf16 %v1103_v56, %v1102_v55  ;;  %1557 = vrot.lane.b32.xlu0 %v1556_v52, %s1687_s11  ;;  %v1108_v10 = vmul.f32 %v1639_v9, %v1507_v29  ;;  %v842_v29 = vmul.f32 %v1653_v54, %v1987_v36 }
 0x4c8   : > { %v1079_v58 = vpop.f32.mrf.mxu0 }
 0x4c9   : > { %1552 = vrot.lane.b32.xlu1 %v1551_v57, %s1687_s11  ;;  %v1106_v49 = vmul.f32 %v1633_v60, %v1079_v58  ;;  %v843_v57 = vmul.f32 %v1655_v38, %v1994_v31 }
 0x4ca   : > { %v1508_v59 = vpop.f32.mrf.mxu0 }
 0x4cb   : > { %v1109_v2 = vmul.f32 %v1637_v63, %v1508_v59 }
 0x4cc   : > { %v1082_v61 = vpop.f32.mrf.mxu0 }
 0x4cd   : > { %v1107_v62 = vmul.f32 %v1635_v39, %v1082_v61  ;;  %v1566_v11 = vpack.i.bf16 %v1109_v2, %v1108_v10  ;;  %v1419_v61 = vld [vmem:[%s2070_s6] ss:$0 sm:$0xff]  ;;  %v1656_v10 = vld [vmem:[%s1754_s8 + $0x8] sm:$0xff] }
 0x4cf   : > { %v1561_v6 = vpack.i.bf16 %v1107_v62, %v1106_v49 }
 0x4d1   : > { %1562 = vrot.lane.b32.xlu1 %v1561_v6, %s1687_s11 }
 0x4d5   : > { %1567 = vrot.lane.b32.xlu1 %v1566_v11, %s1687_s11 }
 0x539   : > { %v1558_v24 = vpop.permute.xlu0 %1557 }
 0x53a   : > { %v1560_v26 = vunpack.i.h.bf16 %v1558_v24  ;;  %v1559_v32 = vunpack.i.l.bf16 %v1558_v24  ;;  %v1659_v24 = vld [vmem:[%s1754_s8 + $0x28] sm:$0xff] }
 0x53b   : > { %v1553_v20 = vpop.permute.xlu1 %1552 }
 0x53c   : > { %v1145_v40 = vsel %vm591_vm1, %v839_v8, %v1560_v26  ;;  %v1144_v42 = vsel %vm591_vm1, %v838_v25, %v1559_v32  ;;  %v1555_v43 = vunpack.i.h.bf16 %v1553_v20  ;;  %v1554_v45 = vunpack.i.l.bf16 %v1553_v20 }
 0x53d   : > { %v1151_v44 = vpack.c.bf16 %v1145_v40, %v1144_v42 }
 0x53e   : > { %v1142_v28 = vsel %vm591_vm1, %v836_v33, %v1554_v45  ;;  %v1143_v27 = vsel %vm591_vm1, %v837_v37, %v1555_v43 }
 0x53f   : > { %v1150_v50 = vpack.c.bf16 %v1143_v27, %v1142_v28 }
 0x541   : > { %1513 = vmatprep.mubr.msk.bf16.mxu1 %vm349_vm0, %v1150_v50 }
 0x542   : > { %1514 = vmatmul.mubr.msk.bf16.vlgmr.msra.gmra.mxu1 %vm349_vm0, %v1151_v44 }
 0x543   : > { %v1563_v34 = vpop.permute.xlu1 %1562 }
 0x544   : > { %v1565_v47 = vunpack.i.h.bf16 %v1563_v34  ;;  %v1564_v53 = vunpack.i.l.bf16 %v1563_v34 }
 0x546   : > { %v1146_v51 = vsel %vm591_vm1, %v840_v21, %v1564_v53  ;;  %v1147_v55 = vsel %vm591_vm1, %v841_v46, %v1565_v47 }
 0x547   : > { %v1152_v52 = vpack.c.bf16 %v1147_v55, %v1146_v51  ;;  %v1568_v56 = vpop.permute.xlu1 %1567 }
 0x548   : > { %v1570_v58 = vunpack.i.h.bf16 %v1568_v56  ;;  %v1569_v59 = vunpack.i.l.bf16 %v1568_v56 }
 0x549   : > { %1517 = vmatprep.mubr.msk.bf16.mxu1 %vm349_vm0, %v1152_v52 }
 0x54a   : > { %v1148_v35 = vsel %vm591_vm1, %v842_v29, %v1569_v59  ;;  %v1149_v41 = vsel %vm591_vm1, %v843_v57, %v1570_v58 }
 0x54b   : > { %v1153_v60 = vpack.c.bf16 %v1149_v41, %v1148_v35 }
 0x54d   : > { %1518 = vmatmul.mubr.msk.bf16.gmra.mxu1 %vm349_vm0, %v1153_v60 }
 0x602   : > { %v1515_v39 = vpop.f32.mrf.mxu1 }
 0x603   : > { %v1249_v36 = vadd.f32 %v1515_v39, %v1760_v1 }
 0x604   : > { %v1216_v31 = vpop.f32.mrf.mxu1 }
 0x605   : > { %v1264_v49 = vadd.f32 %v1419_v61, %v1249_v36  ;;  %v1247_v62 = vadd.f32 %v1216_v31, %v1757_v0 }
 0x606   : > { %v1516_v63 = vpop.f32.mrf.mxu1 }
 0x607   : > { %1272 = vst.msk [vmem:[%s2030_s16 + $0x10] sm:$0xff] %vm349_vm0, %v1264_v49  ;;  %v1262_v2 = vadd.f32 %v1419_v61, %v1247_v62  ;;  %v1250_v1 = vadd.f32 %v1516_v63, %v1768_v5 }
 0x608   : > { %v1219_v6 = vpop.f32.mrf.mxu1 }
 0x609   : > { %1270 = vst.msk [vmem:[%s2030_s16] sm:$0xff] %vm349_vm0, %v1262_v2  ;;  %v1265_v9 = vadd.f32 %v1419_v61, %v1250_v1  ;;  %v1248_v11 = vadd.f32 %v1656_v10, %v1219_v6 }
 0x60b   : > { %1273 = vst.msk [vmem:[%s2030_s16 + $0x18] sm:$0xff] %vm349_vm0, %v1265_v9  ;;  %v1263_v13 = vadd.f32 %v1419_v61, %v1248_v11 }
 0x60d   : > { %1271 = vst.msk [vmem:[%s2030_s16 + $0x8] sm:$0xff] %vm349_vm0, %v1263_v13  ;;  %v1519_v0 = vpop.f32.mrf.mxu1 }
 0x60e   : > { %v1253_v48 = vadd.f32 %v1519_v0, %v1778_v12 }
 0x60f   : > { %v1232_v5 = vpop.f32.mrf.mxu1 }
 0x610   : > { %v1268_v14 = vadd.f32 %v1419_v61, %v1253_v48  ;;  %v1251_v16 = vadd.f32 %v1657_v15, %v1232_v5 }
 0x611   : > { %v1520_v17 = vpop.f32.mrf.mxu1 }
 0x612   : > { %1276 = vst.msk [vmem:[%s2030_s16 + $0x30] sm:$0xff] %vm349_vm0, %v1268_v14  ;;  %v1266_v18 = vadd.f32 %v1419_v61, %v1251_v16  ;;  %v1254_v22 = vadd.f32 %v1658_v19, %v1520_v17 }
 0x613   : > { %v1235_v23 = vpop.f32.mrf.mxu1 }
 0x614   : > { %1274 = vst.msk [vmem:[%s2030_s16 + $0x20] sm:$0xff] %vm349_vm0, %v1266_v18  ;;  %v1269_v7 = vadd.f32 %v1419_v61, %v1254_v22  ;;  %v1252_v3 = vadd.f32 %v1659_v24, %v1235_v23 }
 0x616   : > { %1277 = vst.msk [vmem:[%s2030_s16 + $0x38] sm:$0xff] %vm349_vm0, %v1269_v7  ;;  %v1267_v12 = vadd.f32 %v1419_v61, %v1252_v3 }
 0x618   : > { %1275 = vst.msk [vmem:[%s2030_s16 + $0x28] sm:$0xff] %vm349_vm0, %v1267_v12 }
 0x619 PF: > { %s17_s26 = sadd.s32 1, %s1682_s26   ;;  %s2072_s24 = smov %s1678_s25 }
 0x61a   : > { %p14_p5 = scmp.ge.s32.totalorder %s17_s26, 4   ;;  %s2073_s25 = smov %s2075_s27 }
 0x61c   :  { %16 = sbr.rel (!%p14_p5) target bundleno = 2 (0x2), region = 81 }

// kernel: encode_block_forward.3
= control target key start
LH: loop header
LB: loop body
LE: loop exit
PB: predicated region body
PF: predicated region fallthrough
CT: control target
= control target key end

     0   :  { %vm97_vm0 = vcmask 1041409   ;;  %vm100_vm1 = vcmask 1042434   ;;  %vm103_vm2 = vcmask 1043459   ;;  %vm106_vm3 = vcmask 1044484   ;;  %s6057_s0 = inlined_call_operand.vmem [shape: f32[32,4,32], index: 0, kind: input, shape index: {}]   ;;  %s6058_s1 = inlined_call_operand.vmem [shape: f32[1,32], index: 1, kind: input, shape index: {}]   ;;  %s6059_s2 = inlined_call_operand.vmem [shape: f32[1,32], index: 2, kind: input, shape index: {}]   ;;  %s6060_s3 = inlined_call_operand.vmem [shape: bf16[4,32,32], index: 3, kind: input, shape index: {}]   ;;  %s6061_s4 = inlined_call_operand.vmem [shape: f32[1,32], index: 4, kind: input, shape index: {}]   ;;  %s6062_s7 = inlined_call_operand.vmem [shape: bf16[32,64], index: 7, kind: input, shape index: {}]   ;;  %s6063_s5 = inlined_call_operand.vmem [shape: f32[1,32], index: 5, kind: input, shape index: {}]   ;;  %s6064_s6 = inlined_call_operand.vmem [shape: f32[1,32], index: 6, kind: input, shape index: {}]   ;;  %s6065_s8 = inlined_call_operand.vmem [shape: bf16[32,64], index: 8, kind: output, shape index: {}]  }
   0x1   :  { %vm109_vm4 = vcmask 1045509   ;;  %vm112_vm5 = vcmask 1046534   ;;  %v3610_v0 = vld [vmem:[%s6057_s0 + $0x41] sm:$0x1]  ;;  %v3615_v1 = vld [vmem:[%s6057_s0 + $0x45] sm:$0x1] }
   0x2   :  { %v3620_v2 = vld [vmem:[%s6057_s0 + $0x49] sm:$0x1]  ;;  %v3625_v3 = vld [vmem:[%s6057_s0 + $0x4d] sm:$0x1]  ;;  %v3630_v4 = vld [vmem:[%s6057_s0 + $0x51] sm:$0x1] }
   0x3   :  { %v3635_v5 = vld [vmem:[%s6057_s0 + $0x55] sm:$0x1]  ;;  %v3640_v6 = vld [vmem:[%s6057_s0 + $0x59] sm:$0x1]  ;;  %vm115_vm6 = vcmask 1047559   ;;  %v725_v8 = vrot.slane %v3615_v1, 7 }
   0x4   :  { %v3645_v7 = vld [vmem:[%s6057_s0 + $0x5d] sm:$0x1]  ;;  %v727_v9 = vrot.slane %v3620_v2, 6  ;;  %v729_v10 = vrot.slane %v3625_v3, 5  ;;  %v731_v11 = vrot.slane %v3630_v4, 4  ;;  %v733_v12 = vrot.slane %v3635_v5, 3 }
   0x5   :  { %v735_v13 = vrot.slane %v3640_v6, 2  ;;  %v737_v14 = vrot.slane %v3645_v7, 1  ;;  %v3657_v15 = vld [vmem:[%s6057_s0 + $0x1] sm:$0x1]  ;;  %v726_v16 = vsel %vm97_vm0, %v725_v8, %v3610_v0  ;;  %v3664_v17 = vld [vmem:[%s6057_s0 + $0x5] sm:$0x1] }
   0x6   :  { %v3669_v18 = vld [vmem:[%s6057_s0 + $0x9] sm:$0x1]  ;;  %v3674_v19 = vld [vmem:[%s6057_s0 + $0xd] sm:$0x1]  ;;  %v728_v20 = vsel %vm100_vm1, %v727_v9, %v726_v16  ;;  %v3680_v21 = vld [vmem:[%s6057_s0 + $0x11] sm:$0x1] }
   0x7   :  { %v3685_v22 = vld [vmem:[%s6057_s0 + $0x15] sm:$0x1]  ;;  %v3690_v23 = vld [vmem:[%s6057_s0 + $0x19] sm:$0x1]  ;;  %v730_v24 = vsel %vm103_vm2, %v729_v10, %v728_v20  ;;  %v3696_v25 = vld [vmem:[%s6057_s0 + $0x1d] sm:$0x1] }
   0x8   :  { %v697_v26 = vrot.slane %v3664_v17, 7  ;;  %v699_v27 = vrot.slane %v3669_v18, 6  ;;  %v701_v28 = vrot.slane %v3674_v19, 5  ;;  %vm163_vm7 = vcmask 261120   ;;  %v3707_v32 = vld [vmem:[%s6057_s0 + $0x61] sm:$0x1] }
   0x9   :  { %v732_v29 = vsel %vm106_vm3, %v731_v11, %v730_v24  ;;  %v703_v30 = vrot.slane %v3680_v21, 4  ;;  %v705_v31 = vrot.slane %v3685_v22, 3  ;;  %v707_v35 = vrot.slane %v3690_v23, 2  ;;  %v3717_v37 = vld [vmem:[%s6057_s0 + $0x65] sm:$0x1] }
   0xa   :  { %v734_v33 = vsel %vm109_vm4, %v733_v12, %v732_v29  ;;  %v698_v34 = vsel %vm97_vm0, %v697_v26, %v3657_v15  ;;  %v709_v36 = vrot.slane %v3696_v25, 1  ;;  %v3722_v38 = vld [vmem:[%s6057_s0 + $0x69] sm:$0x1]  ;;  %v3729_v41 = vld [vmem:[%s6057_s0 + $0x6d] sm:$0x1]  ;;  %v739_v48 = vrot.slane %v3717_v37, 7 }
   0xb   :  { %v736_v39 = vsel %vm112_vm5, %v735_v13, %v734_v33  ;;  %v700_v40 = vsel %vm100_vm1, %v699_v27, %v698_v34  ;;  %v3734_v42 = vld [vmem:[%s6057_s0 + $0x71] sm:$0x1]  ;;  %v3739_v43 = vld [vmem:[%s6057_s0 + $0x75] sm:$0x1]  ;;  %v3746_v46 = vld [vmem:[%s6057_s0 + $0x79] sm:$0x1] }
   0xc   :  { %v738_v44 = vsel %vm115_vm6, %v737_v14, %v736_v39  ;;  %v702_v45 = vsel %vm103_vm2, %v701_v28, %v700_v40  ;;  %v3751_v47 = vld [vmem:[%s6057_s0 + $0x7d] sm:$0x1]  ;;  %v741_v49 = vrot.slane %v3722_v38, 6  ;;  %v743_v52 = vrot.slane %v3729_v41, 5  ;;  %v3762_v54 = vld [vmem:[%s6057_s0 + $0x21] sm:$0x1] }
   0xd   :  { %v763_v50 = vsel %vm163_vm7, %v738_v44, 0.0  ;;  %v704_v51 = vsel %vm106_vm3, %v703_v30, %v702_v45  ;;  %v745_v53 = vrot.slane %v3734_v42, 4  ;;  %v740_v56 = vsel %vm97_vm0, %v739_v48, %v3707_v32  ;;  %v3772_v59 = vld [vmem:[%s6057_s0 + $0x25] sm:$0x1]  ;;  %v3777_v60 = vld [vmem:[%s6057_s0 + $0x29] sm:$0x1] }
   0xe   :  { %764 = vadd.xlane.f32.xlu1 %v763_v50  ;;  %v706_v55 = vsel %vm109_vm4, %v705_v31, %v704_v51  ;;  %v747_v57 = vrot.slane %v3739_v43, 3  ;;  %v749_v58 = vrot.slane %v3746_v46, 2  ;;  %v742_v62 = vsel %vm100_vm1, %v741_v49, %v740_v56  ;;  %v3785_v8 = vld [vmem:[%s6057_s0 + $0x2d] sm:$0x1]  ;;  %v3790_v9 = vld [vmem:[%s6057_s0 + $0x31] sm:$0x1] }
   0xf   :  { %v708_v61 = vsel %vm112_vm5, %v707_v35, %v706_v55  ;;  %v751_v63 = vrot.slane %v3751_v47, 1  ;;  %v711_v10 = vrot.slane %v3772_v59, 7  ;;  %v744_v12 = vsel %vm103_vm2, %v743_v52, %v742_v62  ;;  %v3798_v13 = vld [vmem:[%s6057_s0 + $0x35] sm:$0x1]  ;;  %v3803_v14 = vld [vmem:[%s6057_s0 + $0x39] sm:$0x1] }
  0x10   :  { %v710_v11 = vsel %vm115_vm6, %v709_v36, %v708_v61  ;;  %v3808_v16 = vld [vmem:[%s6057_s0 + $0x3d] sm:$0x1]  ;;  %v746_v24 = vsel %vm106_vm3, %v745_v53, %v744_v12  ;;  %v713_v27 = vrot.slane %v3777_v60, 6  ;;  %v41_v28 = vld [vmem:[%s6057_s0 + $0x24] sm:$0x1]  ;;  %v715_v30 = vrot.slane %v3785_v8, 5 }
  0x11   :  { %v757_v20 = vsel %vm163_vm7, %v710_v11, 0.0  ;;  %v712_v26 = vsel %vm97_vm0, %v711_v10, %v3762_v54  ;;  %v748_v29 = vsel %vm109_vm4, %v747_v57, %v746_v24  ;;  %v717_v31 = vrot.slane %v3790_v9, 4  ;;  %v40_v34 = vld [vmem:[%s6057_s0 + $0x20] sm:$0x1]  ;;  %v42_v35 = vld [vmem:[%s6057_s0 + $0x28] sm:$0x1] }
  0x12   :  { %758 = vadd.xlane.f32.xlu0 %v757_v20  ;;  %v719_v33 = vrot.slane %v3798_v13, 3  ;;  %v750_v36 = vsel %vm112_vm5, %v749_v58, %v748_v29  ;;  %v714_v39 = vsel %vm100_vm1, %v713_v27, %v712_v26  ;;  %v721_v40 = vrot.slane %v3803_v14, 2  ;;  %v43_v45 = vld [vmem:[%s6057_s0 + $0x2c] sm:$0x1]  ;;  %v44_v48 = vld [vmem:[%s6057_s0 + $0x30] sm:$0x1] }
  0x13   :  { %v723_v44 = vrot.slane %v3808_v16, 1  ;;  %v752_v49 = vsel %vm115_vm6, %v751_v63, %v750_v36  ;;  %v716_v50 = vsel %vm103_vm2, %v715_v30, %v714_v39  ;;  %v45_v51 = vld [vmem:[%s6057_s0 + $0x34] sm:$0x1]  ;;  %v46_v52 = vld [vmem:[%s6057_s0 + $0x38] sm:$0x1]  ;;  %v117_v57 = vrot.slane %v41_v28, 7 }
  0x14   :  { %v47_v53 = vld [vmem:[%s6057_s0 + $0x3c] sm:$0x1]  ;;  %v766_v55 = vsel %vm163_vm7, %v752_v49, 0.0  ;;  %v718_v56 = vsel %vm106_vm3, %v717_v31, %v716_v50  ;;  %v119_v58 = vrot.slane %v42_v35, 6  ;;  %v121_v62 = vrot.slane %v43_v45, 5 }
  0x15   :  { %767 = vadd.xlane.f32.xlu1 %v766_v55  ;;  %v720_v61 = vsel %vm109_vm4, %v719_v33, %v718_v56  ;;  %v123_v63 = vrot.slane %v44_v48, 4  ;;  %v125_v10 = vrot.slane %v45_v51, 3  ;;  %v3855_v11 = vld [vmem:[%s6057_s0] sm:$0x1]  ;;  %v3860_v12 = vld [vmem:[%s6057_s0 + $0x4] sm:$0x1]  ;;  %v118_v24 = vsel %vm97_vm0, %v117_v57, %v40_v34 }
  0x16   :  { %v722_v20 = vsel %vm112_vm5, %v721_v40, %v720_v61  ;;  %v127_v26 = vrot.slane %v46_v52, 2  ;;  %v129_v27 = vrot.slane %v47_v53, 1  ;;  %v3867_v28 = vld [vmem:[%s6057_s0 + $0x8] sm:$0x1]  ;;  %v3872_v29 = vld [vmem:[%s6057_s0 + $0xc] sm:$0x1]  ;;  %v120_v31 = vsel %vm100_vm1, %v119_v58, %v118_v24 }
  0x17   :  { %v724_v30 = vsel %vm115_vm6, %v723_v44, %v722_v20  ;;  %v3879_v33 = vld [vmem:[%s6057_s0 + $0x10] sm:$0x1]  ;;  %v3884_v34 = vld [vmem:[%s6057_s0 + $0x14] sm:$0x1]  ;;  %v3889_v35 = vld [vmem:[%s6057_s0 + $0x18] sm:$0x1]  ;;  %v122_v39 = vsel %vm103_vm2, %v121_v62, %v120_v31 }
  0x18   :  { %6166 = vst [vmem:[#allocation2_spill] sm:$0xff] %v3889_v35  ;;  %v760_v36 = vsel %vm163_vm7, %v724_v30, 0.0  ;;  %v3896_v40 = vld [vmem:[%s6057_s0 + $0x1c] sm:$0x1]  ;;  %v96_v44 = vrot.slane %v3860_v12, 7  ;;  %v99_v45 = vrot.slane %v3867_v28, 6  ;;  %v124_v48 = vsel %vm106_vm3, %v123_v63, %v122_v39 }
  0x19   :  { %6167 = vst [vmem:[#allocation3_spill] sm:$0xff] %v3896_v40  ;;  %761 = vadd.xlane.f32.xlu0 %v760_v36  ;;  %v102_v49 = vrot.slane %v3872_v29, 5  ;;  %v105_v50 = vrot.slane %v3879_v33, 4  ;;  %v108_v51 = vrot.slane %v3884_v34, 3  ;;  %v56_v52 = vld [vmem:[%s6057_s0 + $0x60] sm:$0x1]  ;;  %v126_v53 = vsel %vm109_vm4, %v125_v10, %v124_v48 }
  0x1a   :  { %v98_v55 = vsel %vm97_vm0, %v96_v44, %v3855_v11  ;;  %v111_v56 = vrot.slane %v3889_v35, 2  ;;  %v114_v57 = vrot.slane %v3896_v40, 1  ;;  %v57_v58 = vld [vmem:[%s6057_s0 + $0x64] sm:$0x1]  ;;  %v58_v61 = vld [vmem:[%s6057_s0 + $0x68] sm:$0x1]  ;;  %v128_v62 = vsel %vm112_vm5, %v127_v26, %v126_v53 }
  0x1b   :  { %v101_v63 = vsel %vm100_vm1, %v99_v45, %v98_v55  ;;  %v59_v10 = vld [vmem:[%s6057_s0 + $0x6c] sm:$0x1]  ;;  %v60_v20 = vld [vmem:[%s6057_s0 + $0x70] sm:$0x1]  ;;  %v61_v24 = vld [vmem:[%s6057_s0 + $0x74] sm:$0x1]  ;;  %v130_v30 = vsel %vm115_vm6, %v129_v27, %v128_v62 }
  0x1c   :  { %v104_v31 = vsel %vm103_vm2, %v102_v49, %v101_v63  ;;  %v62_v26 = vld [vmem:[%s6057_s0 + $0x78] sm:$0x1]  ;;  %v63_v36 = vld [vmem:[%s6057_s0 + $0x7c] sm:$0x1]  ;;  %v145_v39 = vrot.slane %v57_v58, 7  ;;  %v147_v44 = vrot.slane %v58_v61, 6 }
  0x1d   :  { %v167_v45 = vsel %vm163_vm7, %v130_v30, 0.0  ;;  %v107_v48 = vsel %vm106_vm3, %v105_v50, %v104_v31  ;;  %v149_v53 = vrot.slane %v59_v10, 5  ;;  %v151_v55 = vrot.slane %v60_v20, 4  ;;  %v3942_v27 = vld [vmem:[%s6057_s0 + $0x40] sm:$0x1] }
  0x1e   :  { %6168 = vst [vmem:[#allocation4_spill] sm:$0xff] %v3942_v27  ;;  %168 = vadd.xlane.f32.xlu1 %v167_v45  ;;  %v110_v49 = vsel %vm109_vm4, %v108_v51, %v107_v48  ;;  %v146_v62 = vsel %vm97_vm0, %v145_v39, %v56_v52  ;;  %v153_v63 = vrot.slane %v61_v24, 3  ;;  %v155_v40 = vrot.slane %v62_v26, 2  ;;  %v3949_v58 = vld [vmem:[%s6057_s0 + $0x44] sm:$0x1] }
  0x1f   :  { %6169 = vst [vmem:[#allocation5_spill] sm:$0xff] %v3949_v58  ;;  %v3954_v50 = vld [vmem:[%s6057_s0 + $0x48] sm:$0x1]  ;;  %v113_v61 = vsel %vm112_vm5, %v111_v56, %v110_v49  ;;  %v148_v10 = vsel %vm100_vm1, %v147_v44, %v146_v62  ;;  %v157_v20 = vrot.slane %v63_v36, 1  ;;  %v3961_v51 = vld [vmem:[%s6057_s0 + $0x4c] sm:$0x1] }
  0x20   :  { %6170 = vst [vmem:[#allocation6_spill] sm:$0xff] %v3954_v50  ;;  %6171 = vst [vmem:[#allocation7_spill] sm:$0xff] %v3961_v51  ;;  %v3966_v52 = vld [vmem:[%s6057_s0 + $0x50] sm:$0x1]  ;;  %v131_v24 = vrot.slane %v3949_v58, 7  ;;  %v116_v30 = vsel %vm115_vm6, %v114_v57, %v113_v61  ;;  %v150_v31 = vsel %vm103_vm2, %v149_v53, %v148_v10  ;;  %v133_v45 = vrot.slane %v3954_v50, 6 }
  0x21   :  { %6172 = vst [vmem:[#allocation8_spill] sm:$0xff] %v3966_v52  ;;  %v3974_v56 = vld [vmem:[%s6057_s0 + $0x54] sm:$0x1]  ;;  %v3979_v26 = vld [vmem:[%s6057_s0 + $0x58] sm:$0x1]  ;;  %v164_v39 = vsel %vm163_vm7, %v116_v30, 0.0  ;;  %v152_v57 = vsel %vm106_vm3, %v151_v55, %v150_v31 }
  0x22   :  { %6173 = vst [vmem:[#allocation9_spill] sm:$0xff] %v3974_v56  ;;  %6174 = vst [vmem:[#allocation10_spill] sm:$0xff] %v3979_v26  ;;  %v3984_v36 = vld [vmem:[%s6057_s0 + $0x5c] sm:$0x1]  ;;  %v132_v44 = vsel %vm97_vm0, %v131_v24, %v3942_v27  ;;  %v1601_v48 = vld [vmem:[%s6057_s0 + $0x26] sm:$0x1]  ;;  %165 = vadd.xlane.f32.xlu0 %v164_v39  ;;  %v154_v53 = vsel %vm109_vm4, %v153_v63, %v152_v57 }
  0x23   :  { %6175 = vst [vmem:[#allocation11_spill] sm:$0xff] %v3984_v36  ;;  %v135_v49 = vrot.slane %v3961_v51, 5  ;;  %v137_v62 = vrot.slane %v3966_v52, 4  ;;  %v139_v61 = vrot.slane %v3974_v56, 3  ;;  %v1600_v55 = vld [vmem:[%s6057_s0 + $0x22] sm:$0x1]  ;;  %v156_v24 = vsel %vm112_vm5, %v155_v40, %v154_v53 }
  0x24   :  { %v1602_v10 = vld [vmem:[%s6057_s0 + $0x2a] sm:$0x1]  ;;  %v134_v30 = vsel %vm100_vm1, %v133_v45, %v132_v44  ;;  %v141_v63 = vrot.slane %v3979_v26, 2  ;;  %v143_v31 = vrot.slane %v3984_v36, 1  ;;  %v1603_v39 = vld [vmem:[%s6057_s0 + $0x2e] sm:$0x1]  ;;  %v158_v56 = vsel %vm115_vm6, %v157_v20, %v156_v24 }
  0x25   :  { %v1604_v57 = vld [vmem:[%s6057_s0 + $0x32] sm:$0x1]  ;;  %v136_v52 = vsel %vm103_vm2, %v135_v49, %v134_v30  ;;  %v1605_v40 = vld [vmem:[%s6057_s0 + $0x36] sm:$0x1]  ;;  %v1606_v44 = vld [vmem:[%s6057_s0 + $0x3a] sm:$0x1] }
  0x26   :  { %v1607_v45 = vld [vmem:[%s6057_s0 + $0x3e] sm:$0x1]  ;;  %v173_v53 = vsel %vm163_vm7, %v158_v56, 0.0  ;;  %v138_v36 = vsel %vm106_vm3, %v137_v62, %v136_v52  ;;  %v1670_v26 = vrot.slane %v1601_v48, 7  ;;  %v1672_v20 = vrot.slane %v1602_v10, 6 }
  0x27   :  { %174 = vadd.xlane.f32.xlu1 %v173_v53  ;;  %v140_v49 = vsel %vm109_vm4, %v139_v61, %v138_v36  ;;  %v1674_v24 = vrot.slane %v1603_v39, 5  ;;  %v1676_v30 = vrot.slane %v1604_v57, 4  ;;  %v1678_v51 = vrot.slane %v1605_v40, 3  ;;  %v1592_v50 = vld [vmem:[%s6057_s0 + $0x2] sm:$0x1] }
  0x28   :  { %v1593_v58 = vld [vmem:[%s6057_s0 + $0x6] sm:$0x1]  ;;  %v142_v56 = vsel %vm112_vm5, %v141_v63, %v140_v49  ;;  %v1671_v52 = vsel %vm97_vm0, %v1670_v26, %v1600_v55  ;;  %v1680_v48 = vrot.slane %v1606_v44, 2  ;;  %v1682_v62 = vrot.slane %v1607_v45, 1  ;;  %v1594_v36 = vld [vmem:[%s6057_s0 + $0xa] sm:$0x1] }
  0x29   :  { %v1595_v61 = vld [vmem:[%s6057_s0 + $0xe] sm:$0x1]  ;;  %v144_v10 = vsel %vm115_vm6, %v143_v31, %v142_v56  ;;  %v1673_v39 = vsel %vm100_vm1, %v1672_v20, %v1671_v52  ;;  %v1596_v63 = vld [vmem:[%s6057_s0 + $0x12] sm:$0x1]  ;;  %v1597_v26 = vld [vmem:[%s6057_s0 + $0x16] sm:$0x1] }
  0x2a   :  { %v1598_v55 = vld [vmem:[%s6057_s0 + $0x1a] sm:$0x1]  ;;  %v170_v57 = vsel %vm163_vm7, %v144_v10, 0.0  ;;  %v1675_v40 = vsel %vm103_vm2, %v1674_v24, %v1673_v39  ;;  %v1599_v31 = vld [vmem:[%s6057_s0 + $0x1e] sm:$0x1]  ;;  %v1656_v44 = vrot.slane %v1593_v58, 7 }
  0x2b   :  { %v1658_v45 = vrot.slane %v1594_v36, 6  ;;  %171 = vadd.xlane.f32.xlu0 %v170_v57  ;;  %v1677_v53 = vsel %vm106_vm3, %v1676_v30, %v1675_v40  ;;  %v1660_v20 = vrot.slane %v1595_v61, 5  ;;  %v1662_v49 = vrot.slane %v1596_v63, 4  ;;  %v1616_v52 = vld [vmem:[%s6057_s0 + $0x62] sm:$0x1] }
  0x2c   :  { %v1664_v56 = vrot.slane %v1597_v26, 3  ;;  %v1679_v10 = vsel %vm109_vm4, %v1678_v51, %v1677_v53  ;;  %v1657_v24 = vsel %vm97_vm0, %v1656_v44, %v1592_v50  ;;  %v1666_v39 = vrot.slane %v1598_v55, 2  ;;  %v1617_v58 = vld [vmem:[%s6057_s0 + $0x66] sm:$0x1]  ;;  %v1618_v30 = vld [vmem:[%s6057_s0 + $0x6a] sm:$0x1] }
  0x2d   :  { %v1668_v27 = vrot.slane %v1599_v31, 1  ;;  %v1681_v36 = vsel %vm112_vm5, %v1680_v48, %v1679_v10  ;;  %v1659_v61 = vsel %vm100_vm1, %v1658_v45, %v1657_v24  ;;  %v1619_v51 = vld [vmem:[%s6057_s0 + $0x6e] sm:$0x1]  ;;  %v1620_v50 = vld [vmem:[%s6057_s0 + $0x72] sm:$0x1]  ;;  %v1698_v40 = vrot.slane %v1617_v58, 7 }
  0x2e   :  { %v1621_v63 = vld [vmem:[%s6057_s0 + $0x76] sm:$0x1]  ;;  %v1683_v26 = vsel %vm115_vm6, %v1682_v62, %v1681_v36  ;;  %v1661_v55 = vsel %vm103_vm2, %v1660_v20, %v1659_v61  ;;  %v1622_v48 = vld [vmem:[%s6057_s0 + $0x7a] sm:$0x1]  ;;  %v1623_v57 = vld [vmem:[%s6057_s0 + $0x7e] sm:$0x1] }
  0x2f   :  { %v1700_v31 = vrot.slane %v1618_v30, 6  ;;  %v1719_v44 = vsel %vm163_vm7, %v1683_v26, 0.0  ;;  %v1663_v45 = vsel %vm106_vm3, %v1662_v49, %v1661_v55  ;;  %v1702_v53 = vrot.slane %v1619_v51, 5  ;;  %v1608_v62 = vld [vmem:[%s6057_s0 + $0x42] sm:$0x1] }
  0x30   :  { %v1704_v10 = vrot.slane %v1620_v50, 4  ;;  %1720 = vadd.xlane.f32.xlu1 %v1719_v44  ;;  %v1665_v20 = vsel %vm109_vm4, %v1664_v56, %v1663_v45  ;;  %v1699_v24 = vsel %vm97_vm0, %v1698_v40, %v1616_v52  ;;  %v1706_v36 = vrot.slane %v1621_v63, 3  ;;  %v1609_v58 = vld [vmem:[%s6057_s0 + $0x46] sm:$0x1]  ;;  %v1610_v49 = vld [vmem:[%s6057_s0 + $0x4a] sm:$0x1] }
  0x31   :  { %v1708_v61 = vrot.slane %v1622_v48, 2  ;;  %v1667_v30 = vsel %vm112_vm5, %v1666_v39, %v1665_v20  ;;  %v1701_v51 = vsel %vm100_vm1, %v1700_v31, %v1699_v24  ;;  %v1710_v50 = vrot.slane %v1623_v57, 1  ;;  %v1611_v56 = vld [vmem:[%s6057_s0 + $0x4e] sm:$0x1]  ;;  %v1612_v52 = vld [vmem:[%s6057_s0 + $0x52] sm:$0x1] }
  0x32   :  { %v1684_v63 = vrot.slane %v1609_v58, 7  ;;  %v1669_v26 = vsel %vm115_vm6, %v1668_v27, %v1667_v30  ;;  %v1703_v55 = vsel %vm103_vm2, %v1702_v53, %v1701_v51  ;;  %v1613_v39 = vld [vmem:[%s6057_s0 + $0x56] sm:$0x1]  ;;  %v1614_v48 = vld [vmem:[%s6057_s0 + $0x5a] sm:$0x1]  ;;  %v1686_v44 = vrot.slane %v1610_v49, 6 }
  0x33   :  { %v1615_v57 = vld [vmem:[%s6057_s0 + $0x5e] sm:$0x1]  ;;  %v1716_v40 = vsel %vm163_vm7, %v1669_v26, 0.0  ;;  %v1705_v31 = vsel %vm106_vm3, %v1704_v10, %v1703_v55  ;;  %v2375_v45 = vld [vmem:[%s6057_s0 + $0x27] sm:$0x1]  ;;  %v1688_v20 = vrot.slane %v1611_v56, 5 }
  0x34   :  { %v1685_v27 = vsel %vm97_vm0, %v1684_v63, %v1608_v62  ;;  %1717 = vadd.xlane.f32.xlu0 %v1716_v40  ;;  %v1707_v53 = vsel %vm109_vm4, %v1706_v36, %v1705_v31  ;;  %v1690_v24 = vrot.slane %v1612_v52, 4  ;;  %v1692_v58 = vrot.slane %v1613_v39, 3  ;;  %v2374_v30 = vld [vmem:[%s6057_s0 + $0x23] sm:$0x1]  ;;  %v2376_v10 = vld [vmem:[%s6057_s0 + $0x2b] sm:$0x1] }
  0x35   :  { %v1709_v62 = vsel %vm112_vm5, %v1708_v61, %v1707_v53  ;;  %v1687_v49 = vsel %vm100_vm1, %v1686_v44, %v1685_v27  ;;  %v1694_v51 = vrot.slane %v1614_v48, 2  ;;  %v1696_v63 = vrot.slane %v1615_v57, 1  ;;  %v2377_v36 = vld [vmem:[%s6057_s0 + $0x2f] sm:$0x1]  ;;  %v2378_v56 = vld [vmem:[%s6057_s0 + $0x33] sm:$0x1] }
  0x36   :  { %v1711_v52 = vsel %vm115_vm6, %v1710_v50, %v1709_v62  ;;  %v1689_v26 = vsel %vm103_vm2, %v1688_v20, %v1687_v49  ;;  %v2379_v61 = vld [vmem:[%s6057_s0 + $0x37] sm:$0x1]  ;;  %v2380_v55 = vld [vmem:[%s6057_s0 + $0x3b] sm:$0x1]  ;;  %v2381_v39 = vld [vmem:[%s6057_s0 + $0x3f] sm:$0x1] }
  0x37   :  { %v1725_v48 = vsel %vm163_vm7, %v1711_v52, 0.0  ;;  %v1691_v57 = vsel %vm106_vm3, %v1690_v24, %v1689_v26  ;;  %v2444_v40 = vrot.slane %v2375_v45, 7  ;;  %v2446_v50 = vrot.slane %v2376_v10, 6  ;;  %v2366_v20 = vld [vmem:[%s6057_s0 + $0x3] sm:$0x1] }
  0x38   :  { %1726 = vadd.xlane.f32.xlu1 %v1725_v48  ;;  %v1693_v31 = vsel %vm109_vm4, %v1692_v58, %v1691_v57  ;;  %v2448_v27 = vrot.slane %v2377_v36, 5  ;;  %v2450_v44 = vrot.slane %v2378_v56, 4  ;;  %v2452_v53 = vrot.slane %v2379_v61, 3  ;;  %v2367_v62 = vld [vmem:[%s6057_s0 + $0x7] sm:$0x1] }
  0x39   :  { %v1695_v49 = vsel %vm112_vm5, %v1694_v51, %v1693_v31  ;;  %v2445_v24 = vsel %vm97_vm0, %v2444_v40, %v2374_v30  ;;  %v2454_v45 = vrot.slane %v2380_v55, 2  ;;  %v2456_v10 = vrot.slane %v2381_v39, 1  ;;  %v2368_v58 = vld [vmem:[%s6057_s0 + $0xb] sm:$0x1]  ;;  %v2369_v36 = vld [vmem:[%s6057_s0 + $0xf] sm:$0x1] }
  0x3a   :  { %v1697_v56 = vsel %vm115_vm6, %v1696_v63, %v1695_v49  ;;  %v2447_v52 = vsel %vm100_vm1, %v2446_v50, %v2445_v24  ;;  %v2370_v51 = vld [vmem:[%s6057_s0 + $0x13] sm:$0x1]  ;;  %v2371_v30 = vld [vmem:[%s6057_s0 + $0x17] sm:$0x1]  ;;  %v2372_v26 = vld [vmem:[%s6057_s0 + $0x1b] sm:$0x1] }
  0x3b   :  { %v1722_v61 = vsel %vm163_vm7, %v1697_v56, 0.0  ;;  %v2449_v55 = vsel %vm103_vm2, %v2448_v27, %v2447_v52  ;;  %v2373_v63 = vld [vmem:[%s6057_s0 + $0x1f] sm:$0x1]  ;;  %v2430_v39 = vrot.slane %v2367_v62, 7  ;;  %v2432_v48 = vrot.slane %v2368_v58, 6 }
  0x3c   :  { %1723 = vadd.xlane.f32.xlu0 %v1722_v61  ;;  %v2451_v57 = vsel %vm106_vm3, %v2450_v44, %v2449_v55  ;;  %v2434_v40 = vrot.slane %v2369_v36, 5  ;;  %v2436_v50 = vrot.slane %v2370_v51, 4  ;;  %v2438_v31 = vrot.slane %v2371_v30, 3  ;;  %v2390_v49 = vld [vmem:[%s6057_s0 + $0x63] sm:$0x1] }
  0x3d   :  { %v2453_v24 = vsel %vm109_vm4, %v2452_v53, %v2451_v57  ;;  %v2431_v27 = vsel %vm97_vm0, %v2430_v39, %v2366_v20  ;;  %v2440_v56 = vrot.slane %v2372_v26, 2  ;;  %v2442_v52 = vrot.slane %v2373_v63, 1  ;;  %v2391_v62 = vld [vmem:[%s6057_s0 + $0x67] sm:$0x1]  ;;  %v2392_v44 = vld [vmem:[%s6057_s0 + $0x6b] sm:$0x1] }
  0x3e   :  { %v2455_v58 = vsel %vm112_vm5, %v2454_v45, %v2453_v24  ;;  %v2433_v36 = vsel %vm100_vm1, %v2432_v48, %v2431_v27  ;;  %v2393_v53 = vld [vmem:[%s6057_s0 + $0x6f] sm:$0x1]  ;;  %v2394_v20 = vld [vmem:[%s6057_s0 + $0x73] sm:$0x1]  ;;  %v2395_v51 = vld [vmem:[%s6057_s0 + $0x77] sm:$0x1] }
  0x3f   :  { %v2457_v30 = vsel %vm115_vm6, %v2456_v10, %v2455_v58  ;;  %v2435_v26 = vsel %vm103_vm2, %v2434_v40, %v2433_v36  ;;  %v2396_v45 = vld [vmem:[%s6057_s0 + $0x7b] sm:$0x1]  ;;  %v2397_v61 = vld [vmem:[%s6057_s0 + $0x7f] sm:$0x1]  ;;  %v2472_v55 = vrot.slane %v2391_v62, 7  ;;  %v2474_v63 = vrot.slane %v2392_v44, 6 }
  0x40   :  { %v2493_v39 = vsel %vm163_vm7, %v2457_v30, 0.0  ;;  %v2437_v48 = vsel %vm106_vm3, %v2436_v50, %v2435_v26  ;;  %v2476_v57 = vrot.slane %v2393_v53, 5  ;;  %v2478_v24 = vrot.slane %v2394_v20, 4  ;;  %v2382_v10 = vld [vmem:[%s6057_s0 + $0x43] sm:$0x1] }
  0x41   :  { %2494 = vadd.xlane.f32.xlu1 %v2493_v39  ;;  %v2439_v40 = vsel %vm109_vm4, %v2438_v31, %v2437_v48  ;;  %v2473_v27 = vsel %vm97_vm0, %v2472_v55, %v2390_v49  ;;  %v2480_v58 = vrot.slane %v2395_v51, 3  ;;  %v2383_v62 = vld [vmem:[%s6057_s0 + $0x47] sm:$0x1]  ;;  %v2384_v50 = vld [vmem:[%s6057_s0 + $0x4b] sm:$0x1]  ;;  %v2482_v53 = vrot.slane %v2396_v45, 2 }
  0x42   :  { %v2441_v44 = vsel %vm112_vm5, %v2440_v56, %v2439_v40  ;;  %v2475_v36 = vsel %vm100_vm1, %v2474_v63, %v2473_v27  ;;  %v2385_v31 = vld [vmem:[%s6057_s0 + $0x4f] sm:$0x1]  ;;  %v2386_v49 = vld [vmem:[%s6057_s0 + $0x53] sm:$0x1]  ;;  %v2458_v20 = vrot.slane %v2383_v62, 7  ;;  %v2484_v26 = vrot.slane %v2397_v61, 1 }
  0x43   :  { %v2443_v51 = vsel %vm115_vm6, %v2442_v52, %v2441_v44  ;;  %v2477_v30 = vsel %vm103_vm2, %v2476_v57, %v2475_v36  ;;  %v2387_v56 = vld [vmem:[%s6057_s0 + $0x57] sm:$0x1]  ;;  %v2388_v45 = vld [vmem:[%s6057_s0 + $0x5b] sm:$0x1]  ;;  %v2389_v39 = vld [vmem:[%s6057_s0 + $0x5f] sm:$0x1] }
  0x44   :  { %v2490_v55 = vsel %vm163_vm7, %v2443_v51, 0.0  ;;  %v2479_v63 = vsel %vm106_vm3, %v2478_v24, %v2477_v30  ;;  %v2459_v52 = vsel %vm97_vm0, %v2458_v20, %v2382_v10  ;;  %v2460_v48 = vrot.slane %v2384_v50, 6 }
  0x45   :  { %2491 = vadd.xlane.f32.xlu0 %v2490_v55  ;;  %v2481_v61 = vsel %vm109_vm4, %v2480_v58, %v2479_v63  ;;  %v2462_v57 = vrot.slane %v2385_v31, 5  ;;  %v2464_v40 = vrot.slane %v2386_v49, 4  ;;  %v2466_v27 = vrot.slane %v2387_v56, 3 }
  0x46   :  { %v2483_v62 = vsel %vm112_vm5, %v2482_v53, %v2481_v61  ;;  %v2461_v44 = vsel %vm100_vm1, %v2460_v48, %v2459_v52  ;;  %v2468_v36 = vrot.slane %v2388_v45, 2  ;;  %v2470_v30 = vrot.slane %v2389_v39, 1 }
  0x47   :  { %v2485_v24 = vsel %vm115_vm6, %v2484_v26, %v2483_v62  ;;  %v2463_v51 = vsel %vm103_vm2, %v2462_v57, %v2461_v44  ;;  %vm3314_vm8 = vcmask 519168  }
  0x48   :  { %v2499_v35 = vsel %vm163_vm7, %v2485_v24, 0.0  ;;  %v2465_v10 = vsel %vm106_vm3, %v2464_v40, %v2463_v51 }
  0x49   :  { %2500 = vadd.xlane.f32.xlu1 %v2499_v35  ;;  %v2467_v58 = vsel %vm109_vm4, %v2466_v27, %v2465_v10 }
  0x4a   :  { %v2469_v50 = vsel %vm112_vm5, %v2468_v36, %v2467_v58 }
  0x4b   :  { %v2471_v31 = vsel %vm115_vm6, %v2470_v30, %v2469_v50 }
  0x4c   :  { %v2496_v53 = vsel %vm163_vm7, %v2471_v31, 0.0 }
  0x4d   :  { %2497 = vadd.xlane.f32.xlu0 %v2496_v53 }
  0x97   :  { %v765_v49 = vpop.xlane.xlu1 %764 }
  0x98   :  { %v771_v20 = vmul.f32 0.03125, %v765_v49 }
  0x9a   :  { %v791_v26 = vrot.slane %v771_v20, 1  ;;  %v792_v56 = vrot.slane %v771_v20, 2  ;;  %v793_v45 = vrot.slane %v771_v20, 3  ;;  %v794_v55 = vrot.slane %v771_v20, 4 }
  0x9b   :  { %v759_v63 = vpop.xlane.xlu0 %758  ;;  %v795_v39 = vrot.slane %v771_v20, 5  ;;  %v796_v52 = vrot.slane %v771_v20, 6  ;;  %v797_v48 = vrot.slane %v771_v20, 7  ;;  %v4264_v35 = vsub.f32 %v3610_v0, %v771_v20 }
  0x9c   :  { %v769_v61 = vmul.f32 0.03125, %v759_v63  ;;  %v4267_v57 = vsub.f32 %v3615_v1, %v791_v26  ;;  %v4270_v40 = vsub.f32 %v3620_v2, %v792_v56  ;;  %v4273_v27 = vsub.f32 %v3625_v3, %v793_v45 }
  0x9d   :  { %v4276_v62 = vsub.f32 %v3630_v4, %v794_v55  ;;  %v4279_v44 = vsub.f32 %v3635_v5, %v795_v39  ;;  %v4282_v36 = vsub.f32 %v3640_v6, %v796_v52  ;;  %v4285_v0 = vsub.f32 %v3645_v7, %v797_v48 }
  0x9e   :  { %v777_v1 = vrot.slane %v769_v61, 1  ;;  %v778_v24 = vrot.slane %v769_v61, 2  ;;  %v779_v51 = vrot.slane %v769_v61, 3  ;;  %v780_v2 = vrot.slane %v769_v61, 4  ;;  %v768_v30 = vpop.xlane.xlu1 %767 }
  0x9f   :  { %6176 = vst [vmem:[#allocation12_spill] sm:$0xff] %v4276_v62  ;;  %6177 = vst [vmem:[#allocation13_spill] sm:$0xff] %v4279_v44  ;;  %v781_v10 = vrot.slane %v769_v61, 5  ;;  %v782_v3 = vrot.slane %v769_v61, 6  ;;  %v783_v58 = vrot.slane %v769_v61, 7  ;;  %v4288_v4 = vsub.f32 %v3657_v15, %v769_v61 }
  0xa0   :  { %6178 = vst [vmem:[#allocation14_spill] sm:$0xff] %v4282_v36  ;;  %6179 = vst [vmem:[#allocation15_spill] sm:$0xff] %v4285_v0  ;;  %v4290_v50 = vmul.f32 0.03125, %v768_v30  ;;  %v4293_v5 = vsub.f32 %v3664_v17, %v777_v1  ;;  %v4296_v6 = vsub.f32 %v3669_v18, %v778_v24  ;;  %v4299_v7 = vsub.f32 %v3674_v19, %v779_v51 }
  0xa1   :  { %v4302_v31 = vsub.f32 %v3680_v21, %v780_v2  ;;  %v4305_v53 = vsub.f32 %v3685_v22, %v781_v10  ;;  %v4308_v15 = vsub.f32 %v3690_v23, %v782_v3  ;;  %v4311_v49 = vsub.f32 %v3696_v25, %v783_v58 }
  0xa2   :  { %v869_v17 = vmul.f32 %v4288_v4, %v4288_v4  ;;  %v870_v18 = vmul.f32 %v4293_v5, %v4293_v5  ;;  %v871_v19 = vmul.f32 %v4296_v6, %v4296_v6  ;;  %v872_v21 = vmul.f32 %v4299_v7, %v4299_v7  ;;  %v762_v22 = vpop.xlane.xlu0 %761 }
  0xa3   :  { %6180 = vst [vmem:[#allocation16_spill] sm:$0xff] %v4308_v15  ;;  %v873_v23 = vmul.f32 %v4302_v31, %v4302_v31  ;;  %v874_v25 = vmul.f32 %v4305_v53, %v4305_v53  ;;  %v875_v20 = vmul.f32 %v4308_v15, %v4308_v15  ;;  %v876_v26 = vmul.f32 %v4311_v49, %v4311_v49 }
  0xa4   :  { %v770_v56 = vmul.f32 0.03125, %v762_v22  ;;  %v933_v45 = vrot.slane %v870_v18, 7  ;;  %v935_v55 = vrot.slane %v871_v19, 6  ;;  %v937_v63 = vrot.slane %v872_v21, 5 }
  0xa5   :  { %v939_v39 = vrot.slane %v873_v23, 4  ;;  %v941_v52 = vrot.slane %v874_v25, 3  ;;  %v943_v48 = vrot.slane %v875_v20, 2  ;;  %v945_v61 = vrot.slane %v876_v26, 1 }
  0xa6   :  { %v934_v1 = vsel %vm97_vm0, %v933_v45, %v869_v17  ;;  %v784_v24 = vrot.slane %v770_v56, 1  ;;  %v785_v51 = vrot.slane %v770_v56, 2  ;;  %v786_v2 = vrot.slane %v770_v56, 3 }
  0xa7   :  { %v936_v30 = vsel %vm100_vm1, %v935_v55, %v934_v1  ;;  %v787_v10 = vrot.slane %v770_v56, 4  ;;  %v788_v3 = vrot.slane %v770_v56, 5  ;;  %v789_v58 = vrot.slane %v770_v56, 6  ;;  %v169_v15 = vpop.xlane.xlu1 %168 }
  0xa8   :  { %v938_v22 = vsel %vm103_vm2, %v937_v63, %v936_v30  ;;  %v790_v18 = vrot.slane %v770_v56, 7  ;;  %v4333_v19 = vsub.f32 %v3762_v54, %v770_v56  ;;  %v4336_v21 = vsub.f32 %v3772_v59, %v784_v24 }
  0xa9   :  { %v4338_v23 = vmul.f32 0.03125, %v169_v15  ;;  %v940_v17 = vsel %vm106_vm3, %v939_v39, %v938_v22  ;;  %v4342_v25 = vsub.f32 %v3777_v60, %v785_v51  ;;  %v4345_v20 = vsub.f32 %v3785_v8, %v786_v2 }
  0xaa   :  { %v942_v26 = vsel %vm109_vm4, %v941_v52, %v940_v17  ;;  %v4349_v45 = vsub.f32 %v3790_v9, %v787_v10  ;;  %v4352_v54 = vsub.f32 %v3798_v13, %v788_v3  ;;  %v4355_v59 = vsub.f32 %v3803_v14, %v789_v58 }
  0xab   :  { %v944_v15 = vsel %vm112_vm5, %v943_v48, %v942_v26  ;;  %v4359_v56 = vsub.f32 %v3808_v16, %v790_v18  ;;  %v877_v60 = vmul.f32 %v4333_v19, %v4333_v19  ;;  %v878_v8 = vmul.f32 %v4336_v21, %v4336_v21  ;;  %v166_v55 = vpop.xlane.xlu0 %165 }
  0xac   :  { %v946_v9 = vsel %vm115_vm6, %v945_v61, %v944_v15  ;;  %v879_v13 = vmul.f32 %v4342_v25, %v4342_v25  ;;  %v880_v14 = vmul.f32 %v4345_v20, %v4345_v20  ;;  %v881_v63 = vmul.f32 %v4349_v45, %v4349_v45 }
  0xad   :  { %v4372_v16 = vmul.f32 0.03125, %v166_v55  ;;  %v993_v39 = vsel %vm163_vm7, %v946_v9, 0.0  ;;  %v882_v52 = vmul.f32 %v4352_v54, %v4352_v54  ;;  %v883_v48 = vmul.f32 %v4355_v59, %v4355_v59 }
  0xae   :  { %994 = vadd.xlane.f32.xlu0 %v993_v39  ;;  %v884_v61 = vmul.f32 %v4359_v56, %v4359_v56  ;;  %v947_v1 = vrot.slane %v878_v8, 7  ;;  %v949_v24 = vrot.slane %v879_v13, 6  ;;  %v951_v51 = vrot.slane %v880_v14, 5 }
  0xaf   :  { %v953_v2 = vrot.slane %v881_v63, 4  ;;  %v955_v30 = vrot.slane %v882_v52, 3  ;;  %v957_v10 = vrot.slane %v883_v48, 2  ;;  %v885_v3 = vmul.f32 %v4264_v35, %v4264_v35 }
  0xb0   :  { %v175_v58 = vpop.xlane.xlu1 %174  ;;  %v948_v22 = vsel %vm97_vm0, %v947_v1, %v877_v60  ;;  %v959_v18 = vrot.slane %v884_v61, 1  ;;  %v886_v17 = vmul.f32 %v4267_v57, %v4267_v57  ;;  %v887_v26 = vmul.f32 %v4270_v40, %v4270_v40 }
  0xb1   :  { %v4388_v15 = vmul.f32 0.03125, %v175_v58  ;;  %v950_v8 = vsel %vm100_vm1, %v949_v24, %v948_v22  ;;  %v888_v55 = vmul.f32 %v4273_v27, %v4273_v27  ;;  %v889_v9 = vmul.f32 %v4276_v62, %v4276_v62 }
  0xb2   :  { %v952_v13 = vsel %vm103_vm2, %v951_v51, %v950_v8  ;;  %v890_v60 = vmul.f32 %v4279_v44, %v4279_v44  ;;  %v891_v14 = vmul.f32 %v4282_v36, %v4282_v36  ;;  %v892_v63 = vmul.f32 %v4285_v0, %v4285_v0 }
  0xb3   :  { %v954_v39 = vsel %vm106_vm3, %v953_v2, %v952_v13  ;;  %v961_v52 = vrot.slane %v886_v17, 7  ;;  %v963_v48 = vrot.slane %v887_v26, 6  ;;  %v965_v61 = vrot.slane %v888_v55, 5 }
  0xb4   :  { %v172_v1 = vpop.xlane.xlu0 %171  ;;  %v956_v24 = vsel %vm109_vm4, %v955_v30, %v954_v39  ;;  %v967_v58 = vrot.slane %v889_v9, 4  ;;  %v969_v22 = vrot.slane %v890_v60, 3  ;;  %v971_v51 = vrot.slane %v891_v14, 2 }
  0xb5   :  { %v4404_v8 = vmul.f32 0.03125, %v172_v1  ;;  %v958_v44 = vsel %vm112_vm5, %v957_v10, %v956_v24  ;;  %v962_v36 = vsel %vm97_vm0, %v961_v52, %v885_v3  ;;  %v973_v62 = vrot.slane %v892_v63, 1 }
  0xb6   :  { %v960_v0 = vsel %vm115_vm6, %v959_v18, %v958_v44  ;;  %v964_v2 = vsel %vm100_vm1, %v963_v48, %v962_v36  ;;  %v798_v17 = vrot.slane %v4290_v50, 1  ;;  %v799_v26 = vrot.slane %v4290_v50, 2 }
  0xb7   :  { %v996_v30 = vsel %vm163_vm7, %v960_v0, 0.0  ;;  %v966_v55 = vsel %vm103_vm2, %v965_v61, %v964_v2  ;;  %v800_v9 = vrot.slane %v4290_v50, 3  ;;  %v801_v13 = vrot.slane %v4290_v50, 4 }
  0xb8   :  { %997 = vadd.xlane.f32.xlu1 %v996_v30  ;;  %v968_v10 = vsel %vm106_vm3, %v967_v58, %v966_v55  ;;  %v802_v3 = vrot.slane %v4290_v50, 5  ;;  %v803_v44 = vrot.slane %v4290_v50, 6  ;;  %v804_v36 = vrot.slane %v4290_v50, 7 }
  0xb9   :  { %v1721_v18 = vpop.xlane.xlu1 %1720  ;;  %v970_v60 = vsel %vm109_vm4, %v969_v22, %v968_v10  ;;  %v4423_v0 = vsub.f32 %v3707_v32, %v4290_v50  ;;  %v4426_v14 = vsub.f32 %v3717_v37, %v798_v17  ;;  %v4429_v63 = vsub.f32 %v3722_v38, %v799_v26 }
  0xba   :  { %v4431_v39 = vmul.f32 0.03125, %v1721_v18  ;;  %v972_v52 = vsel %vm112_vm5, %v971_v51, %v970_v60  ;;  %v4435_v48 = vsub.f32 %v3729_v41, %v800_v9  ;;  %v4438_v61 = vsub.f32 %v3734_v42, %v801_v13 }
  0xbb   :  { %v974_v1 = vsel %vm115_vm6, %v973_v62, %v972_v52  ;;  %v4442_v32 = vsub.f32 %v3739_v43, %v802_v3  ;;  %v4445_v37 = vsub.f32 %v3746_v46, %v803_v44  ;;  %v4448_v38 = vsub.f32 %v3751_v47, %v804_v36 }
  0xbc   :  { %v999_v50 = vsel %vm163_vm7, %v974_v1, 0.0  ;;  %v893_v41 = vmul.f32 %v4423_v0, %v4423_v0  ;;  %v894_v42 = vmul.f32 %v4426_v14, %v4426_v14  ;;  %v895_v62 = vmul.f32 %v4429_v63, %v4429_v63 }
  0xbd   :  { %v1718_v24 = vpop.xlane.xlu0 %1717  ;;  %1000 = vadd.xlane.f32.xlu0 %v999_v50  ;;  %v896_v43 = vmul.f32 %v4435_v48, %v4435_v48  ;;  %v897_v46 = vmul.f32 %v4438_v61, %v4438_v61  ;;  %v898_v47 = vmul.f32 %v4442_v32, %v4442_v32  ;;  %v899_v58 = vmul.f32 %v4445_v37, %v4445_v37 }
  0xbe   :  { %v4465_v22 = vmul.f32 0.03125, %v1718_v24  ;;  %v900_v51 = vmul.f32 %v4448_v38, %v4448_v38  ;;  %v975_v2 = vrot.slane %v894_v42, 7  ;;  %v977_v17 = vrot.slane %v895_v62, 6 }
  0xbf   :  { %v979_v26 = vrot.slane %v896_v43, 5  ;;  %v981_v30 = vrot.slane %v897_v46, 4  ;;  %v983_v55 = vrot.slane %v898_v47, 3  ;;  %v985_v9 = vrot.slane %v899_v58, 2 }
  0xc0   :  { %v976_v13 = vsel %vm97_vm0, %v975_v2, %v893_v41  ;;  %v987_v10 = vrot.slane %v900_v51, 1  ;;  %v185_v3 = vrot.slane %v4372_v16, 1  ;;  %v186_v44 = vrot.slane %v4372_v16, 2 }
  0xc1   :  { %v1727_v36 = vpop.xlane.xlu1 %1726  ;;  %v978_v18 = vsel %vm100_vm1, %v977_v17, %v976_v13  ;;  %v187_v60 = vrot.slane %v4372_v16, 3  ;;  %v188_v52 = vrot.slane %v4372_v16, 4  ;;  %v189_v1 = vrot.slane %v4372_v16, 5 }
  0xc2   :  { %v4476_v50 = vmul.f32 0.03125, %v1727_v36  ;;  %v980_v42 = vsel %vm103_vm2, %v979_v26, %v978_v18  ;;  %v190_v41 = vrot.slane %v4372_v16, 6  ;;  %v191_v62 = vrot.slane %v4372_v16, 7 }
  0xc3   :  { %v982_v24 = vsel %vm106_vm3, %v981_v30, %v980_v42  ;;  %v4484_v43 = vsub.f32 %v3855_v11, %v4372_v16  ;;  %v4487_v46 = vsub.f32 %v3860_v12, %v185_v3  ;;  %v4490_v47 = vsub.f32 %v3867_v28, %v186_v44  ;;  %v6185_v16 = vld [vmem:[#allocation2_spill] sm:$0xff]  ;;  %v6187_v30 = vld [vmem:[#allocation3_spill] sm:$0xff] }
  0xc4   :  { %v984_v58 = vsel %vm109_vm4, %v983_v55, %v982_v24  ;;  %v4494_v51 = vsub.f32 %v3872_v29, %v187_v60  ;;  %v4497_v2 = vsub.f32 %v3879_v33, %v188_v52  ;;  %v4500_v17 = vsub.f32 %v3884_v34, %v189_v1 }
  0xc5   :  { %6181 = vst [vmem:[#allocation17_spill] sm:$0xff] %v4490_v47  ;;  %v1724_v26 = vpop.xlane.xlu0 %1723  ;;  %v986_v11 = vsel %vm112_vm5, %v985_v9, %v984_v58  ;;  %v4504_v12 = vsub.f32 %v6185_v16, %v190_v41  ;;  %v4507_v28 = vsub.f32 %v6187_v30, %v191_v62  ;;  %v277_v55 = vmul.f32 %v4484_v43, %v4484_v43 }
  0xc6   :  { %6182 = vst [vmem:[#allocation18_spill] sm:$0xff] %v4494_v51  ;;  %6183 = vst [vmem:[#allocation19_spill] sm:$0xff] %v4497_v2  ;;  %v4511_v29 = vmul.f32 0.03125, %v1724_v26  ;;  %v988_v33 = vsel %vm115_vm6, %v987_v10, %v986_v11  ;;  %v278_v34 = vmul.f32 %v4487_v46, %v4487_v46  ;;  %v279_v13 = vmul.f32 %v4490_v47, %v4490_v47 }
  0xc7   :  { %6184 = vst [vmem:[#allocation20_spill] sm:$0xff] %v4500_v17  ;;  %6186 = vst [vmem:[#allocation2_spill] sm:$0xff] %v4504_v12  ;;  %v1002_v9 = vsel %vm163_vm7, %v988_v33, 0.0  ;;  %v280_v3 = vmul.f32 %v4494_v51, %v4494_v51  ;;  %v281_v44 = vmul.f32 %v4497_v2, %v4497_v2  ;;  %v282_v36 = vmul.f32 %v4500_v17, %v4500_v17  ;;  %v6200_v17 = vld [vmem:[#allocation7_spill] sm:$0xff]  ;;  %v6201_v51 = vld [vmem:[#allocation8_spill] sm:$0xff] }
  0xc8   :  { %6188 = vst [vmem:[#allocation3_spill] sm:$0xff] %v4507_v28  ;;  %1003 = vadd.xlane.f32.xlu1 %v1002_v9  ;;  %v283_v10 = vmul.f32 %v4504_v12, %v4504_v12  ;;  %v284_v18 = vmul.f32 %v4507_v28, %v4507_v28  ;;  %v341_v60 = vrot.slane %v278_v34, 7  ;;  %v343_v52 = vrot.slane %v279_v13, 6 }
  0xc9   :  { %v345_v1 = vrot.slane %v280_v3, 5  ;;  %v347_v42 = vrot.slane %v281_v44, 4  ;;  %v349_v41 = vrot.slane %v282_v36, 3  ;;  %v192_v62 = vrot.slane %v4338_v23, 1 }
  0xca   :  { %v2495_v24 = vpop.xlane.xlu1 %2494  ;;  %v342_v58 = vsel %vm97_vm0, %v341_v60, %v277_v55  ;;  %v351_v26 = vrot.slane %v283_v10, 2  ;;  %v353_v11 = vrot.slane %v284_v18, 1  ;;  %v193_v16 = vrot.slane %v4338_v23, 2  ;;  %v3478_v10 = vld [vmem:[%s6057_s0 + $0x20] sm:$0x1] }
  0xcb   :  { %v4532_v30 = vmul.f32 0.03125, %v2495_v24  ;;  %v344_v33 = vsel %vm100_vm1, %v343_v52, %v342_v58  ;;  %v194_v9 = vrot.slane %v4338_v23, 3  ;;  %v195_v34 = vrot.slane %v4338_v23, 4  ;;  %v3479_v60 = vld [vmem:[%s6057_s0 + $0x24] sm:$0x1] }
  0xcc   :  { %v346_v13 = vsel %vm103_vm2, %v345_v1, %v344_v33  ;;  %v196_v3 = vrot.slane %v4338_v23, 5  ;;  %v197_v44 = vrot.slane %v4338_v23, 6  ;;  %v198_v55 = vrot.slane %v4338_v23, 7  ;;  %v3480_v1 = vld [vmem:[%s6057_s0 + $0x28] sm:$0x1] }
  0xcd   :  { %v348_v36 = vsel %vm106_vm3, %v347_v42, %v346_v13  ;;  %v4546_v18 = vsub.f32 %v3478_v10, %v4338_v23  ;;  %v4551_v52 = vsub.f32 %v3479_v60, %v192_v62  ;;  %v4556_v24 = vsub.f32 %v3480_v1, %v193_v16  ;;  %v3481_v23 = vld [vmem:[%s6057_s0 + $0x2c] sm:$0x1]  ;;  %v3482_v62 = vld [vmem:[%s6057_s0 + $0x30] sm:$0x1]  ;;  %v3483_v16 = vld [vmem:[%s6057_s0 + $0x34] sm:$0x1] }
  0xce   :  { %v2492_v42 = vpop.xlane.xlu0 %2491  ;;  %v350_v58 = vsel %vm109_vm4, %v349_v41, %v348_v36  ;;  %v4562_v33 = vsub.f32 %v3481_v23, %v194_v9  ;;  %v4567_v13 = vsub.f32 %v3482_v62, %v195_v34  ;;  %v4572_v10 = vsub.f32 %v3483_v16, %v196_v3  ;;  %v3484_v9 = vld [vmem:[%s6057_s0 + $0x38] sm:$0x1]  ;;  %v3485_v34 = vld [vmem:[%s6057_s0 + $0x3c] sm:$0x1] }
  0xcf   :  { %6189 = vst [vmem:[#allocation21_spill] sm:$0xff] %v4546_v18  ;;  %6190 = vst [vmem:[#allocation22_spill] sm:$0xff] %v4551_v52  ;;  %v4574_v60 = vmul.f32 0.03125, %v2492_v42  ;;  %v352_v41 = vsel %vm112_vm5, %v351_v26, %v350_v58  ;;  %v4580_v36 = vsub.f32 %v3484_v9, %v197_v44  ;;  %v4585_v1 = vsub.f32 %v3485_v34, %v198_v55 }
  0xd0   :  { %6191 = vst [vmem:[#allocation23_spill] sm:$0xff] %v4556_v24  ;;  %6192 = vst [vmem:[#allocation24_spill] sm:$0xff] %v4562_v33  ;;  %v354_v23 = vsel %vm115_vm6, %v353_v11, %v352_v41  ;;  %v285_v3 = vmul.f32 %v4546_v18, %v4546_v18  ;;  %v286_v26 = vmul.f32 %v4551_v52, %v4551_v52  ;;  %v201_v12 = vrot.slane %v4404_v8, 3 }
  0xd1   :  { %6193 = vst [vmem:[#allocation25_spill] sm:$0xff] %v4567_v13  ;;  %6194 = vst [vmem:[#allocation26_spill] sm:$0xff] %v4572_v10  ;;  %v287_v42 = vmul.f32 %v4556_v24, %v4556_v24  ;;  %v401_v44 = vsel %vm163_vm7, %v354_v23, 0.0  ;;  %v288_v58 = vmul.f32 %v4562_v33, %v4562_v33  ;;  %v289_v55 = vmul.f32 %v4567_v13, %v4567_v13 }
  0xd2   :  { %6195 = vst [vmem:[#allocation27_spill] sm:$0xff] %v4580_v36  ;;  %6196 = vst [vmem:[#allocation28_spill] sm:$0xff] %v4585_v1  ;;  %v290_v11 = vmul.f32 %v4572_v10, %v4572_v10  ;;  %402 = vadd.xlane.f32.xlu0 %v401_v44  ;;  %v2501_v62 = vpop.xlane.xlu1 %2500  ;;  %v291_v16 = vmul.f32 %v4580_v36, %v4580_v36  ;;  %v292_v41 = vmul.f32 %v4585_v1, %v4585_v1 }
  0xd3   :  { %v355_v9 = vrot.slane %v286_v26, 7  ;;  %v357_v34 = vrot.slane %v287_v42, 6  ;;  %v4605_v23 = vmul.f32 0.03125, %v2501_v62  ;;  %v359_v24 = vrot.slane %v288_v58, 5 }
  0xd4   :  { %v361_v33 = vrot.slane %v289_v55, 4  ;;  %v363_v52 = vrot.slane %v290_v11, 3  ;;  %v365_v18 = vrot.slane %v291_v16, 2  ;;  %v367_v28 = vrot.slane %v292_v41, 1 }
  0xd5   :  { %v356_v13 = vsel %vm97_vm0, %v355_v9, %v285_v3  ;;  %v199_v44 = vrot.slane %v4404_v8, 1  ;;  %v200_v36 = vrot.slane %v4404_v8, 2  ;;  %v202_v26 = vrot.slane %v4404_v8, 4  ;;  %v6198_v9 = vld [vmem:[#allocation5_spill] sm:$0xff] }
  0xd6   :  { %v358_v10 = vsel %vm100_vm1, %v357_v34, %v356_v13  ;;  %v2498_v42 = vpop.xlane.xlu0 %2497  ;;  %v203_v58 = vrot.slane %v4404_v8, 5  ;;  %v204_v55 = vrot.slane %v4404_v8, 6  ;;  %v205_v3 = vrot.slane %v4404_v8, 7  ;;  %v6197_v13 = vld [vmem:[#allocation4_spill] sm:$0xff] }
  0xd7   :  { %v360_v62 = vsel %vm103_vm2, %v359_v24, %v358_v10  ;;  %v4617_v11 = vmul.f32 0.03125, %v2498_v42  ;;  %v4622_v41 = vsub.f32 %v6197_v13, %v4404_v8  ;;  %v4625_v34 = vsub.f32 %v6198_v9, %v199_v44  ;;  %v6199_v24 = vld [vmem:[#allocation6_spill] sm:$0xff]  ;;  %v6207_v44 = vld [vmem:[#allocation11_spill] sm:$0xff] }
  0xd8   :  { %v362_v16 = vsel %vm106_vm3, %v361_v33, %v360_v62  ;;  %v4629_v10 = vsub.f32 %v6199_v24, %v200_v36  ;;  %v4632_v2 = vsub.f32 %v6200_v17, %v201_v12  ;;  %v4635_v42 = vsub.f32 %v6201_v51, %v202_v26  ;;  %v6203_v62 = vld [vmem:[#allocation9_spill] sm:$0xff]  ;;  %v6205_v8 = vld [vmem:[#allocation10_spill] sm:$0xff] }
  0xd9   :  { %v364_v1 = vsel %vm109_vm4, %v363_v52, %v362_v16  ;;  %v4639_v47 = vsub.f32 %v6203_v62, %v203_v58  ;;  %v4642_v13 = vsub.f32 %v6205_v8, %v204_v55  ;;  %v4645_v9 = vsub.f32 %v6207_v44, %v205_v3 }
  0xda   :  { %6202 = vst [vmem:[#allocation4_spill] sm:$0xff] %v4635_v42  ;;  %v366_v33 = vsel %vm112_vm5, %v365_v18, %v364_v1  ;;  %v293_v17 = vmul.f32 %v4622_v41, %v4622_v41  ;;  %v294_v51 = vmul.f32 %v4625_v34, %v4625_v34  ;;  %v295_v12 = vmul.f32 %v4629_v10, %v4629_v10 }
  0xdb   :  { %6204 = vst [vmem:[#allocation5_spill] sm:$0xff] %v4639_v47  ;;  %6206 = vst [vmem:[#allocation6_spill] sm:$0xff] %v4642_v13  ;;  %v368_v52 = vsel %vm115_vm6, %v367_v28, %v366_v33  ;;  %v296_v36 = vmul.f32 %v4632_v2, %v4632_v2  ;;  %v297_v1 = vmul.f32 %v4635_v42, %v4635_v42  ;;  %v206_v62 = vrot.slane %v4388_v15, 1 }
  0xdc   :  { %v404_v18 = vsel %vm163_vm7, %v368_v52, 0.0  ;;  %v298_v28 = vmul.f32 %v4639_v47, %v4639_v47  ;;  %v299_v26 = vmul.f32 %v4642_v13, %v4642_v13  ;;  %v300_v58 = vmul.f32 %v4645_v9, %v4645_v9 }
  0xdd   :  { %405 = vadd.xlane.f32.xlu1 %v404_v18  ;;  %v369_v55 = vrot.slane %v294_v51, 7  ;;  %v371_v3 = vrot.slane %v295_v12, 6  ;;  %v373_v16 = vrot.slane %v296_v36, 5  ;;  %v375_v24 = vrot.slane %v297_v1, 4 }
  0xde   :  { %v377_v33 = vrot.slane %v298_v28, 3  ;;  %v379_v44 = vrot.slane %v299_v26, 2  ;;  %v381_v52 = vrot.slane %v300_v58, 1  ;;  %v207_v47 = vrot.slane %v4388_v15, 2  ;;  %v3487_v58 = vld [vmem:[%s6057_s0 + $0x64] sm:$0x1] }
  0xdf   :  { %v370_v8 = vsel %vm97_vm0, %v369_v55, %v293_v17  ;;  %v208_v13 = vrot.slane %v4388_v15, 3  ;;  %v209_v42 = vrot.slane %v4388_v15, 4  ;;  %v210_v51 = vrot.slane %v4388_v15, 5  ;;  %v3486_v17 = vld [vmem:[%s6057_s0 + $0x60] sm:$0x1] }
  0xe0   :  { %v372_v18 = vsel %vm100_vm1, %v371_v3, %v370_v8  ;;  %v211_v36 = vrot.slane %v4388_v15, 6  ;;  %v212_v1 = vrot.slane %v4388_v15, 7  ;;  %v4679_v28 = vsub.f32 %v3486_v17, %v4388_v15  ;;  %v3488_v3 = vld [vmem:[%s6057_s0 + $0x68] sm:$0x1]  ;;  %v3489_v8 = vld [vmem:[%s6057_s0 + $0x6c] sm:$0x1] }
  0xe1   :  { %v374_v12 = vsel %vm103_vm2, %v373_v16, %v372_v18  ;;  %v4685_v55 = vsub.f32 %v3487_v58, %v206_v62  ;;  %v4690_v16 = vsub.f32 %v3488_v3, %v207_v47  ;;  %v4695_v15 = vsub.f32 %v3489_v8, %v208_v13  ;;  %v3490_v18 = vld [vmem:[%s6057_s0 + $0x70] sm:$0x1]  ;;  %v3492_v17 = vld [vmem:[%s6057_s0 + $0x78] sm:$0x1] }
  0xe2   :  { %6208 = vst [vmem:[#allocation7_spill] sm:$0xff] %v4679_v28  ;;  %v376_v26 = vsel %vm106_vm3, %v375_v24, %v374_v12  ;;  %v4701_v62 = vsub.f32 %v3490_v18, %v209_v42  ;;  %v3491_v12 = vld [vmem:[%s6057_s0 + $0x74] sm:$0x1]  ;;  %v4711_v13 = vsub.f32 %v3492_v17, %v211_v36  ;;  %v301_v58 = vmul.f32 %v4679_v28, %v4679_v28 }
  0xe3   :  { %6209 = vst [vmem:[#allocation8_spill] sm:$0xff] %v4685_v55  ;;  %6210 = vst [vmem:[#allocation9_spill] sm:$0xff] %v4690_v16  ;;  %v378_v24 = vsel %vm109_vm4, %v377_v33, %v376_v26  ;;  %v4706_v47 = vsub.f32 %v3491_v12, %v210_v51  ;;  %v3493_v26 = vld [vmem:[%s6057_s0 + $0x7c] sm:$0x1]  ;;  %v302_v51 = vmul.f32 %v4685_v55, %v4685_v55  ;;  %v1738_v28 = vrot.slane %v4465_v22, 3 }
  0xe4   :  { %6211 = vst [vmem:[#allocation10_spill] sm:$0xff] %v4695_v15  ;;  %6212 = vst [vmem:[#allocation11_spill] sm:$0xff] %v4701_v62  ;;  %v380_v33 = vsel %vm112_vm5, %v379_v44, %v378_v24  ;;  %v4717_v42 = vsub.f32 %v3493_v26, %v212_v1  ;;  %v303_v36 = vmul.f32 %v4690_v16, %v4690_v16 }
  0xe5   :  { %6213 = vst [vmem:[#allocation29_spill] sm:$0xff] %v4706_v47  ;;  %6214 = vst [vmem:[#allocation30_spill] sm:$0xff] %v4711_v13  ;;  %v382_v3 = vsel %vm115_vm6, %v381_v52, %v380_v33  ;;  %v304_v44 = vmul.f32 %v4695_v15, %v4695_v15  ;;  %v305_v8 = vmul.f32 %v4701_v62, %v4701_v62  ;;  %v383_v12 = vrot.slane %v302_v51, 7 }
  0xe6   :  { %6215 = vst [vmem:[#allocation31_spill] sm:$0xff] %v4717_v42  ;;  %v407_v1 = vsel %vm163_vm7, %v382_v3, 0.0  ;;  %v306_v24 = vmul.f32 %v4706_v47, %v4706_v47  ;;  %v307_v18 = vmul.f32 %v4711_v13, %v4711_v13  ;;  %v308_v52 = vmul.f32 %v4717_v42, %v4717_v42 }
  0xe7   :  { %408 = vadd.xlane.f32.xlu0 %v407_v1  ;;  %v385_v17 = vrot.slane %v303_v36, 6  ;;  %v387_v33 = vrot.slane %v304_v44, 5  ;;  %v389_v26 = vrot.slane %v305_v8, 4  ;;  %v1736_v62 = vrot.slane %v4465_v22, 1 }
  0xe8   :  { %v391_v15 = vrot.slane %v306_v24, 3  ;;  %v393_v16 = vrot.slane %v307_v18, 2  ;;  %v395_v55 = vrot.slane %v308_v52, 1  ;;  %v384_v3 = vsel %vm97_vm0, %v383_v12, %v301_v58  ;;  %v3494_v58 = vld [vmem:[%s6057_s0 + $0x2] sm:$0x1] }
  0xe9   :  { %v1737_v47 = vrot.slane %v4465_v22, 2  ;;  %v1739_v13 = vrot.slane %v4465_v22, 4  ;;  %v386_v42 = vsel %vm100_vm1, %v385_v17, %v384_v3  ;;  %v1740_v51 = vrot.slane %v4465_v22, 5  ;;  %v3495_v24 = vld [vmem:[%s6057_s0 + $0x6] sm:$0x1] }
  0xea   :  { %v1741_v36 = vrot.slane %v4465_v22, 6  ;;  %v1742_v44 = vrot.slane %v4465_v22, 7  ;;  %v388_v8 = vsel %vm103_vm2, %v387_v33, %v386_v42  ;;  %v4751_v1 = vsub.f32 %v3494_v58, %v4465_v22  ;;  %v3496_v52 = vld [vmem:[%s6057_s0 + $0xa] sm:$0x1]  ;;  %v3497_v17 = vld [vmem:[%s6057_s0 + $0xe] sm:$0x1] }
  0xeb   :  { %v4756_v18 = vsub.f32 %v3495_v24, %v1736_v62  ;;  %v4761_v12 = vsub.f32 %v3496_v52, %v1737_v47  ;;  %v390_v42 = vsel %vm106_vm3, %v389_v26, %v388_v8  ;;  %v4767_v22 = vsub.f32 %v3497_v17, %v1738_v28  ;;  %v3498_v33 = vld [vmem:[%s6057_s0 + $0x12] sm:$0x1]  ;;  %v3499_v3 = vld [vmem:[%s6057_s0 + $0x16] sm:$0x1]  ;;  %v3500_v8 = vld [vmem:[%s6057_s0 + $0x1a] sm:$0x1] }
  0xec   :  { %6216 = vst [vmem:[#allocation32_spill] sm:$0xff] %v4751_v1  ;;  %v4772_v62 = vsub.f32 %v3498_v33, %v1739_v13  ;;  %v4777_v47 = vsub.f32 %v3499_v3, %v1740_v51  ;;  %v392_v26 = vsel %vm109_vm4, %v391_v15, %v390_v42  ;;  %v4783_v28 = vsub.f32 %v3500_v8, %v1741_v36  ;;  %v3501_v58 = vld [vmem:[%s6057_s0 + $0x1e] sm:$0x1] }
  0xed   :  { %6217 = vst [vmem:[#allocation33_spill] sm:$0xff] %v4761_v12  ;;  %6218 = vst [vmem:[#allocation34_spill] sm:$0xff] %v4767_v22  ;;  %v4788_v13 = vsub.f32 %v3501_v58, %v1742_v44  ;;  %v1828_v24 = vmul.f32 %v4751_v1, %v4751_v1  ;;  %v394_v51 = vsel %vm112_vm5, %v393_v16, %v392_v26 }
  0xee   :  { %6219 = vst [vmem:[#allocation35_spill] sm:$0xff] %v4772_v62  ;;  %6220 = vst [vmem:[#allocation36_spill] sm:$0xff] %v4777_v47  ;;  %v1829_v15 = vmul.f32 %v4756_v18, %v4756_v18  ;;  %v1830_v52 = vmul.f32 %v4761_v12, %v4761_v12  ;;  %v1831_v36 = vmul.f32 %v4767_v22, %v4767_v22  ;;  %v1744_v12 = vrot.slane %v4431_v39, 2 }
  0xef   :  { %6221 = vst [vmem:[#allocation37_spill] sm:$0xff] %v4783_v28  ;;  %6222 = vst [vmem:[#allocation38_spill] sm:$0xff] %v4788_v13  ;;  %v396_v42 = vsel %vm115_vm6, %v395_v55, %v394_v51  ;;  %v1832_v44 = vmul.f32 %v4772_v62, %v4772_v62  ;;  %v1833_v17 = vmul.f32 %v4777_v47, %v4777_v47  ;;  %v1743_v47 = vrot.slane %v4431_v39, 1 }
  0xf0   :  { %v1834_v16 = vmul.f32 %v4783_v28, %v4783_v28  ;;  %v410_v33 = vsel %vm163_vm7, %v396_v42, 0.0  ;;  %v1835_v3 = vmul.f32 %v4788_v13, %v4788_v13  ;;  %v1892_v26 = vrot.slane %v1829_v15, 7 }
  0xf1   :  { %v1894_v8 = vrot.slane %v1830_v52, 6  ;;  %411 = vadd.xlane.f32.xlu1 %v410_v33  ;;  %v1896_v58 = vrot.slane %v1831_v36, 5  ;;  %v1898_v22 = vrot.slane %v1832_v44, 4  ;;  %v1900_v55 = vrot.slane %v1833_v17, 3 }
  0xf2   :  { %v1902_v51 = vrot.slane %v1834_v16, 2  ;;  %v1893_v62 = vsel %vm97_vm0, %v1892_v26, %v1828_v24  ;;  %v1904_v1 = vrot.slane %v1835_v3, 1  ;;  %v1745_v42 = vrot.slane %v4431_v39, 3  ;;  %v3502_v24 = vld [vmem:[%s6057_s0 + $0x22] sm:$0x1] }
  0xf3   :  { %v1895_v28 = vsel %vm100_vm1, %v1894_v8, %v1893_v62  ;;  %v1746_v13 = vrot.slane %v4431_v39, 4  ;;  %v1747_v15 = vrot.slane %v4431_v39, 5  ;;  %v1748_v36 = vrot.slane %v4431_v39, 6  ;;  %v3503_v16 = vld [vmem:[%s6057_s0 + $0x26] sm:$0x1] }
  0xf4   :  { %v1897_v52 = vsel %vm103_vm2, %v1896_v58, %v1895_v28  ;;  %v1749_v44 = vrot.slane %v4431_v39, 7  ;;  %v4823_v17 = vsub.f32 %v3502_v24, %v4431_v39  ;;  %v4829_v33 = vsub.f32 %v3503_v16, %v1743_v47  ;;  %v3504_v28 = vld [vmem:[%s6057_s0 + $0x2a] sm:$0x1]  ;;  %v3505_v26 = vld [vmem:[%s6057_s0 + $0x2e] sm:$0x1] }
  0xf5   :  { %v1899_v62 = vsel %vm106_vm3, %v1898_v22, %v1897_v52  ;;  %v4834_v3 = vsub.f32 %v3504_v28, %v1744_v12  ;;  %v4839_v39 = vsub.f32 %v3505_v26, %v1745_v42  ;;  %v3506_v8 = vld [vmem:[%s6057_s0 + $0x32] sm:$0x1]  ;;  %v3507_v58 = vld [vmem:[%s6057_s0 + $0x36] sm:$0x1]  ;;  %v3508_v52 = vld [vmem:[%s6057_s0 + $0x3a] sm:$0x1] }
  0xf6   :  { %6223 = vst [vmem:[#allocation39_spill] sm:$0xff] %v4823_v17  ;;  %v1901_v22 = vsel %vm109_vm4, %v1900_v55, %v1899_v62  ;;  %v4845_v47 = vsub.f32 %v3506_v8, %v1746_v13  ;;  %v4850_v12 = vsub.f32 %v3507_v58, %v1747_v15  ;;  %v4855_v42 = vsub.f32 %v3508_v52, %v1748_v36  ;;  %v3509_v24 = vld [vmem:[%s6057_s0 + $0x3e] sm:$0x1] }
  0xf7   :  { %6224 = vst [vmem:[#allocation40_spill] sm:$0xff] %v4834_v3  ;;  %6225 = vst [vmem:[#allocation41_spill] sm:$0xff] %v4839_v39  ;;  %v1903_v55 = vsel %vm112_vm5, %v1902_v51, %v1901_v22  ;;  %v4861_v13 = vsub.f32 %v3509_v24, %v1749_v44  ;;  %v1836_v62 = vmul.f32 %v4823_v17, %v4823_v17 }
  0xf8   :  { %6226 = vst [vmem:[#allocation42_spill] sm:$0xff] %v4845_v47  ;;  %6227 = vst [vmem:[#allocation43_spill] sm:$0xff] %v4850_v12  ;;  %v1837_v15 = vmul.f32 %v4829_v33, %v4829_v33  ;;  %v1905_v16 = vsel %vm115_vm6, %v1904_v1, %v1903_v55  ;;  %v1838_v36 = vmul.f32 %v4834_v3, %v4834_v3  ;;  %v1752_v3 = vrot.slane %v4511_v29, 3 }
  0xf9   :  { %6228 = vst [vmem:[#allocation44_spill] sm:$0xff] %v4855_v42  ;;  %6229 = vst [vmem:[#allocation45_spill] sm:$0xff] %v4861_v13  ;;  %v1839_v51 = vmul.f32 %v4839_v39, %v4839_v39  ;;  %v1840_v28 = vmul.f32 %v4845_v47, %v4845_v47  ;;  %v1952_v44 = vsel %vm163_vm7, %v1905_v16, 0.0  ;;  %v1841_v26 = vmul.f32 %v4850_v12, %v4850_v12 }
  0xfa   :  { %v1842_v22 = vmul.f32 %v4855_v42, %v4855_v42  ;;  %v1843_v1 = vmul.f32 %v4861_v13, %v4861_v13  ;;  %1953 = vadd.xlane.f32.xlu0 %v1952_v44  ;;  %v1906_v8 = vrot.slane %v1837_v15, 7  ;;  %v1908_v58 = vrot.slane %v1838_v36, 6 }
  0xfb   :  { %v1910_v52 = vrot.slane %v1839_v51, 5  ;;  %v1912_v55 = vrot.slane %v1840_v28, 4  ;;  %v1914_v24 = vrot.slane %v1841_v26, 3  ;;  %v1750_v47 = vrot.slane %v4511_v29, 1  ;;  %v3511_v26 = vld [vmem:[%s6057_s0 + $0x46] sm:$0x1] }
  0xfc   :  { %v1916_v39 = vrot.slane %v1842_v22, 2  ;;  %v1918_v17 = vrot.slane %v1843_v1, 1  ;;  %v1907_v16 = vsel %vm97_vm0, %v1906_v8, %v1836_v62  ;;  %v1751_v12 = vrot.slane %v4511_v29, 2  ;;  %v3510_v62 = vld [vmem:[%s6057_s0 + $0x42] sm:$0x1] }
  0xfd   :  { %v1753_v42 = vrot.slane %v4511_v29, 4  ;;  %v1909_v13 = vsel %vm100_vm1, %v1908_v58, %v1907_v16  ;;  %v1754_v15 = vrot.slane %v4511_v29, 5  ;;  %v1755_v36 = vrot.slane %v4511_v29, 6  ;;  %v3512_v1 = vld [vmem:[%s6057_s0 + $0x4a] sm:$0x1] }
  0xfe   :  { %v1756_v51 = vrot.slane %v4511_v29, 7  ;;  %v1911_v28 = vsel %vm103_vm2, %v1910_v52, %v1909_v13  ;;  %v4895_v44 = vsub.f32 %v3510_v62, %v4511_v29  ;;  %v4900_v22 = vsub.f32 %v3511_v26, %v1750_v47  ;;  %v3513_v58 = vld [vmem:[%s6057_s0 + $0x4e] sm:$0x1]  ;;  %v3514_v52 = vld [vmem:[%s6057_s0 + $0x52] sm:$0x1] }
  0xff   :  { %v4905_v8 = vsub.f32 %v3512_v1, %v1751_v12  ;;  %v1913_v13 = vsel %vm106_vm3, %v1912_v55, %v1911_v28  ;;  %v4911_v29 = vsub.f32 %v3513_v58, %v1752_v3  ;;  %v4916_v47 = vsub.f32 %v3514_v52, %v1753_v42  ;;  %v3515_v16 = vld [vmem:[%s6057_s0 + $0x56] sm:$0x1]  ;;  %v3516_v28 = vld [vmem:[%s6057_s0 + $0x5a] sm:$0x1]  ;;  %v3517_v62 = vld [vmem:[%s6057_s0 + $0x5e] sm:$0x1] }
 0x100   :  { %6230 = vst [vmem:[#allocation46_spill] sm:$0xff] %v4895_v44  ;;  %v4921_v12 = vsub.f32 %v3515_v16, %v1754_v15  ;;  %v1915_v55 = vsel %vm109_vm4, %v1914_v24, %v1913_v13  ;;  %v4927_v3 = vsub.f32 %v3516_v28, %v1755_v36  ;;  %v4932_v42 = vsub.f32 %v3517_v62, %v1756_v51 }
 0x101   :  { %6231 = vst [vmem:[#allocation47_spill] sm:$0xff] %v4905_v8  ;;  %6232 = vst [vmem:[#allocation48_spill] sm:$0xff] %v4911_v29  ;;  %v1844_v26 = vmul.f32 %v4895_v44, %v4895_v44  ;;  %v1917_v15 = vsel %vm112_vm5, %v1916_v39, %v1915_v55  ;;  %v1845_v24 = vmul.f32 %v4900_v22, %v4900_v22 }
 0x102   :  { %6233 = vst [vmem:[#allocation49_spill] sm:$0xff] %v4916_v47  ;;  %6234 = vst [vmem:[#allocation50_spill] sm:$0xff] %v4921_v12  ;;  %v1846_v1 = vmul.f32 %v4905_v8, %v4905_v8  ;;  %v1847_v36 = vmul.f32 %v4911_v29, %v4911_v29  ;;  %v1919_v13 = vsel %vm115_vm6, %v1918_v17, %v1917_v15  ;;  %v1758_v8 = vrot.slane %v4476_v50, 2 }
 0x103   :  { %6235 = vst [vmem:[#allocation51_spill] sm:$0xff] %v4927_v3  ;;  %6236 = vst [vmem:[#allocation52_spill] sm:$0xff] %v4932_v42  ;;  %v1848_v51 = vmul.f32 %v4916_v47, %v4916_v47  ;;  %v1849_v58 = vmul.f32 %v4921_v12, %v4921_v12  ;;  %v1850_v39 = vmul.f32 %v4927_v3, %v4927_v3  ;;  %v1955_v52 = vsel %vm163_vm7, %v1919_v13, 0.0 }
 0x104   :  { %v1851_v16 = vmul.f32 %v4932_v42, %v4932_v42  ;;  %v1920_v55 = vrot.slane %v1845_v24, 7  ;;  %v1922_v28 = vrot.slane %v1846_v1, 6  ;;  %1956 = vadd.xlane.f32.xlu1 %v1955_v52  ;;  %v1924_v62 = vrot.slane %v1847_v36, 5 }
 0x105   :  { %v1926_v29 = vrot.slane %v1848_v51, 4  ;;  %v1928_v17 = vrot.slane %v1849_v58, 3  ;;  %v1930_v15 = vrot.slane %v1850_v39, 2  ;;  %v1757_v12 = vrot.slane %v4476_v50, 1  ;;  %v3519_v39 = vld [vmem:[%s6057_s0 + $0x66] sm:$0x1] }
 0x106   :  { %v1921_v47 = vsel %vm97_vm0, %v1920_v55, %v1844_v26  ;;  %v1932_v44 = vrot.slane %v1851_v16, 1  ;;  %v1759_v13 = vrot.slane %v4476_v50, 3  ;;  %v1760_v42 = vrot.slane %v4476_v50, 4  ;;  %v3518_v26 = vld [vmem:[%s6057_s0 + $0x62] sm:$0x1] }
 0x107   :  { %v1923_v3 = vsel %vm100_vm1, %v1922_v28, %v1921_v47  ;;  %v1761_v24 = vrot.slane %v4476_v50, 5  ;;  %v1762_v36 = vrot.slane %v4476_v50, 6  ;;  %v1763_v51 = vrot.slane %v4476_v50, 7  ;;  %v3521_v55 = vld [vmem:[%s6057_s0 + $0x6e] sm:$0x1] }
 0x108   :  { %v1925_v1 = vsel %vm103_vm2, %v1924_v62, %v1923_v3  ;;  %v4967_v58 = vsub.f32 %v3518_v26, %v4476_v50  ;;  %v4973_v52 = vsub.f32 %v3519_v39, %v1757_v12  ;;  %v3520_v3 = vld [vmem:[%s6057_s0 + $0x6a] sm:$0x1]  ;;  %v4983_v50 = vsub.f32 %v3521_v55, %v1759_v13  ;;  %v3522_v28 = vld [vmem:[%s6057_s0 + $0x72] sm:$0x1]  ;;  %v3523_v62 = vld [vmem:[%s6057_s0 + $0x76] sm:$0x1] }
 0x109   :  { %v1927_v47 = vsel %vm106_vm3, %v1926_v29, %v1925_v1  ;;  %v4978_v16 = vsub.f32 %v3520_v3, %v1758_v8  ;;  %v4989_v12 = vsub.f32 %v3522_v28, %v1760_v42  ;;  %v4994_v8 = vsub.f32 %v3523_v62, %v1761_v24  ;;  %v3524_v1 = vld [vmem:[%s6057_s0 + $0x7a] sm:$0x1]  ;;  %v3525_v26 = vld [vmem:[%s6057_s0 + $0x7e] sm:$0x1] }
 0x10a   :  { %6237 = vst [vmem:[#allocation53_spill] sm:$0xff] %v4967_v58  ;;  %6239 = vst [vmem:[#allocation55_spill] sm:$0xff] %v4983_v50  ;;  %v1929_v29 = vsel %vm109_vm4, %v1928_v17, %v1927_v47  ;;  %v4999_v13 = vsub.f32 %v3524_v1, %v1762_v36  ;;  %v5005_v42 = vsub.f32 %v3525_v26, %v1763_v51 }
 0x10b   :  { %6238 = vst [vmem:[#allocation54_spill] sm:$0xff] %v4978_v16  ;;  %6240 = vst [vmem:[#allocation56_spill] sm:$0xff] %v4989_v12  ;;  %v1931_v17 = vsel %vm112_vm5, %v1930_v15, %v1929_v29  ;;  %v1852_v47 = vmul.f32 %v4967_v58, %v4967_v58  ;;  %v1853_v24 = vmul.f32 %v4973_v52, %v4973_v52 }
 0x10c   :  { %6241 = vst [vmem:[#allocation57_spill] sm:$0xff] %v4994_v8  ;;  %6242 = vst [vmem:[#allocation58_spill] sm:$0xff] %v4999_v13  ;;  %v1933_v39 = vsel %vm115_vm6, %v1932_v44, %v1931_v17  ;;  %v1854_v36 = vmul.f32 %v4978_v16, %v4978_v16  ;;  %v1855_v15 = vmul.f32 %v4983_v50, %v4983_v50  ;;  %v2512_v16 = vrot.slane %v4574_v60, 3 }
 0x10d   :  { %6243 = vst [vmem:[#allocation59_spill] sm:$0xff] %v5005_v42  ;;  %v1856_v3 = vmul.f32 %v4989_v12, %v4989_v12  ;;  %v1958_v51 = vsel %vm163_vm7, %v1933_v39, 0.0  ;;  %v1857_v55 = vmul.f32 %v4994_v8, %v4994_v8  ;;  %v1858_v29 = vmul.f32 %v4999_v13, %v4999_v13 }
 0x10e   :  { %v1859_v44 = vmul.f32 %v5005_v42, %v5005_v42  ;;  %1959 = vadd.xlane.f32.xlu0 %v1958_v51  ;;  %v1934_v28 = vrot.slane %v1853_v24, 7  ;;  %v1936_v62 = vrot.slane %v1854_v36, 6  ;;  %v1938_v1 = vrot.slane %v1855_v15, 5 }
 0x10f   :  { %v1940_v17 = vrot.slane %v1856_v3, 4  ;;  %v1942_v26 = vrot.slane %v1857_v55, 3  ;;  %v1944_v50 = vrot.slane %v1858_v29, 2  ;;  %v2510_v12 = vrot.slane %v4574_v60, 1  ;;  %v3527_v55 = vld [vmem:[%s6057_s0 + $0x7] sm:$0x1] }
 0x110   :  { %v1946_v58 = vrot.slane %v1859_v44, 1  ;;  %v1935_v39 = vsel %vm97_vm0, %v1934_v28, %v1852_v47  ;;  %v2511_v8 = vrot.slane %v4574_v60, 2  ;;  %v2513_v13 = vrot.slane %v4574_v60, 4  ;;  %v3526_v47 = vld [vmem:[%s6057_s0 + $0x3] sm:$0x1] }
 0x111   :  { %v1937_v42 = vsel %vm100_vm1, %v1936_v62, %v1935_v39  ;;  %v2514_v24 = vrot.slane %v4574_v60, 5  ;;  %v2515_v36 = vrot.slane %v4574_v60, 6  ;;  %v2516_v15 = vrot.slane %v4574_v60, 7  ;;  %v3528_v44 = vld [vmem:[%s6057_s0 + $0xb] sm:$0x1] }
 0x112   :  { %v1939_v3 = vsel %vm103_vm2, %v1938_v1, %v1937_v42  ;;  %v5039_v51 = vsub.f32 %v3526_v47, %v4574_v60  ;;  %v5044_v29 = vsub.f32 %v3527_v55, %v2510_v12  ;;  %v5049_v28 = vsub.f32 %v3528_v44, %v2511_v8  ;;  %v3529_v62 = vld [vmem:[%s6057_s0 + $0xf] sm:$0x1]  ;;  %v3530_v1 = vld [vmem:[%s6057_s0 + $0x13] sm:$0x1]  ;;  %v3531_v39 = vld [vmem:[%s6057_s0 + $0x17] sm:$0x1] }
 0x113   :  { %v1941_v42 = vsel %vm106_vm3, %v1940_v17, %v1939_v3  ;;  %v5055_v60 = vsub.f32 %v3529_v62, %v2512_v16  ;;  %v5060_v12 = vsub.f32 %v3530_v1, %v2513_v13  ;;  %v5065_v8 = vsub.f32 %v3531_v39, %v2514_v24  ;;  %v3532_v3 = vld [vmem:[%s6057_s0 + $0x1b] sm:$0x1]  ;;  %v3533_v47 = vld [vmem:[%s6057_s0 + $0x1f] sm:$0x1] }
 0x114   :  { %6244 = vst [vmem:[#allocation60_spill] sm:$0xff] %v5039_v51  ;;  %6245 = vst [vmem:[#allocation61_spill] sm:$0xff] %v5044_v29  ;;  %v1943_v17 = vsel %vm109_vm4, %v1942_v26, %v1941_v42  ;;  %v5071_v16 = vsub.f32 %v3532_v3, %v2515_v36  ;;  %v5076_v13 = vsub.f32 %v3533_v47, %v2516_v15 }
 0x115   :  { %6246 = vst [vmem:[#allocation62_spill] sm:$0xff] %v5049_v28  ;;  %6247 = vst [vmem:[#allocation63_spill] sm:$0xff] %v5055_v60  ;;  %v2602_v55 = vmul.f32 %v5039_v51, %v5039_v51  ;;  %v1945_v24 = vsel %vm112_vm5, %v1944_v50, %v1943_v17  ;;  %v2603_v26 = vmul.f32 %v5044_v29, %v5044_v29 }
 0x116   :  { %6248 = vst [vmem:[#allocation64_spill] sm:$0xff] %v5060_v12  ;;  %6249 = vst [vmem:[#allocation65_spill] sm:$0xff] %v5065_v8  ;;  %v2604_v44 = vmul.f32 %v5049_v28, %v5049_v28  ;;  %v2605_v36 = vmul.f32 %v5055_v60, %v5055_v60  ;;  %v1947_v42 = vsel %vm115_vm6, %v1946_v58, %v1945_v24  ;;  %v2518_v28 = vrot.slane %v4532_v30, 2 }
 0x117   :  { %6250 = vst [vmem:[#allocation66_spill] sm:$0xff] %v5071_v16  ;;  %6251 = vst [vmem:[#allocation67_spill] sm:$0xff] %v5076_v13  ;;  %v2606_v15 = vmul.f32 %v5060_v12, %v5060_v12  ;;  %v2607_v62 = vmul.f32 %v5065_v8, %v5065_v8  ;;  %v2608_v50 = vmul.f32 %v5071_v16, %v5071_v16  ;;  %v1961_v1 = vsel %vm163_vm7, %v1947_v42, 0.0 }
 0x118   :  { %v2609_v39 = vmul.f32 %v5076_v13, %v5076_v13  ;;  %v2666_v17 = vrot.slane %v2603_v26, 7  ;;  %v2668_v3 = vrot.slane %v2604_v44, 6  ;;  %1962 = vadd.xlane.f32.xlu1 %v1961_v1  ;;  %v2670_v47 = vrot.slane %v2605_v36, 5 }
 0x119   :  { %v2672_v60 = vrot.slane %v2606_v15, 4  ;;  %v2674_v58 = vrot.slane %v2607_v62, 3  ;;  %v2676_v24 = vrot.slane %v2608_v50, 2  ;;  %v2517_v8 = vrot.slane %v4532_v30, 1  ;;  %v3535_v50 = vld [vmem:[%s6057_s0 + $0x27] sm:$0x1] }
 0x11a   :  { %v2667_v12 = vsel %vm97_vm0, %v2666_v17, %v2602_v55  ;;  %v2678_v51 = vrot.slane %v2609_v39, 1  ;;  %v2519_v42 = vrot.slane %v4532_v30, 3  ;;  %v2520_v13 = vrot.slane %v4532_v30, 4  ;;  %v3534_v55 = vld [vmem:[%s6057_s0 + $0x23] sm:$0x1] }
 0x11b   :  { %v2669_v16 = vsel %vm100_vm1, %v2668_v3, %v2667_v12  ;;  %v2521_v26 = vrot.slane %v4532_v30, 5  ;;  %v2522_v36 = vrot.slane %v4532_v30, 6  ;;  %v2523_v15 = vrot.slane %v4532_v30, 7  ;;  %v3537_v17 = vld [vmem:[%s6057_s0 + $0x2f] sm:$0x1] }
 0x11c   :  { %v2671_v44 = vsel %vm103_vm2, %v2670_v47, %v2669_v16  ;;  %v5111_v62 = vsub.f32 %v3534_v55, %v4532_v30  ;;  %v5117_v1 = vsub.f32 %v3535_v50, %v2517_v8  ;;  %v3536_v16 = vld [vmem:[%s6057_s0 + $0x2b] sm:$0x1]  ;;  %v5127_v30 = vsub.f32 %v3537_v17, %v2519_v42  ;;  %v3538_v3 = vld [vmem:[%s6057_s0 + $0x33] sm:$0x1]  ;;  %v3539_v47 = vld [vmem:[%s6057_s0 + $0x37] sm:$0x1] }
 0x11d   :  { %v2673_v12 = vsel %vm106_vm3, %v2672_v60, %v2671_v44  ;;  %v5122_v39 = vsub.f32 %v3536_v16, %v2518_v28  ;;  %v5133_v8 = vsub.f32 %v3538_v3, %v2520_v13  ;;  %v5138_v28 = vsub.f32 %v3539_v47, %v2521_v26  ;;  %v3540_v44 = vld [vmem:[%s6057_s0 + $0x3b] sm:$0x1]  ;;  %v3541_v55 = vld [vmem:[%s6057_s0 + $0x3f] sm:$0x1] }
 0x11e   :  { %6252 = vst [vmem:[#allocation68_spill] sm:$0xff] %v5111_v62  ;;  %6253 = vst [vmem:[#allocation69_spill] sm:$0xff] %v5117_v1  ;;  %v2675_v60 = vsel %vm109_vm4, %v2674_v58, %v2673_v12  ;;  %v5143_v42 = vsub.f32 %v3540_v44, %v2522_v36  ;;  %v5149_v13 = vsub.f32 %v3541_v55, %v2523_v15 }
 0x11f   :  { %6254 = vst [vmem:[#allocation70_spill] sm:$0xff] %v5122_v39  ;;  %6255 = vst [vmem:[#allocation71_spill] sm:$0xff] %v5127_v30  ;;  %v2677_v58 = vsel %vm112_vm5, %v2676_v24, %v2675_v60  ;;  %v2610_v12 = vmul.f32 %v5111_v62, %v5111_v62  ;;  %v2611_v26 = vmul.f32 %v5117_v1, %v5117_v1 }
 0x120   :  { %6256 = vst [vmem:[#allocation72_spill] sm:$0xff] %v5133_v8  ;;  %6257 = vst [vmem:[#allocation73_spill] sm:$0xff] %v5138_v28  ;;  %v2679_v50 = vsel %vm115_vm6, %v2678_v51, %v2677_v58  ;;  %v2612_v36 = vmul.f32 %v5122_v39, %v5122_v39  ;;  %v2613_v24 = vmul.f32 %v5127_v30, %v5127_v30  ;;  %v2526_v39 = vrot.slane %v4617_v11, 3 }
 0x121   :  { %6258 = vst [vmem:[#allocation74_spill] sm:$0xff] %v5143_v42  ;;  %6259 = vst [vmem:[#allocation75_spill] sm:$0xff] %v5149_v13  ;;  %v2614_v16 = vmul.f32 %v5133_v8, %v5133_v8  ;;  %v2726_v15 = vsel %vm163_vm7, %v2679_v50, 0.0  ;;  %v2615_v17 = vmul.f32 %v5138_v28, %v5138_v28  ;;  %v2616_v60 = vmul.f32 %v5143_v42, %v5143_v42 }
 0x122   :  { %v2617_v51 = vmul.f32 %v5149_v13, %v5149_v13  ;;  %2727 = vadd.xlane.f32.xlu0 %v2726_v15  ;;  %v2680_v3 = vrot.slane %v2611_v26, 7  ;;  %v2682_v47 = vrot.slane %v2612_v36, 6  ;;  %v2684_v44 = vrot.slane %v2613_v24, 5 }
 0x123   :  { %v2686_v58 = vrot.slane %v2614_v16, 4  ;;  %v2688_v55 = vrot.slane %v2615_v17, 3  ;;  %v2690_v30 = vrot.slane %v2616_v60, 2  ;;  %v2524_v8 = vrot.slane %v4617_v11, 1  ;;  %v3543_v17 = vld [vmem:[%s6057_s0 + $0x47] sm:$0x1] }
 0x124   :  { %v2692_v62 = vrot.slane %v2617_v51, 1  ;;  %v2681_v50 = vsel %vm97_vm0, %v2680_v3, %v2610_v12  ;;  %v2525_v28 = vrot.slane %v4617_v11, 2  ;;  %v2527_v42 = vrot.slane %v4617_v11, 4  ;;  %v3542_v12 = vld [vmem:[%s6057_s0 + $0x43] sm:$0x1] }
 0x125   :  { %v2683_v13 = vsel %vm100_vm1, %v2682_v47, %v2681_v50  ;;  %v2528_v26 = vrot.slane %v4617_v11, 5  ;;  %v2529_v36 = vrot.slane %v4617_v11, 6  ;;  %v2530_v24 = vrot.slane %v4617_v11, 7  ;;  %v3544_v51 = vld [vmem:[%s6057_s0 + $0x4b] sm:$0x1] }
 0x126   :  { %v2685_v16 = vsel %vm103_vm2, %v2684_v44, %v2683_v13  ;;  %v5183_v15 = vsub.f32 %v3542_v12, %v4617_v11  ;;  %v5188_v60 = vsub.f32 %v3543_v17, %v2524_v8  ;;  %v5193_v3 = vsub.f32 %v3544_v51, %v2525_v28  ;;  %v3545_v47 = vld [vmem:[%s6057_s0 + $0x4f] sm:$0x1]  ;;  %v3546_v44 = vld [vmem:[%s6057_s0 + $0x53] sm:$0x1]  ;;  %v3547_v50 = vld [vmem:[%s6057_s0 + $0x57] sm:$0x1] }
 0x127   :  { %v2687_v13 = vsel %vm106_vm3, %v2686_v58, %v2685_v16  ;;  %v5199_v11 = vsub.f32 %v3545_v47, %v2526_v39  ;;  %v5204_v8 = vsub.f32 %v3546_v44, %v2527_v42  ;;  %v5209_v28 = vsub.f32 %v3547_v50, %v2528_v26  ;;  %v3548_v16 = vld [vmem:[%s6057_s0 + $0x5b] sm:$0x1]  ;;  %v3549_v12 = vld [vmem:[%s6057_s0 + $0x5f] sm:$0x1] }
 0x128   :  { %6260 = vst [vmem:[#allocation76_spill] sm:$0xff] %v5183_v15  ;;  %6261 = vst [vmem:[#allocation77_spill] sm:$0xff] %v5188_v60  ;;  %v2689_v58 = vsel %vm109_vm4, %v2688_v55, %v2687_v13  ;;  %v5215_v39 = vsub.f32 %v3548_v16, %v2529_v36  ;;  %v5220_v42 = vsub.f32 %v3549_v12, %v2530_v24 }
 0x129   :  { %6262 = vst [vmem:[#allocation78_spill] sm:$0xff] %v5193_v3  ;;  %6263 = vst [vmem:[#allocation79_spill] sm:$0xff] %v5199_v11  ;;  %v2618_v17 = vmul.f32 %v5183_v15, %v5183_v15  ;;  %v2691_v26 = vsel %vm112_vm5, %v2690_v30, %v2689_v58  ;;  %v2619_v55 = vmul.f32 %v5188_v60, %v5188_v60 }
 0x12a   :  { %6264 = vst [vmem:[#allocation80_spill] sm:$0xff] %v5204_v8  ;;  %6265 = vst [vmem:[#allocation81_spill] sm:$0xff] %v5209_v28  ;;  %v2620_v51 = vmul.f32 %v5193_v3, %v5193_v3  ;;  %v2621_v36 = vmul.f32 %v5199_v11, %v5199_v11  ;;  %v2693_v13 = vsel %vm115_vm6, %v2692_v62, %v2691_v26  ;;  %v2532_v3 = vrot.slane %v4605_v23, 2 }
 0x12b   :  { %6266 = vst [vmem:[#allocation82_spill] sm:$0xff] %v5215_v39  ;;  %6267 = vst [vmem:[#allocation83_spill] sm:$0xff] %v5220_v42  ;;  %v2622_v24 = vmul.f32 %v5204_v8, %v5204_v8  ;;  %v2623_v47 = vmul.f32 %v5209_v28, %v5209_v28  ;;  %v2624_v30 = vmul.f32 %v5215_v39, %v5215_v39  ;;  %v2729_v44 = vsel %vm163_vm7, %v2693_v13, 0.0 }
 0x12c   :  { %v2625_v50 = vmul.f32 %v5220_v42, %v5220_v42  ;;  %v2694_v58 = vrot.slane %v2619_v55, 7  ;;  %v2696_v16 = vrot.slane %v2620_v51, 6  ;;  %2730 = vadd.xlane.f32.xlu1 %v2729_v44  ;;  %v2698_v12 = vrot.slane %v2621_v36, 5 }
 0x12d   :  { %v2700_v11 = vrot.slane %v2622_v24, 4  ;;  %v2702_v62 = vrot.slane %v2623_v47, 3  ;;  %v2704_v26 = vrot.slane %v2624_v30, 2  ;;  %v2531_v28 = vrot.slane %v4605_v23, 1  ;;  %v3551_v30 = vld [vmem:[%s6057_s0 + $0x67] sm:$0x1] }
 0x12e   :  { %v2695_v8 = vsel %vm97_vm0, %v2694_v58, %v2618_v17  ;;  %v2706_v15 = vrot.slane %v2625_v50, 1  ;;  %v2533_v13 = vrot.slane %v4605_v23, 3  ;;  %v2534_v42 = vrot.slane %v4605_v23, 4  ;;  %v3550_v17 = vld [vmem:[%s6057_s0 + $0x63] sm:$0x1] }
 0x12f   :  { %v2697_v39 = vsel %vm100_vm1, %v2696_v16, %v2695_v8  ;;  %v2535_v55 = vrot.slane %v4605_v23, 5  ;;  %v2536_v36 = vrot.slane %v4605_v23, 6  ;;  %v2537_v24 = vrot.slane %v4605_v23, 7  ;;  %v3553_v58 = vld [vmem:[%s6057_s0 + $0x6f] sm:$0x1] }
 0x130   :  { %v2699_v51 = vsel %vm103_vm2, %v2698_v12, %v2697_v39  ;;  %v5255_v47 = vsub.f32 %v3550_v17, %v4605_v23  ;;  %v5261_v44 = vsub.f32 %v3551_v30, %v2531_v28  ;;  %v3552_v39 = vld [vmem:[%s6057_s0 + $0x6b] sm:$0x1]  ;;  %v5271_v23 = vsub.f32 %v3553_v58, %v2533_v13  ;;  %v3554_v16 = vld [vmem:[%s6057_s0 + $0x73] sm:$0x1]  ;;  %v3555_v12 = vld [vmem:[%s6057_s0 + $0x77] sm:$0x1] }
 0x131   :  { %v2701_v8 = vsel %vm106_vm3, %v2700_v11, %v2699_v51  ;;  %v5266_v50 = vsub.f32 %v3552_v39, %v2532_v3  ;;  %v5277_v28 = vsub.f32 %v3554_v16, %v2534_v42  ;;  %v5282_v3 = vsub.f32 %v3555_v12, %v2535_v55  ;;  %v3556_v51 = vld [vmem:[%s6057_s0 + $0x7b] sm:$0x1]  ;;  %v3557_v17 = vld [vmem:[%s6057_s0 + $0x7f] sm:$0x1] }
 0x132   :  { %6268 = vst [vmem:[#allocation84_spill] sm:$0xff] %v5255_v47  ;;  %6269 = vst [vmem:[#allocation85_spill] sm:$0xff] %v5261_v44  ;;  %v2703_v11 = vsel %vm109_vm4, %v2702_v62, %v2701_v8  ;;  %v5287_v13 = vsub.f32 %v3556_v51, %v2536_v36  ;;  %v5293_v42 = vsub.f32 %v3557_v17, %v2537_v24 }
 0x133   :  { %6270 = vst [vmem:[#allocation86_spill] sm:$0xff] %v5266_v50  ;;  %6271 = vst [vmem:[#allocation87_spill] sm:$0xff] %v5271_v23  ;;  %v2705_v62 = vsel %vm112_vm5, %v2704_v26, %v2703_v11  ;;  %v2626_v8 = vmul.f32 %v5255_v47, %v5255_v47  ;;  %v2627_v55 = vmul.f32 %v5261_v44, %v5261_v44 }
 0x134   :  { %6272 = vst [vmem:[#allocation88_spill] sm:$0xff] %v5277_v28  ;;  %6273 = vst [vmem:[#allocation89_spill] sm:$0xff] %v5282_v3  ;;  %v2707_v30 = vsel %vm115_vm6, %v2706_v15, %v2705_v62  ;;  %v2628_v36 = vmul.f32 %v5266_v50, %v5266_v50  ;;  %v2629_v26 = vmul.f32 %v5271_v23, %v5271_v23 }
 0x135   :  { %6274 = vst [vmem:[#allocation90_spill] sm:$0xff] %v5287_v13  ;;  %6275 = vst [vmem:[#allocation91_spill] sm:$0xff] %v5293_v42  ;;  %v2630_v39 = vmul.f32 %v5277_v28, %v5277_v28  ;;  %v2732_v24 = vsel %vm163_vm7, %v2707_v30, 0.0  ;;  %v2631_v58 = vmul.f32 %v5282_v3, %v5282_v3  ;;  %v2632_v11 = vmul.f32 %v5287_v13, %v5287_v13 }
 0x136   :  { %2733 = vadd.xlane.f32.xlu0 %v2732_v24  ;;  %v2708_v16 = vrot.slane %v2627_v55, 7  ;;  %v2710_v15 = vrot.slane %v2628_v36, 6  ;;  %v2712_v12 = vrot.slane %v2629_v26, 5  ;;  %v2633_v62 = vmul.f32 %v5293_v42, %v5293_v42 }
 0x137   :  { %v2714_v51 = vrot.slane %v2630_v39, 4  ;;  %v2716_v47 = vrot.slane %v2631_v58, 3  ;;  %v2718_v30 = vrot.slane %v2632_v11, 2  ;;  %v995_v50 = vpop.xlane.xlu0 %994 }
 0x138   :  { %v2709_v17 = vsel %vm97_vm0, %v2708_v16, %v2626_v8  ;;  %v2720_v55 = vrot.slane %v2633_v62, 1  ;;  %v1005_v36 = vmul.f32 0.03125, %v995_v50  ;;  %v5329_v50 = vld [vmem:[%s6059_s2] ss:$0 sm:$0xff] }
 0x139   :  { %v2711_v28 = vsel %vm100_vm1, %v2710_v15, %v2709_v17  ;;  %v3428_v17 = vld [vmem:[%s6060_s3 + $0x18] sm:$0xff]  }
 0x13a   :  { %v2713_v23 = vsel %vm103_vm2, %v2712_v12, %v2711_v28  ;;  %v1009_v42 = vadd.f32 1e-05, %v1005_v36  ;;  %3388 = vmatprep.subr.bf16.mxu0 %v3428_v17 }
 0x13b   :  { %v2715_v3 = vsel %vm106_vm3, %v2714_v51, %v2713_v23  ;;  %3389 = vmatpush3.bf16.msra.mxu0 %v3428_v17 }
 0x13c   :  { %v2717_v24 = vsel %vm109_vm4, %v2716_v47, %v2715_v3  ;;  %3438 = vrsqrt.f32 %v1009_v42  ;;  %v5324_v47 = vld [vmem:[%s6058_s1] ss:$0 sm:$0xff] }
 0x13d   :  { %v2719_v26 = vsel %vm112_vm5, %v2718_v30, %v2717_v24 }
 0x13e   :  { %v2721_v39 = vsel %vm115_vm6, %v2720_v55, %v2719_v26  ;;  %v3429_v55 = vld [vmem:[%s6060_s3 + $0x10] sm:$0xff]  }
 0x13f   :  { %v2735_v8 = vsel %vm163_vm7, %v2721_v39, 0.0  ;;  %3390 = vmatprep.subr.bf16.mxu0 %v3429_v55 }
 0x140   :  { %2736 = vadd.xlane.f32.xlu1 %v2735_v8  ;;  %3391 = vmatpush3.bf16.msra.mxu0 %v3429_v55  ;;  %v5386_v55 = vld [vmem:[%s6060_s3 + $0x28] sm:$0xff]  }
 0x141   :  { %v998_v58 = vpop.xlane.xlu1 %997  ;;  %3404 = vmatprep.subr.bf16.mxu0 %v5386_v55 }
 0x142   :  { %v1006_v11 = vmul.f32 0.03125, %v998_v58 }
 0x144   :  { %v1010_v16 = vadd.f32 1e-05, %v1006_v11 }
 0x146   :  { %3440 = vrsqrt.f32 %v1010_v16  ;;  %v1001_v28 = vpop.xlane.xlu0 %1000 }
 0x147   :  { %v1007_v23 = vmul.f32 0.03125, %v1001_v28 }
 0x149   :  { %v3439_v15 = vpop.eup %3438  ;;  %v1011_v12 = vadd.f32 1e-05, %v1007_v23  ;;  %v6276_v23 = vld [vmem:[#allocation16_spill] sm:$0xff] }
 0x14a   :  { %v1021_v3 = vrot.slane %v3439_v15, 1  ;;  %v1022_v42 = vrot.slane %v3439_v15, 2  ;;  %v1023_v51 = vrot.slane %v3439_v15, 3  ;;  %v1024_v62 = vrot.slane %v3439_v15, 4 }
 0x14b   :  { %v1025_v30 = vrot.slane %v3439_v15, 5  ;;  %v1081_v24 = vmul.f32 %v3439_v15, %v4288_v4  ;;  %v1026_v36 = vrot.slane %v3439_v15, 6  ;;  %v1027_v58 = vrot.slane %v3439_v15, 7  ;;  %v3430_v4 = vld [vmem:[%s6060_s3 + $0x8] sm:$0xff]  }
 0x14c   :  { %v1082_v26 = vmul.f32 %v1021_v3, %v4293_v5  ;;  %v1083_v39 = vmul.f32 %v1022_v42, %v4296_v6  ;;  %v1084_v8 = vmul.f32 %v1023_v51, %v4299_v7  ;;  %v1085_v11 = vmul.f32 %v1024_v62, %v4302_v31  ;;  %v3431_v31 = vld [vmem:[%s6060_s3] sm:$0xff]   ;;  %3396 = vmatprep.subr.bf16.mxu1 %v3430_v4 }
 0x14d   :  { %v1086_v16 = vmul.f32 %v1025_v30, %v4305_v53  ;;  %v1113_v28 = vmul.f32 %v5324_v47, %v1081_v24  ;;  %v1087_v13 = vmul.f32 %v1026_v36, %v6276_v23  ;;  %v1088_v53 = vmul.f32 %v1027_v58, %v4311_v49  ;;  %3397 = vmatpush3.bf16.msra.mxu1 %v3430_v4 }
 0x14e   :  { %v1114_v5 = vmul.f32 %v5324_v47, %v1082_v26  ;;  %v1115_v6 = vmul.f32 %v5324_v47, %v1083_v39  ;;  %v1116_v7 = vmul.f32 %v5324_v47, %v1084_v8  ;;  %v1117_v15 = vmul.f32 %v5324_v47, %v1085_v11  ;;  %3398 = vmatprep.subr.bf16.mxu1 %v3431_v31 }
 0x14f   :  { %v1118_v3 = vmul.f32 %v5324_v47, %v1086_v16  ;;  %v5358_v42 = vadd.f32 %v5329_v50, %v1113_v28  ;;  %v1119_v51 = vmul.f32 %v5324_v47, %v1087_v13  ;;  %3442 = vrsqrt.f32 %v1011_v12 }
 0x150   :  { %v5362_v62 = vadd.f32 %v5329_v50, %v1114_v5  ;;  %v1120_v30 = vmul.f32 %v5324_v47, %v1088_v53  ;;  %v1147_v49 = vadd.f32 %v5329_v50, %v1115_v6  ;;  %v5367_v36 = vadd.f32 %v5329_v50, %v1116_v7 }
 0x151   :  { %v1004_v17 = vpop.xlane.xlu1 %1003  ;;  %v5370_v26 = vadd.f32 %v5329_v50, %v1117_v15  ;;  %v5373_v39 = vadd.f32 %v5329_v50, %v1118_v3  ;;  %v5376_v12 = vadd.f32 %v5329_v50, %v1119_v51  ;;  %v1177_v8 = vpack.c.bf16 %v5358_v42, %v5358_v42  ;;  %3399 = vmatpush3.bf16.msra.mxu1 %v3431_v31 }
 0x152   :  { %v1008_v24 = vmul.f32 0.03125, %v1004_v17  ;;  %v1178_v58 = vpack.c.bf16 %v5362_v62, %v5362_v62  ;;  %v1152_v4 = vadd.f32 %v5329_v50, %v1120_v30 }
 0x153   :  { %v3441_v13 = vpop.eup %3440 }
 0x154   :  { %v1028_v11 = vrot.slane %v3441_v13, 1  ;;  %v1029_v16 = vrot.slane %v3441_v13, 2  ;;  %v1030_v28 = vrot.slane %v3441_v13, 3  ;;  %v1031_v23 = vrot.slane %v3441_v13, 4 }
 0x155   :  { %v1032_v5 = vrot.slane %v3441_v13, 5  ;;  %v1033_v6 = vrot.slane %v3441_v13, 6  ;;  %v1034_v7 = vrot.slane %v3441_v13, 7  ;;  %v1012_v53 = vadd.f32 1e-05, %v1008_v24 }
 0x156   :  { %v1089_v15 = vmul.f32 %v3441_v13, %v4333_v19  ;;  %v1090_v3 = vmul.f32 %v1028_v11, %v4336_v21  ;;  %v1091_v42 = vmul.f32 %v1029_v16, %v4342_v25  ;;  %v1092_v51 = vmul.f32 %v1030_v28, %v4345_v20 }
 0x157   :  { %v1093_v62 = vmul.f32 %v1031_v23, %v4349_v45  ;;  %v1094_v17 = vmul.f32 %v1032_v5, %v4352_v54  ;;  %v1095_v30 = vmul.f32 %v1033_v6, %v4355_v59  ;;  %v1096_v44 = vmul.f32 %v1034_v7, %v4359_v56 }
 0x158   :  { %v1121_v31 = vmul.f32 %v5324_v47, %v1089_v15  ;;  %v1122_v19 = vmul.f32 %v5324_v47, %v1090_v3  ;;  %v1123_v21 = vmul.f32 %v5324_v47, %v1091_v42  ;;  %v1124_v25 = vmul.f32 %v5324_v47, %v1092_v51 }
 0x159   :  { %v1125_v24 = vmul.f32 %v5324_v47, %v1093_v62  ;;  %v1126_v20 = vmul.f32 %v5324_v47, %v1094_v17  ;;  %v1127_v45 = vmul.f32 %v5324_v47, %v1095_v30  ;;  %v1128_v54 = vmul.f32 %v5324_v47, %v1096_v44 }
 0x15a   :  { %v1153_v59 = vadd.f32 %v5329_v50, %v1121_v31  ;;  %v1154_v56 = vadd.f32 %v5329_v50, %v1122_v19  ;;  %v1155_v13 = vadd.f32 %v5329_v50, %v1123_v21  ;;  %v1156_v16 = vadd.f32 %v5329_v50, %v1124_v25 }
 0x15b   :  { %v403_v11 = vpop.xlane.xlu0 %402  ;;  %v1157_v28 = vadd.f32 %v5329_v50, %v1125_v24  ;;  %v1179_v23 = vpack.c.bf16 %v1147_v49, %v1147_v49  ;;  %v1180_v5 = vpack.c.bf16 %v5367_v36, %v5367_v36  ;;  %v1158_v7 = vadd.f32 %v5329_v50, %v1126_v20 }
 0x15c   :  { %v413_v6 = vmul.f32 0.03125, %v403_v11  ;;  %v1159_v44 = vadd.f32 %v5329_v50, %v1127_v45  ;;  %v1160_v15 = vadd.f32 %v5329_v50, %v1128_v54  ;;  %3444 = vrsqrt.f32 %v1012_v53  ;;  %v5419_v62 = vpop.eup %3442 }
 0x15d   :  { %v1181_v3 = vpack.c.bf16 %v5370_v26, %v5370_v26  ;;  %v1182_v42 = vpack.c.bf16 %v5373_v39, %v5373_v39  ;;  %v1186_v51 = vpack.c.bf16 %v1154_v56, %v1154_v56  ;;  %v1183_v49 = vpack.c.bf16 %v5376_v12, %v5376_v12 }
 0x15e   :  { %v1184_v36 = vpack.c.bf16 %v1152_v4, %v1152_v4  ;;  %v1185_v17 = vpack.c.bf16 %v1153_v59, %v1153_v59  ;;  %v1187_v30 = vpack.c.bf16 %v1155_v13, %v1155_v13  ;;  %v417_v31 = vadd.f32 1e-05, %v413_v6 }
 0x15f   :  { %v1188_v19 = vpack.c.bf16 %v1156_v16, %v1156_v16  ;;  %v1247_v21 = vunpack.c.l.b16 %v1178_v58  ;;  %v1248_v25 = vunpack.c.l.b16 %v1179_v23  ;;  %v1189_v53 = vpack.c.bf16 %v1157_v28, %v1157_v28 }
 0x160   :  { %v1190_v24 = vpack.c.bf16 %v1158_v7, %v1158_v7  ;;  %v1191_v20 = vpack.c.bf16 %v1159_v44, %v1159_v44  ;;  %v1192_v26 = vpack.c.bf16 %v1160_v15, %v1160_v15  ;;  %v1246_v45 = vunpack.c.l.b16 %v1177_v8 }
 0x161   :  { %v1249_v54 = vunpack.c.l.b16 %v1180_v5  ;;  %v1250_v39 = vunpack.c.l.b16 %v1181_v3  ;;  %v1255_v56 = vunpack.c.l.b16 %v1186_v51  ;;  %v1251_v11 = vunpack.c.l.b16 %v1182_v42 }
 0x162   :  { %v1252_v60 = vunpack.c.l.b16 %v1183_v49  ;;  %v1253_v1 = vunpack.c.l.b16 %v1184_v36  ;;  %v1256_v29 = vunpack.c.l.b16 %v1187_v30  ;;  %v1254_v12 = vunpack.c.l.b16 %v1185_v17 }
 0x163   :  { %v1257_v4 = vunpack.c.l.b16 %v1188_v19  ;;  %v1278_v59 = vrot.slane %v1247_v21, 7  ;;  %v1280_v13 = vrot.slane %v1248_v25, 6  ;;  %v1258_v6 = vunpack.c.l.b16 %v1189_v53 }
 0x164   :  { %v1259_v16 = vunpack.c.l.b16 %v1190_v24  ;;  %v1260_v58 = vunpack.c.l.b16 %v1191_v20  ;;  %v1261_v23 = vunpack.c.l.b16 %v1192_v26  ;;  %v1282_v44 = vrot.slane %v1249_v54, 5 }
 0x165   :  { %v1279_v7 = vsel %vm97_vm0, %v1278_v59, %v1246_v45  ;;  %v1292_v8 = vrot.slane %v1255_v56, 7  ;;  %v1294_v5 = vrot.slane %v1256_v29, 6  ;;  %v1284_v42 = vrot.slane %v1250_v39, 4 }
 0x166   :  { %v406_v28 = vpop.xlane.xlu1 %405  ;;  %v1281_v3 = vsel %vm100_vm1, %v1280_v13, %v1279_v7  ;;  %v1286_v51 = vrot.slane %v1251_v11, 3  ;;  %v1288_v36 = vrot.slane %v1252_v60, 2  ;;  %v1296_v30 = vrot.slane %v1257_v4, 5 }
 0x167   :  { %v414_v15 = vmul.f32 0.03125, %v406_v28  ;;  %v1283_v49 = vsel %vm103_vm2, %v1282_v44, %v1281_v3  ;;  %v1293_v17 = vsel %vm97_vm0, %v1292_v8, %v1254_v12  ;;  %v1298_v53 = vrot.slane %v1258_v6, 4 }
 0x168   :  { %v1285_v21 = vsel %vm106_vm3, %v1284_v42, %v1283_v49  ;;  %v1295_v25 = vsel %vm100_vm1, %v1294_v5, %v1293_v17  ;;  %3446 = vrsqrt.f32 %v417_v31  ;;  %v1300_v20 = vrot.slane %v1259_v16, 3 }
 0x169   :  { %v418_v19 = vadd.f32 1e-05, %v414_v15  ;;  %v1287_v29 = vsel %vm109_vm4, %v1286_v51, %v1285_v21  ;;  %v1297_v24 = vsel %vm103_vm2, %v1296_v30, %v1295_v25  ;;  %v3445_v26 = vpop.eup %3444  ;;  %v1290_v54 = vrot.slane %v1253_v1, 1  ;;  %v6277_v21 = vld [vmem:[#allocation12_spill] sm:$0xff] }
 0x16a   :  { %v1289_v45 = vsel %vm112_vm5, %v1288_v36, %v1287_v29  ;;  %v1299_v60 = vsel %vm106_vm3, %v1298_v53, %v1297_v24  ;;  %v1302_v39 = vrot.slane %v1260_v58, 2  ;;  %v1304_v11 = vrot.slane %v1261_v23, 1  ;;  %v6278_v53 = vld [vmem:[#allocation13_spill] sm:$0xff] }
 0x16b   :  { %v1301_v56 = vsel %vm109_vm4, %v1300_v20, %v1299_v60  ;;  %v1035_v12 = vrot.slane %v5419_v62, 1  ;;  %v1036_v4 = vrot.slane %v5419_v62, 2  ;;  %3448 = vrsqrt.f32 %v418_v19  ;;  %v6279_v20 = vld [vmem:[#allocation14_spill] sm:$0xff] }
 0x16c   :  { %v1291_v31 = vsel %vm115_vm6, %v1290_v54, %v1289_v45  ;;  %v1303_v59 = vsel %vm112_vm5, %v1302_v39, %v1301_v56  ;;  %v1037_v13 = vrot.slane %v5419_v62, 3  ;;  %v1038_v1 = vrot.slane %v5419_v62, 4  ;;  %v6280_v54 = vld [vmem:[#allocation15_spill] sm:$0xff] }
 0x16d   :  { %v1305_v6 = vsel %vm115_vm6, %v1304_v11, %v1303_v59  ;;  %v1039_v16 = vrot.slane %v5419_v62, 5  ;;  %v1040_v58 = vrot.slane %v5419_v62, 6  ;;  %v1041_v28 = vrot.slane %v5419_v62, 7 }
 0x16e   :  { %v1334_v23 = vpack.c.b16 %v1305_v6, %v1291_v31  ;;  %v1042_v7 = vrot.slane %v3445_v26, 1  ;;  %v1043_v44 = vrot.slane %v3445_v26, 2  ;;  %v1044_v5 = vrot.slane %v3445_v26, 3 }
 0x16f   :  { %v1045_v15 = vrot.slane %v3445_v26, 4  ;;  %v1046_v3 = vrot.slane %v3445_v26, 5  ;;  %v1047_v42 = vrot.slane %v3445_v26, 6  ;;  %v1048_v49 = vrot.slane %v3445_v26, 7 }
 0x170   :  { %v409_v8 = vpop.xlane.xlu0 %408  ;;  %3392 = vmatprep.mubr.msk.bf16.mxu0 %vm163_vm7, %v1334_v23  ;;  %v1097_v36 = vmul.f32 %v5419_v62, %v4264_v35  ;;  %v1098_v17 = vmul.f32 %v1035_v12, %v4267_v57  ;;  %v1099_v30 = vmul.f32 %v1036_v4, %v4270_v40  ;;  %v1100_v19 = vmul.f32 %v1037_v13, %v4273_v27  ;;  %v5462_v27 = vld [vmem:[%s6060_s3 + $0x38] sm:$0xff]  }
 0x171   :  { %v415_v51 = vmul.f32 0.03125, %v409_v8  ;;  %v1101_v25 = vmul.f32 %v1038_v1, %v6277_v21  ;;  %v1102_v29 = vmul.f32 %v1039_v16, %v6278_v53  ;;  %v1103_v45 = vmul.f32 %v1040_v58, %v6279_v20  ;;  %3412 = vmatprep.subr.bf16.mxu1 %v5462_v27 }
 0x172   :  { %v1104_v60 = vmul.f32 %v1041_v28, %v6280_v54  ;;  %v1105_v39 = vmul.f32 %v3445_v26, %v4423_v0  ;;  %v1106_v56 = vmul.f32 %v1042_v7, %v4426_v14  ;;  %v1107_v35 = vmul.f32 %v1043_v44, %v4429_v63 }
 0x173   :  { %v419_v24 = vadd.f32 1e-05, %v415_v51  ;;  %v1108_v57 = vmul.f32 %v1044_v5, %v4435_v48  ;;  %v1109_v40 = vmul.f32 %v1045_v15, %v4438_v61  ;;  %v1110_v62 = vmul.f32 %v1046_v3, %v4442_v32 }
 0x174   :  { %v1111_v11 = vmul.f32 %v1047_v42, %v4445_v37  ;;  %v1112_v12 = vmul.f32 %v1048_v49, %v4448_v38  ;;  %v1130_v0 = vmul.f32 %v5324_v47, %v1098_v17  ;;  %v1129_v14 = vmul.f32 %v5324_v47, %v1097_v36 }
 0x175   :  { %3450 = vrsqrt.f32 %v419_v24  ;;  %v1131_v63 = vmul.f32 %v5324_v47, %v1099_v30  ;;  %v1132_v48 = vmul.f32 %v5324_v47, %v1100_v19  ;;  %v5472_v61 = vpop.eup %3446  ;;  %v1133_v26 = vmul.f32 %v5324_v47, %v1101_v25 }
 0x176   :  { %v1134_v32 = vmul.f32 %v5324_v47, %v1102_v29  ;;  %v1135_v37 = vmul.f32 %v5324_v47, %v1103_v45  ;;  %v1136_v38 = vmul.f32 %v5324_v47, %v1104_v60  ;;  %v1137_v4 = vmul.f32 %v5324_v47, %v1105_v39 }
 0x177   :  { %v1138_v31 = vmul.f32 %v5324_v47, %v1106_v56  ;;  %v1139_v59 = vmul.f32 %v5324_v47, %v1107_v35  ;;  %v1140_v13 = vmul.f32 %v5324_v47, %v1108_v57  ;;  %v1141_v6 = vmul.f32 %v5324_v47, %v1109_v40 }
 0x178   :  { %v1142_v1 = vmul.f32 %v5324_v47, %v1110_v62  ;;  %v1143_v16 = vmul.f32 %v5324_v47, %v1111_v11  ;;  %v1162_v58 = vadd.f32 %v5329_v50, %v1130_v0  ;;  %v5486_v23 = vpop.eup %3448  ;;  %v1144_v7 = vmul.f32 %v5324_v47, %v1112_v12 }
 0x179   :  { %v1161_v44 = vadd.f32 %v5329_v50, %v1129_v14  ;;  %v1163_v8 = vadd.f32 %v5329_v50, %v1131_v63  ;;  %v1164_v5 = vadd.f32 %v5329_v50, %v1132_v48  ;;  %v1165_v3 = vadd.f32 %v5329_v50, %v1133_v26 }
 0x17a   :  { %v412_v28 = vpop.xlane.xlu1 %411  ;;  %v1166_v42 = vadd.f32 %v5329_v50, %v1134_v32  ;;  %v1167_v51 = vadd.f32 %v5329_v50, %v1135_v37  ;;  %v1168_v49 = vadd.f32 %v5329_v50, %v1136_v38  ;;  %v1169_v36 = vadd.f32 %v5329_v50, %v1137_v4 }
 0x17b   :  { %v416_v15 = vmul.f32 0.03125, %v412_v28  ;;  %v1170_v17 = vadd.f32 %v5329_v50, %v1138_v31  ;;  %v1171_v30 = vadd.f32 %v5329_v50, %v1139_v59  ;;  %v1172_v21 = vadd.f32 %v5329_v50, %v1140_v13 }
 0x17c   :  { %v1173_v25 = vadd.f32 %v5329_v50, %v1141_v6  ;;  %v1194_v53 = vpack.c.bf16 %v1162_v58, %v1162_v58  ;;  %v1174_v29 = vadd.f32 %v5329_v50, %v1142_v1  ;;  %v1175_v24 = vadd.f32 %v5329_v50, %v1143_v16 }
 0x17d   :  { %v420_v19 = vadd.f32 1e-05, %v416_v15  ;;  %v1176_v20 = vadd.f32 %v5329_v50, %v1144_v7  ;;  %v1195_v45 = vpack.c.bf16 %v1163_v8, %v1163_v8  ;;  %v1193_v54 = vpack.c.bf16 %v1161_v44, %v1161_v44 }
 0x17e   :  { %v1196_v60 = vpack.c.bf16 %v1164_v5, %v1164_v5  ;;  %v1197_v39 = vpack.c.bf16 %v1165_v3, %v1165_v3  ;;  %v1198_v56 = vpack.c.bf16 %v1166_v42, %v1166_v42  ;;  %v1199_v35 = vpack.c.bf16 %v1167_v51, %v1167_v51 }
 0x17f   :  { %3452 = vrsqrt.f32 %v420_v19  ;;  %v1202_v57 = vpack.c.bf16 %v1170_v17, %v1170_v17  ;;  %v1203_v40 = vpack.c.bf16 %v1171_v30, %v1171_v30  ;;  %v1200_v62 = vpack.c.bf16 %v1168_v49, %v1168_v49 }
 0x180   :  { %v1201_v11 = vpack.c.bf16 %v1169_v36, %v1169_v36  ;;  %v1204_v12 = vpack.c.bf16 %v1172_v21, %v1172_v21  ;;  %v1263_v0 = vunpack.c.l.b16 %v1194_v53  ;;  %v1205_v14 = vpack.c.bf16 %v1173_v25, %v1173_v25 }
 0x181   :  { %v1206_v63 = vpack.c.bf16 %v1174_v29, %v1174_v29  ;;  %v1207_v48 = vpack.c.bf16 %v1175_v24, %v1175_v24  ;;  %v1264_v26 = vunpack.c.l.b16 %v1195_v45  ;;  %v1208_v38 = vpack.c.bf16 %v1176_v20, %v1176_v20 }
 0x182   :  { %v5504_v32 = vpop.eup %3450  ;;  %v1262_v4 = vunpack.c.l.b16 %v1193_v54  ;;  %v1265_v31 = vunpack.c.l.b16 %v1196_v60  ;;  %v1266_v59 = vunpack.c.l.b16 %v1197_v39  ;;  %v1267_v6 = vunpack.c.l.b16 %v1198_v56 }
 0x183   :  { %v1954_v37 = vpop.xlane.xlu0 %1953  ;;  %v1271_v1 = vunpack.c.l.b16 %v1202_v57  ;;  %v1272_v16 = vunpack.c.l.b16 %v1203_v40  ;;  %v1268_v58 = vunpack.c.l.b16 %v1199_v35  ;;  %v1269_v28 = vunpack.c.l.b16 %v1200_v62 }
 0x184   :  { %v1964_v13 = vmul.f32 0.03125, %v1954_v37  ;;  %v1270_v7 = vunpack.c.l.b16 %v1201_v11  ;;  %v1306_v44 = vrot.slane %v1263_v0, 7  ;;  %v1273_v8 = vunpack.c.l.b16 %v1204_v12 }
 0x185   :  { %v1274_v5 = vunpack.c.l.b16 %v1205_v14  ;;  %v1275_v15 = vunpack.c.l.b16 %v1206_v63  ;;  %v1308_v3 = vrot.slane %v1264_v26, 6  ;;  %v1276_v51 = vunpack.c.l.b16 %v1207_v48 }
 0x186   :  { %v1968_v42 = vadd.f32 1e-05, %v1964_v13  ;;  %v1307_v49 = vsel %vm97_vm0, %v1306_v44, %v1262_v4  ;;  %v1310_v36 = vrot.slane %v1265_v31, 5  ;;  %v1312_v30 = vrot.slane %v1266_v59, 4 }
 0x187   :  { %v1309_v17 = vsel %vm100_vm1, %v1308_v3, %v1307_v49  ;;  %v1320_v19 = vrot.slane %v1271_v1, 7  ;;  %v1322_v21 = vrot.slane %v1272_v16, 6  ;;  %v1277_v25 = vunpack.c.l.b16 %v1208_v38  ;;  %v3433_v3 = vld [vmem:[%s6060_s3 + $0x20] sm:$0xff]  }
 0x188   :  { %v1311_v53 = vsel %vm103_vm2, %v1310_v36, %v1309_v17  ;;  %v1314_v29 = vrot.slane %v1267_v6, 3  ;;  %v1316_v24 = vrot.slane %v1268_v58, 2  ;;  %v1318_v45 = vrot.slane %v1269_v28, 1 }
 0x189   :  { %v1313_v20 = vsel %vm106_vm3, %v1312_v30, %v1311_v53  ;;  %v1321_v54 = vsel %vm97_vm0, %v1320_v19, %v1270_v7  ;;  %v1324_v60 = vrot.slane %v1273_v8, 5  ;;  %3454 = vrsqrt.f32 %v1968_v42  ;;  %v6281_v30 = vld [vmem:[#allocation17_spill] sm:$0xff]  ;;  %v6283_v53 = vld [vmem:[#allocation19_spill] sm:$0xff] }
 0x18a   :  { %v1315_v39 = vsel %vm109_vm4, %v1314_v29, %v1313_v20  ;;  %v1323_v56 = vsel %vm100_vm1, %v1322_v21, %v1321_v54  ;;  %v1326_v35 = vrot.slane %v1274_v5, 4  ;;  %v1328_v62 = vrot.slane %v1275_v15, 3  ;;  %v6282_v21 = vld [vmem:[#allocation18_spill] sm:$0xff] }
 0x18b   :  { %v1317_v57 = vsel %vm112_vm5, %v1316_v24, %v1315_v39  ;;  %v1325_v40 = vsel %vm103_vm2, %v1324_v60, %v1323_v56  ;;  %v1330_v11 = vrot.slane %v1276_v51, 2  ;;  %v1332_v63 = vrot.slane %v1277_v25, 1  ;;  %v6284_v24 = vld [vmem:[#allocation20_spill] sm:$0xff]  ;;  %v6286_v60 = vld [vmem:[#allocation3_spill] sm:$0xff]  ;;  %v6288_v56 = vld [vmem:[#allocation22_spill] sm:$0xff] }
 0x18c   :  { %v5515_v12 = vpop.eup %3452  ;;  %v1327_v14 = vsel %vm106_vm3, %v1326_v35, %v1325_v40  ;;  %v429_v48 = vrot.slane %v5472_v61, 1  ;;  %v430_v26 = vrot.slane %v5472_v61, 2  ;;  %v431_v4 = vrot.slane %v5472_v61, 3  ;;  %v6290_v40 = vld [vmem:[#allocation24_spill] sm:$0xff] }
 0x18d   :  { %v1957_v0 = vpop.xlane.xlu1 %1956  ;;  %v1329_v38 = vsel %vm109_vm4, %v1328_v62, %v1327_v14  ;;  %v432_v31 = vrot.slane %v5472_v61, 4  ;;  %v1319_v59 = vsel %vm115_vm6, %v1318_v45, %v1317_v57  ;;  %v433_v6 = vrot.slane %v5472_v61, 5  ;;  %v6285_v45 = vld [vmem:[#allocation2_spill] sm:$0xff] }
 0x18e   :  { %v1965_v37 = vmul.f32 0.03125, %v1957_v0  ;;  %v1331_v13 = vsel %vm112_vm5, %v1330_v11, %v1329_v38  ;;  %v434_v1 = vrot.slane %v5472_v61, 6  ;;  %v435_v28 = vrot.slane %v5472_v61, 7  ;;  %v6291_v0 = vld [vmem:[#allocation25_spill] sm:$0xff]  ;;  %v6294_v38 = vld [vmem:[#allocation28_spill] sm:$0xff] }
 0x18f   :  { %v1333_v58 = vsel %vm115_vm6, %v1332_v63, %v1331_v13  ;;  %v436_v7 = vrot.slane %v5486_v23, 1  ;;  %v437_v8 = vrot.slane %v5486_v23, 2  ;;  %v438_v5 = vrot.slane %v5486_v23, 3  ;;  %v6292_v63 = vld [vmem:[#allocation26_spill] sm:$0xff] }
 0x190   :  { %v1969_v16 = vadd.f32 1e-05, %v1965_v37  ;;  %v1335_v44 = vpack.c.b16 %v1333_v58, %v1319_v59  ;;  %v439_v15 = vrot.slane %v5486_v23, 4  ;;  %v440_v42 = vrot.slane %v5486_v23, 5 }
 0x191   :  { %v441_v51 = vrot.slane %v5486_v23, 6  ;;  %v442_v49 = vrot.slane %v5486_v23, 7  ;;  %v489_v36 = vmul.f32 %v5472_v61, %v4484_v43  ;;  %v490_v17 = vmul.f32 %v429_v48, %v4487_v46  ;;  %v6287_v43 = vld [vmem:[#allocation21_spill] sm:$0xff]  ;;  %v6289_v46 = vld [vmem:[#allocation23_spill] sm:$0xff] }
 0x192   :  { %3456 = vrsqrt.f32 %v1969_v16  ;;  %3393 = vmatmul.mubr.msk.bf16.vlgmr.msra.gmra.mxu0 %vm163_vm7, %v1335_v44  ;;  %v491_v19 = vmul.f32 %v430_v26, %v6281_v30  ;;  %v492_v25 = vmul.f32 %v431_v4, %v6282_v21  ;;  %v493_v29 = vmul.f32 %v432_v31, %v6283_v53  ;;  %v6293_v26 = vld [vmem:[#allocation27_spill] sm:$0xff] }
 0x193   :  { %v494_v20 = vmul.f32 %v433_v6, %v6284_v24  ;;  %v495_v54 = vmul.f32 %v434_v1, %v6285_v45  ;;  %v496_v39 = vmul.f32 %v435_v28, %v6286_v60  ;;  %3405 = vmatpush3.bf16.msra.mxu0 %v5386_v55  ;;  %v497_v61 = vmul.f32 %v5486_v23, %v6287_v43 }
 0x194   :  { %v498_v35 = vmul.f32 %v436_v7, %v6288_v56  ;;  %v499_v57 = vmul.f32 %v437_v8, %v6289_v46  ;;  %v500_v62 = vmul.f32 %v438_v5, %v6290_v40  ;;  %3406 = vmatprep.subr.bf16.mxu0 %v3433_v3  ;;  %v501_v14 = vmul.f32 %v439_v15, %v6291_v0 }
 0x195   :  { %v502_v48 = vmul.f32 %v440_v42, %v6292_v63  ;;  %v503_v37 = vmul.f32 %v441_v51, %v6293_v26  ;;  %v504_v4 = vmul.f32 %v442_v49, %v6294_v38  ;;  %v527_v31 = vmul.f32 %v5324_v47, %v489_v36 }
 0x196   :  { %v528_v23 = vmul.f32 %v5324_v47, %v490_v17  ;;  %v529_v59 = vmul.f32 %v5324_v47, %v491_v19  ;;  %v5562_v13 = vpop.eup %3454  ;;  %v530_v6 = vmul.f32 %v5324_v47, %v492_v25  ;;  %v531_v1 = vmul.f32 %v5324_v47, %v493_v29 }
 0x197   :  { %v1960_v11 = vpop.xlane.xlu0 %1959  ;;  %v532_v16 = vmul.f32 %v5324_v47, %v494_v20  ;;  %v533_v58 = vmul.f32 %v5324_v47, %v495_v54  ;;  %3407 = vmatpush3.bf16.msra.mxu0 %v3433_v3  ;;  %v534_v7 = vmul.f32 %v5324_v47, %v496_v39  ;;  %v536_v44 = vmul.f32 %v5324_v47, %v498_v35 }
 0x198   :  { %v1966_v55 = vmul.f32 0.03125, %v1960_v11  ;;  %v537_v8 = vmul.f32 %v5324_v47, %v499_v57  ;;  %v535_v5 = vmul.f32 %v5324_v47, %v497_v61  ;;  %v538_v15 = vmul.f32 %v5324_v47, %v500_v62 }
 0x199   :  { %v539_v42 = vmul.f32 %v5324_v47, %v501_v14  ;;  %v540_v51 = vmul.f32 %v5324_v47, %v502_v48  ;;  %v541_v49 = vmul.f32 %v5324_v47, %v503_v37  ;;  %v542_v36 = vmul.f32 %v5324_v47, %v504_v4 }
 0x19a   :  { %v1970_v28 = vadd.f32 1e-05, %v1966_v55  ;;  %v566_v3 = vadd.f32 %v5329_v50, %v528_v23  ;;  %v567_v17 = vadd.f32 %v5329_v50, %v529_v59  ;;  %v565_v30 = vadd.f32 %v5329_v50, %v527_v31 }
 0x19b   :  { %v568_v19 = vadd.f32 %v5329_v50, %v530_v6  ;;  %v569_v21 = vadd.f32 %v5329_v50, %v531_v1  ;;  %v570_v25 = vadd.f32 %v5329_v50, %v532_v16  ;;  %v571_v53 = vadd.f32 %v5329_v50, %v533_v58 }
 0x19c   :  { %3458 = vrsqrt.f32 %v1970_v28  ;;  %v574_v29 = vadd.f32 %v5329_v50, %v536_v44  ;;  %v575_v24 = vadd.f32 %v5329_v50, %v537_v8  ;;  %v572_v20 = vadd.f32 %v5329_v50, %v534_v7 }
 0x19d   :  { %v573_v45 = vadd.f32 %v5329_v50, %v535_v5  ;;  %v576_v54 = vadd.f32 %v5329_v50, %v538_v15  ;;  %v577_v60 = vadd.f32 %v5329_v50, %v539_v42  ;;  %v578_v39 = vadd.f32 %v5329_v50, %v540_v51 }
 0x19e   :  { %v579_v43 = vadd.f32 %v5329_v50, %v541_v49  ;;  %v598_v61 = vpack.c.bf16 %v566_v3, %v566_v3  ;;  %v599_v56 = vpack.c.bf16 %v567_v17, %v567_v17  ;;  %v580_v57 = vadd.f32 %v5329_v50, %v542_v36 }
 0x19f   :  { %v5592_v35 = vpop.eup %3456  ;;  %v597_v40 = vpack.c.bf16 %v565_v30, %v565_v30  ;;  %v600_v62 = vpack.c.bf16 %v568_v19, %v568_v19  ;;  %v601_v11 = vpack.c.bf16 %v569_v21, %v569_v21  ;;  %v602_v14 = vpack.c.bf16 %v570_v25, %v570_v25 }
 0x1a0   :  { %v606_v63 = vpack.c.bf16 %v574_v29, %v574_v29  ;;  %v607_v48 = vpack.c.bf16 %v575_v24, %v575_v24  ;;  %v603_v26 = vpack.c.bf16 %v571_v53, %v571_v53  ;;  %v604_v37 = vpack.c.bf16 %v572_v20, %v572_v20 }
 0x1a1   :  { %v1963_v46 = vpop.xlane.xlu1 %1962  ;;  %v605_v38 = vpack.c.bf16 %v573_v45, %v573_v45  ;;  %v608_v4 = vpack.c.bf16 %v576_v54, %v576_v54  ;;  %v609_v31 = vpack.c.bf16 %v577_v60, %v577_v60  ;;  %v1436_v23 = vunpack.c.l.b16 %v598_v61 }
 0x1a2   :  { %v1967_v0 = vmul.f32 0.03125, %v1963_v46  ;;  %v1437_v59 = vunpack.c.l.b16 %v599_v56  ;;  %v610_v6 = vpack.c.bf16 %v578_v39, %v578_v39  ;;  %v611_v1 = vpack.c.bf16 %v579_v43, %v579_v43 }
 0x1a3   :  { %v612_v16 = vpack.c.bf16 %v580_v57, %v580_v57  ;;  %v1435_v58 = vunpack.c.l.b16 %v597_v40  ;;  %v1438_v28 = vunpack.c.l.b16 %v600_v62  ;;  %v1439_v7 = vunpack.c.l.b16 %v601_v11 }
 0x1a4   :  { %v1971_v55 = vadd.f32 1e-05, %v1967_v0  ;;  %v1444_v44 = vunpack.c.l.b16 %v606_v63  ;;  %v1445_v8 = vunpack.c.l.b16 %v607_v48  ;;  %v1440_v5 = vunpack.c.l.b16 %v602_v14 }
 0x1a5   :  { %v1441_v15 = vunpack.c.l.b16 %v603_v26  ;;  %v1442_v42 = vunpack.c.l.b16 %v604_v37  ;;  %v1443_v51 = vunpack.c.l.b16 %v605_v38  ;;  %v1446_v49 = vunpack.c.l.b16 %v608_v4 }
 0x1a6   :  { %3460 = vrsqrt.f32 %v1971_v55  ;;  %v1467_v36 = vrot.slane %v1436_v23, 7  ;;  %v1469_v3 = vrot.slane %v1437_v59, 6  ;;  %v1447_v17 = vunpack.c.l.b16 %v609_v31 }
 0x1a7   :  { %v1448_v30 = vunpack.c.l.b16 %v610_v6  ;;  %v1449_v19 = vunpack.c.l.b16 %v611_v1  ;;  %v1450_v21 = vunpack.c.l.b16 %v612_v16  ;;  %v1471_v24 = vrot.slane %v1438_v28, 5 }
 0x1a8   :  { %v1468_v29 = vsel %vm97_vm0, %v1467_v36, %v1435_v58  ;;  %v1481_v20 = vrot.slane %v1444_v44, 7  ;;  %v1483_v45 = vrot.slane %v1445_v8, 6  ;;  %v1473_v39 = vrot.slane %v1439_v7, 4 }
 0x1a9   :  { %v5595_v25 = vpop.eup %3458  ;;  %v1470_v60 = vsel %vm100_vm1, %v1469_v3, %v1468_v29  ;;  %v1475_v43 = vrot.slane %v1440_v5, 3  ;;  %v1477_v56 = vrot.slane %v1441_v15, 2  ;;  %v1485_v57 = vrot.slane %v1446_v49, 5 }
 0x1aa   :  { %v1472_v61 = vsel %vm103_vm2, %v1471_v24, %v1470_v60  ;;  %v1482_v46 = vsel %vm97_vm0, %v1481_v20, %v1443_v51  ;;  %v1487_v0 = vrot.slane %v1447_v17, 4  ;;  %v1479_v63 = vrot.slane %v1442_v42, 1  ;;  %v6296_v60 = vld [vmem:[#allocation5_spill] sm:$0xff] }
 0x1ab   :  { %v2728_v53 = vpop.xlane.xlu0 %2727  ;;  %v1474_v62 = vsel %vm106_vm3, %v1473_v39, %v1472_v61  ;;  %v1484_v11 = vsel %vm100_vm1, %v1483_v45, %v1482_v46  ;;  %v1489_v26 = vrot.slane %v1448_v30, 3  ;;  %v1491_v4 = vrot.slane %v1449_v19, 2  ;;  %v6295_v45 = vld [vmem:[#allocation4_spill] sm:$0xff] }
 0x1ac   :  { %v2738_v54 = vmul.f32 0.03125, %v2728_v53  ;;  %v1476_v14 = vsel %vm109_vm4, %v1475_v43, %v1474_v62  ;;  %v1486_v48 = vsel %vm103_vm2, %v1485_v57, %v1484_v11  ;;  %v1493_v55 = vrot.slane %v1450_v21, 1  ;;  %v6297_v43 = vld [vmem:[#allocation6_spill] sm:$0xff]  ;;  %v6298_v57 = vld [vmem:[#allocation7_spill] sm:$0xff]  ;;  %v6299_v62 = vld [vmem:[#allocation8_spill] sm:$0xff] }
 0x1ad   :  { %v1478_v37 = vsel %vm112_vm5, %v1477_v56, %v1476_v14  ;;  %v1488_v38 = vsel %vm106_vm3, %v1487_v0, %v1486_v48  ;;  %v443_v23 = vrot.slane %v5504_v32, 1  ;;  %v444_v59 = vrot.slane %v5504_v32, 2  ;;  %v6301_v11 = vld [vmem:[#allocation10_spill] sm:$0xff]  ;;  %v6302_v0 = vld [vmem:[#allocation11_spill] sm:$0xff]  ;;  %v6303_v14 = vld [vmem:[#allocation29_spill] sm:$0xff] }
 0x1ae   :  { %v2742_v40 = vadd.f32 1e-05, %v2738_v54  ;;  %v1490_v31 = vsel %vm109_vm4, %v1489_v26, %v1488_v38  ;;  %v445_v6 = vrot.slane %v5504_v32, 3  ;;  %v1480_v1 = vsel %vm115_vm6, %v1479_v63, %v1478_v37  ;;  %v6304_v48 = vld [vmem:[#allocation30_spill] sm:$0xff]  ;;  %v6305_v37 = vld [vmem:[#allocation31_spill] sm:$0xff] }
 0x1af   :  { %v1492_v16 = vsel %vm112_vm5, %v1491_v4, %v1490_v31  ;;  %v446_v58 = vrot.slane %v5504_v32, 4  ;;  %v447_v7 = vrot.slane %v5504_v32, 5  ;;  %v448_v44 = vrot.slane %v5504_v32, 6 }
 0x1b0   :  { %3462 = vrsqrt.f32 %v2742_v40  ;;  %v1494_v28 = vsel %vm115_vm6, %v1493_v55, %v1492_v16  ;;  %v449_v8 = vrot.slane %v5504_v32, 7  ;;  %v450_v15 = vrot.slane %v5515_v12, 1 }
 0x1b1   :  { %v1523_v5 = vpack.c.b16 %v1494_v28, %v1480_v1  ;;  %v451_v42 = vrot.slane %v5515_v12, 2  ;;  %v452_v51 = vrot.slane %v5515_v12, 3  ;;  %v453_v3 = vrot.slane %v5515_v12, 4 }
 0x1b2   :  { %v454_v17 = vrot.slane %v5515_v12, 5  ;;  %v455_v30 = vrot.slane %v5515_v12, 6  ;;  %v456_v19 = vrot.slane %v5515_v12, 7  ;;  %v505_v53 = vmul.f32 %v5504_v32, %v4622_v41  ;;  %v6300_v32 = vld [vmem:[#allocation9_spill] sm:$0xff] }
 0x1b3   :  { %v5621_v49 = vpop.eup %3460  ;;  %3400 = vmatprep.mubr.msk.bf16.mxu1 %vm163_vm7, %v1523_v5  ;;  %v506_v29 = vmul.f32 %v443_v23, %v4625_v34  ;;  %v507_v24 = vmul.f32 %v444_v59, %v4629_v10  ;;  %v508_v20 = vmul.f32 %v445_v6, %v4632_v2  ;;  %v509_v54 = vmul.f32 %v446_v58, %v6295_v45  ;;  %v5663_v5 = vld [vmem:[%s6058_s1] ss:$0 sm:$0xff] }
 0x1b4   :  { %v510_v39 = vmul.f32 %v447_v7, %v6296_v60  ;;  %v511_v61 = vmul.f32 %v448_v44, %v6297_v43  ;;  %v512_v46 = vmul.f32 %v449_v8, %v4645_v9  ;;  %v513_v40 = vmul.f32 %v5515_v12, %v6298_v57 }
 0x1b5   :  { %v2731_v36 = vpop.xlane.xlu1 %2730  ;;  %v514_v41 = vmul.f32 %v450_v15, %v6299_v62  ;;  %v515_v34 = vmul.f32 %v451_v42, %v6300_v32  ;;  %v516_v10 = vmul.f32 %v452_v51, %v6301_v11  ;;  %v517_v2 = vmul.f32 %v453_v3, %v6302_v0  ;;  %v5670_v51 = vld [vmem:[%s6059_s2] ss:$0 sm:$0xff] }
 0x1b6   :  { %v2739_v21 = vmul.f32 0.03125, %v2731_v36  ;;  %v518_v63 = vmul.f32 %v454_v17, %v6303_v14  ;;  %v519_v26 = vmul.f32 %v455_v30, %v6304_v48  ;;  %v520_v38 = vmul.f32 %v456_v19, %v6305_v37 }
 0x1b7   :  { %v544_v4 = vmul.f32 %v5324_v47, %v506_v29  ;;  %v545_v9 = vmul.f32 %v5324_v47, %v507_v24  ;;  %v543_v12 = vmul.f32 %v5324_v47, %v505_v53  ;;  %v546_v55 = vmul.f32 %v5324_v47, %v508_v20 }
 0x1b8   :  { %v2743_v56 = vadd.f32 1e-05, %v2739_v21  ;;  %v547_v31 = vmul.f32 %v5324_v47, %v509_v54  ;;  %v548_v23 = vmul.f32 %v5324_v47, %v510_v39  ;;  %v549_v59 = vmul.f32 %v5324_v47, %v511_v61 }
 0x1b9   :  { %v550_v6 = vmul.f32 %v5324_v47, %v512_v46  ;;  %v552_v1 = vmul.f32 %v5324_v47, %v514_v41  ;;  %v551_v16 = vmul.f32 %v5324_v47, %v513_v40  ;;  %v553_v58 = vmul.f32 %v5324_v47, %v515_v34 }
 0x1ba   :  { %3464 = vrsqrt.f32 %v2743_v56  ;;  %v554_v28 = vmul.f32 %v5324_v47, %v516_v10  ;;  %v555_v7 = vmul.f32 %v5324_v47, %v517_v2  ;;  %v556_v8 = vmul.f32 %v5324_v47, %v518_v63 }
 0x1bb   :  { %v557_v15 = vmul.f32 %v5663_v5, %v519_v26  ;;  %v582_v42 = vadd.f32 %v5329_v50, %v544_v4  ;;  %v583_v36 = vadd.f32 %v5670_v51, %v545_v9  ;;  %v558_v47 = vmul.f32 %v5663_v5, %v520_v38 }
 0x1bc   :  { %v581_v30 = vadd.f32 %v5670_v51, %v543_v12  ;;  %v584_v19 = vadd.f32 %v5670_v51, %v546_v55  ;;  %v585_v21 = vadd.f32 %v5670_v51, %v547_v31  ;;  %v586_v50 = vadd.f32 %v5670_v51, %v548_v23 }
 0x1bd   :  { %v5673_v3 = vpop.eup %3462  ;;  %v587_v53 = vadd.f32 %v5670_v51, %v549_v59  ;;  %v590_v29 = vadd.f32 %v5670_v51, %v552_v1  ;;  %v588_v20 = vadd.f32 %v5670_v51, %v550_v6  ;;  %v589_v45 = vadd.f32 %v5670_v51, %v551_v16 }
 0x1be   :  { %v591_v54 = vadd.f32 %v5670_v51, %v553_v58  ;;  %v592_v60 = vadd.f32 %v5670_v51, %v554_v28  ;;  %v593_v39 = vadd.f32 %v5670_v51, %v555_v7  ;;  %v614_v43 = vpack.c.bf16 %v582_v42, %v582_v42 }
 0x1bf   :  { %v2734_v44 = vpop.xlane.xlu0 %2733  ;;  %v615_v61 = vpack.c.bf16 %v583_v36, %v583_v36  ;;  %v594_v56 = vadd.f32 %v5670_v51, %v556_v8  ;;  %v595_v46 = vadd.f32 %v5670_v51, %v557_v15  ;;  %v596_v57 = vadd.f32 %v5670_v51, %v558_v47 }
 0x1c0   :  { %v2740_v17 = vmul.f32 0.03125, %v2734_v44  ;;  %v613_v40 = vpack.c.bf16 %v581_v30, %v581_v30  ;;  %v616_v62 = vpack.c.bf16 %v584_v19, %v584_v19  ;;  %v617_v41 = vpack.c.bf16 %v585_v21, %v585_v21 }
 0x1c1   :  { %v622_v32 = vpack.c.bf16 %v590_v29, %v590_v29  ;;  %v618_v34 = vpack.c.bf16 %v586_v50, %v586_v50  ;;  %v619_v11 = vpack.c.bf16 %v587_v53, %v587_v53  ;;  %v620_v10 = vpack.c.bf16 %v588_v20, %v588_v20 }
 0x1c2   :  { %v2744_v24 = vadd.f32 1e-05, %v2740_v17  ;;  %v623_v0 = vpack.c.bf16 %v591_v54, %v591_v54  ;;  %v621_v2 = vpack.c.bf16 %v589_v45, %v589_v45  ;;  %v624_v14 = vpack.c.bf16 %v592_v60, %v592_v60 }
 0x1c3   :  { %v1452_v63 = vunpack.c.l.b16 %v614_v43  ;;  %v1453_v48 = vunpack.c.l.b16 %v615_v61  ;;  %v625_v26 = vpack.c.bf16 %v593_v39, %v593_v39  ;;  %v626_v37 = vpack.c.bf16 %v594_v56, %v594_v56 }
 0x1c4   :  { %3466 = vrsqrt.f32 %v2744_v24  ;;  %v627_v38 = vpack.c.bf16 %v595_v46, %v595_v46  ;;  %v628_v4 = vpack.c.bf16 %v596_v57, %v596_v57  ;;  %v1451_v55 = vunpack.c.l.b16 %v613_v40 }
 0x1c5   :  { %v1454_v31 = vunpack.c.l.b16 %v616_v62  ;;  %v1455_v23 = vunpack.c.l.b16 %v617_v41  ;;  %v1460_v59 = vunpack.c.l.b16 %v622_v32  ;;  %v1456_v1 = vunpack.c.l.b16 %v618_v34 }
 0x1c6   :  { %v1457_v16 = vunpack.c.l.b16 %v619_v11  ;;  %v1461_v58 = vunpack.c.l.b16 %v623_v0  ;;  %v1458_v28 = vunpack.c.l.b16 %v620_v10  ;;  %v1462_v7 = vunpack.c.l.b16 %v624_v14 }
 0x1c7   :  { %v5690_v9 = vpop.eup %3464  ;;  %v1495_v44 = vrot.slane %v1452_v63, 7  ;;  %v1497_v8 = vrot.slane %v1453_v48, 6  ;;  %v1459_v15 = vunpack.c.l.b16 %v621_v2  ;;  %v1463_v42 = vunpack.c.l.b16 %v625_v26 }
 0x1c8   :  { %v1464_v36 = vunpack.c.l.b16 %v626_v37  ;;  %v1465_v17 = vunpack.c.l.b16 %v627_v38  ;;  %v1466_v47 = vunpack.c.l.b16 %v628_v4  ;;  %v1499_v19 = vrot.slane %v1454_v31, 5 }
 0x1c9   :  { %v2737_v12 = vpop.xlane.xlu1 %2736  ;;  %v1496_v30 = vsel %vm97_vm0, %v1495_v44, %v1451_v55  ;;  %v1509_v21 = vrot.slane %v1460_v59, 7  ;;  %v1501_v29 = vrot.slane %v1455_v23, 4  ;;  %v1511_v24 = vrot.slane %v1461_v58, 6 }
 0x1ca   :  { %v2741_v6 = vmul.f32 0.03125, %v2737_v12  ;;  %v1498_v53 = vsel %vm100_vm1, %v1497_v8, %v1496_v30  ;;  %v1503_v45 = vrot.slane %v1456_v1, 3  ;;  %v1513_v60 = vrot.slane %v1462_v7, 5  ;;  %v3435_v1 = vld [vmem:[%s6060_s3 + $0x30] sm:$0xff]   ;;  %v6306_v7 = vld [vmem:[#allocation33_spill] sm:$0xff]  ;;  %v6309_v30 = vld [vmem:[#allocation35_spill] sm:$0xff] }
 0x1cb   :  { %v1500_v20 = vsel %vm103_vm2, %v1499_v19, %v1498_v53  ;;  %v1510_v54 = vsel %vm97_vm0, %v1509_v21, %v1459_v15  ;;  %v1505_v43 = vrot.slane %v1457_v16, 2  ;;  %v1515_v56 = vrot.slane %v1463_v42, 4  ;;  %v6307_v42 = vld [vmem:[#allocation32_spill] sm:$0xff] }
 0x1cc   :  { %v2745_v50 = vadd.f32 1e-05, %v2741_v6  ;;  %v1502_v39 = vsel %vm106_vm3, %v1501_v29, %v1500_v20  ;;  %v1512_v61 = vsel %vm100_vm1, %v1511_v24, %v1510_v54  ;;  %v1507_v57 = vrot.slane %v1458_v28, 1  ;;  %v6310_v21 = vld [vmem:[#allocation36_spill] sm:$0xff]  ;;  %v6312_v24 = vld [vmem:[#allocation37_spill] sm:$0xff] }
 0x1cd   :  { %v1504_v46 = vsel %vm109_vm4, %v1503_v45, %v1502_v39  ;;  %v1514_v40 = vsel %vm103_vm2, %v1513_v60, %v1512_v61  ;;  %v1517_v62 = vrot.slane %v1464_v36, 3  ;;  %v1519_v11 = vrot.slane %v1465_v17, 2  ;;  %v6308_v17 = vld [vmem:[#allocation34_spill] sm:$0xff]  ;;  %v6314_v60 = vld [vmem:[#allocation39_spill] sm:$0xff] }
 0x1ce   :  { %3468 = vrsqrt.f32 %v2745_v50  ;;  %v1506_v32 = vsel %vm112_vm5, %v1505_v43, %v1504_v46  ;;  %v1516_v34 = vsel %vm106_vm3, %v1515_v56, %v1514_v40  ;;  %v1521_v0 = vrot.slane %v1466_v47, 1  ;;  %v6313_v45 = vld [vmem:[#allocation38_spill] sm:$0xff]  ;;  %v6317_v46 = vld [vmem:[#allocation43_spill] sm:$0xff] }
 0x1cf   :  { %v1518_v10 = vsel %vm109_vm4, %v1517_v62, %v1516_v34  ;;  %v1980_v2 = vrot.slane %v5562_v13, 1  ;;  %v1981_v14 = vrot.slane %v5562_v13, 2  ;;  %v1508_v63 = vsel %vm115_vm6, %v1507_v57, %v1506_v32  ;;  %v6316_v61 = vld [vmem:[#allocation42_spill] sm:$0xff]  ;;  %v6318_v62 = vld [vmem:[#allocation44_spill] sm:$0xff]  ;;  %v6319_v32 = vld [vmem:[#allocation45_spill] sm:$0xff] }
 0x1d0   :  { %v1520_v48 = vsel %vm112_vm5, %v1519_v11, %v1518_v10  ;;  %v1982_v26 = vrot.slane %v5562_v13, 3  ;;  %v1983_v37 = vrot.slane %v5562_v13, 4  ;;  %v1984_v4 = vrot.slane %v5562_v13, 5 }
 0x1d1   :  { %v5700_v41 = vpop.eup %3466  ;;  %v1522_v38 = vsel %vm115_vm6, %v1521_v0, %v1520_v48  ;;  %v1987_v12 = vrot.slane %v5592_v35, 1  ;;  %v1988_v55 = vrot.slane %v5592_v35, 2  ;;  %v1985_v23 = vrot.slane %v5562_v13, 6 }
 0x1d2   :  { %v1524_v31 = vpack.c.b16 %v1522_v38, %v1508_v63  ;;  %v1986_v59 = vrot.slane %v5562_v13, 7  ;;  %v1989_v6 = vrot.slane %v5592_v35, 3  ;;  %v1990_v16 = vrot.slane %v5592_v35, 4 }
 0x1d3   :  { %v1991_v58 = vrot.slane %v5592_v35, 5  ;;  %v2041_v28 = vmul.f32 %v1980_v2, %v4756_v18  ;;  %v2042_v44 = vmul.f32 %v1981_v14, %v6306_v7  ;;  %v1992_v8 = vrot.slane %v5592_v35, 6  ;;  %v6311_v18 = vld [vmem:[#allocation40_spill] sm:$0xff] }
 0x1d4   :  { %3401 = vmatmul.mubr.msk.bf16.vlgmr.msra.gmra.mxu1 %vm163_vm7, %v1524_v31  ;;  %v1993_v15 = vrot.slane %v5592_v35, 7  ;;  %v2040_v36 = vmul.f32 %v5562_v13, %v6307_v42  ;;  %v2043_v47 = vmul.f32 %v1982_v26, %v6308_v17  ;;  %v2044_v19 = vmul.f32 %v1983_v37, %v6309_v30  ;;  %v6315_v13 = vld [vmem:[#allocation41_spill] sm:$0xff] }
 0x1d5   :  { %v2045_v50 = vmul.f32 %v1984_v4, %v6310_v21  ;;  %v2049_v53 = vmul.f32 %v1987_v12, %v4829_v33  ;;  %v2050_v29 = vmul.f32 %v1988_v55, %v6311_v18  ;;  %3413 = vmatpush3.bf16.msra.mxu1 %v5462_v27  ;;  %v2046_v20 = vmul.f32 %v1985_v23, %v6312_v24 }
 0x1d6   :  { %v2047_v54 = vmul.f32 %v1986_v59, %v6313_v45  ;;  %v2048_v39 = vmul.f32 %v5592_v35, %v6314_v60  ;;  %v2051_v43 = vmul.f32 %v1989_v6, %v6315_v13  ;;  %3414 = vmatprep.subr.bf16.mxu1 %v3435_v1  ;;  %v2052_v56 = vmul.f32 %v1990_v16, %v6316_v61 }
 0x1d7   :  { %v2053_v57 = vmul.f32 %v1991_v58, %v6317_v46  ;;  %v2073_v33 = vmul.f32 %v5663_v5, %v2041_v28  ;;  %v2074_v40 = vmul.f32 %v5663_v5, %v2042_v44  ;;  %v2054_v27 = vmul.f32 %v1992_v8, %v6318_v62 }
 0x1d8   :  { %v2055_v34 = vmul.f32 %v1993_v15, %v6319_v32  ;;  %v2072_v11 = vmul.f32 %v5663_v5, %v2040_v36  ;;  %v2075_v10 = vmul.f32 %v5663_v5, %v2043_v47  ;;  %v2076_v35 = vmul.f32 %v5663_v5, %v2044_v19 }
 0x1d9   :  { %v2077_v0 = vmul.f32 %v5663_v5, %v2045_v50  ;;  %v2081_v2 = vmul.f32 %v5663_v5, %v2049_v53  ;;  %v2082_v14 = vmul.f32 %v5663_v5, %v2050_v29  ;;  %3415 = vmatpush3.bf16.msra.mxu1 %v3435_v1  ;;  %v2078_v63 = vmul.f32 %v5663_v5, %v2046_v20 }
 0x1da   :  { %v2079_v48 = vmul.f32 %v5663_v5, %v2047_v54  ;;  %v2080_v26 = vmul.f32 %v5663_v5, %v2048_v39  ;;  %v2083_v37 = vmul.f32 %v5663_v5, %v2051_v43  ;;  %v2084_v4 = vmul.f32 %v5663_v5, %v2052_v56 }
 0x1db   :  { %v5757_v38 = vpop.eup %3468  ;;  %v2085_v12 = vmul.f32 %v5663_v5, %v2053_v57  ;;  %v2105_v55 = vadd.f32 %v5670_v51, %v2073_v33  ;;  %v2106_v31 = vadd.f32 %v5670_v51, %v2074_v40  ;;  %v2086_v23 = vmul.f32 %v5663_v5, %v2054_v27 }
 0x1dc   :  { %v2087_v59 = vmul.f32 %v5663_v5, %v2055_v34  ;;  %v2104_v6 = vadd.f32 %v5670_v51, %v2072_v11  ;;  %v2107_v1 = vadd.f32 %v5670_v51, %v2075_v10  ;;  %v2108_v16 = vadd.f32 %v5670_v51, %v2076_v35 }
 0x1dd   :  { %v2109_v58 = vadd.f32 %v5670_v51, %v2077_v0  ;;  %v2113_v28 = vadd.f32 %v5670_v51, %v2081_v2  ;;  %v2114_v7 = vadd.f32 %v5670_v51, %v2082_v14  ;;  %v2110_v44 = vadd.f32 %v5670_v51, %v2078_v63 }
 0x1de   :  { %v2111_v8 = vadd.f32 %v5670_v51, %v2079_v48  ;;  %v2112_v15 = vadd.f32 %v5670_v51, %v2080_v26  ;;  %v2115_v42 = vadd.f32 %v5670_v51, %v2083_v37  ;;  %v2116_v36 = vadd.f32 %v5670_v51, %v2084_v4 }
 0x1df   :  { %v2117_v17 = vadd.f32 %v5670_v51, %v2085_v12  ;;  %v2137_v47 = vpack.c.bf16 %v2105_v55, %v2105_v55  ;;  %v2138_v30 = vpack.c.bf16 %v2106_v31, %v2106_v31  ;;  %v2118_v19 = vadd.f32 %v5670_v51, %v2086_v23 }
 0x1e0   :  { %v2119_v21 = vadd.f32 %v5670_v51, %v2087_v59  ;;  %v2136_v50 = vpack.c.bf16 %v2104_v6, %v2104_v6  ;;  %v2139_v53 = vpack.c.bf16 %v2107_v1, %v2107_v1  ;;  %v2140_v18 = vpack.c.bf16 %v2108_v16, %v2108_v16 }
 0x1e1   :  { %v2141_v29 = vpack.c.bf16 %v2109_v58, %v2109_v58  ;;  %v2145_v24 = vpack.c.bf16 %v2113_v28, %v2113_v28  ;;  %v2146_v20 = vpack.c.bf16 %v2114_v7, %v2114_v7  ;;  %v2142_v45 = vpack.c.bf16 %v2110_v44, %v2110_v44 }
 0x1e2   :  { %v2143_v54 = vpack.c.bf16 %v2111_v8, %v2111_v8  ;;  %v2144_v60 = vpack.c.bf16 %v2112_v15, %v2112_v15  ;;  %v2147_v39 = vpack.c.bf16 %v2115_v42, %v2115_v42  ;;  %v2148_v13 = vpack.c.bf16 %v2116_v36, %v2116_v36 }
 0x1e3   :  { %v2149_v43 = vpack.c.bf16 %v2117_v17, %v2117_v17  ;;  %v2206_v61 = vunpack.c.l.b16 %v2137_v47  ;;  %v2207_v56 = vunpack.c.l.b16 %v2138_v30  ;;  %v2150_v46 = vpack.c.bf16 %v2118_v19, %v2118_v19 }
 0x1e4   :  { %v2151_v57 = vpack.c.bf16 %v2119_v21, %v2119_v21  ;;  %v2205_v33 = vunpack.c.l.b16 %v2136_v50  ;;  %v2208_v40 = vunpack.c.l.b16 %v2139_v53  ;;  %v2209_v62 = vunpack.c.l.b16 %v2140_v18 }
 0x1e5   :  { %v2210_v27 = vunpack.c.l.b16 %v2141_v29  ;;  %v2214_v32 = vunpack.c.l.b16 %v2145_v24  ;;  %v2215_v34 = vunpack.c.l.b16 %v2146_v20  ;;  %v2211_v11 = vunpack.c.l.b16 %v2142_v45 }
 0x1e6   :  { %v2212_v10 = vunpack.c.l.b16 %v2143_v54  ;;  %v2216_v35 = vunpack.c.l.b16 %v2147_v39  ;;  %v2237_v0 = vrot.slane %v2206_v61, 7  ;;  %v2213_v2 = vunpack.c.l.b16 %v2144_v60 }
 0x1e7   :  { %v2217_v14 = vunpack.c.l.b16 %v2148_v13  ;;  %v2218_v63 = vunpack.c.l.b16 %v2149_v43  ;;  %v2239_v48 = vrot.slane %v2207_v56, 6  ;;  %v2219_v26 = vunpack.c.l.b16 %v2150_v46 }
 0x1e8   :  { %v2238_v37 = vsel %vm97_vm0, %v2237_v0, %v2205_v33  ;;  %v2241_v4 = vrot.slane %v2208_v40, 5  ;;  %v2251_v12 = vrot.slane %v2214_v32, 7  ;;  %v2220_v55 = vunpack.c.l.b16 %v2151_v57 }
 0x1e9   :  { %v2240_v31 = vsel %vm100_vm1, %v2239_v48, %v2238_v37  ;;  %v2243_v23 = vrot.slane %v2209_v62, 4  ;;  %v2253_v59 = vrot.slane %v2215_v34, 6  ;;  %v2245_v1 = vrot.slane %v2210_v27, 3  ;;  %v6320_v27 = vld [vmem:[#allocation47_spill] sm:$0xff] }
 0x1ea   :  { %v2242_v6 = vsel %vm103_vm2, %v2241_v4, %v2240_v31  ;;  %v2252_v16 = vsel %vm97_vm0, %v2251_v12, %v2213_v2  ;;  %v2255_v58 = vrot.slane %v2216_v35, 5  ;;  %v2247_v7 = vrot.slane %v2211_v11, 2  ;;  %v6321_v11 = vld [vmem:[#allocation46_spill] sm:$0xff]  ;;  %v6322_v35 = vld [vmem:[#allocation48_spill] sm:$0xff] }
 0x1eb   :  { %v2244_v28 = vsel %vm106_vm3, %v2243_v23, %v2242_v6  ;;  %v2254_v44 = vsel %vm100_vm1, %v2253_v59, %v2252_v16  ;;  %v2257_v8 = vrot.slane %v2217_v14, 4  ;;  %v2249_v42 = vrot.slane %v2212_v10, 1  ;;  %v6326_v4 = vld [vmem:[#allocation54_spill] sm:$0xff]  ;;  %v6328_v23 = vld [vmem:[#allocation53_spill] sm:$0xff]  ;;  %v6329_v6 = vld [vmem:[#allocation55_spill] sm:$0xff] }
 0x1ec   :  { %v2246_v15 = vsel %vm109_vm4, %v2245_v1, %v2244_v28  ;;  %v2256_v36 = vsel %vm103_vm2, %v2255_v58, %v2254_v44  ;;  %v2259_v17 = vrot.slane %v2218_v63, 3  ;;  %v2261_v19 = vrot.slane %v2219_v26, 2  ;;  %v6324_v63 = vld [vmem:[#allocation50_spill] sm:$0xff]  ;;  %v6325_v26 = vld [vmem:[#allocation51_spill] sm:$0xff]  ;;  %v6330_v16 = vld [vmem:[#allocation56_spill] sm:$0xff] }
 0x1ed   :  { %v2248_v47 = vsel %vm112_vm5, %v2247_v7, %v2246_v15  ;;  %v2258_v30 = vsel %vm106_vm3, %v2257_v8, %v2256_v36  ;;  %v1994_v21 = vrot.slane %v5595_v25, 1  ;;  %v2263_v53 = vrot.slane %v2220_v55, 1  ;;  %v6327_v55 = vld [vmem:[#allocation52_spill] sm:$0xff]  ;;  %v6332_v7 = vld [vmem:[#allocation58_spill] sm:$0xff]  ;;  %v6333_v15 = vld [vmem:[#allocation59_spill] sm:$0xff] }
 0x1ee   :  { %v2260_v50 = vsel %vm109_vm4, %v2259_v17, %v2258_v30  ;;  %v1995_v18 = vrot.slane %v5595_v25, 2  ;;  %v1996_v29 = vrot.slane %v5595_v25, 3  ;;  %v1997_v20 = vrot.slane %v5595_v25, 4 }
 0x1ef   :  { %v2262_v24 = vsel %vm112_vm5, %v2261_v19, %v2260_v50  ;;  %v1998_v45 = vrot.slane %v5595_v25, 5  ;;  %v2001_v54 = vrot.slane %v5621_v49, 1  ;;  %v2250_v60 = vsel %vm115_vm6, %v2249_v42, %v2248_v47 }
 0x1f0   :  { %v2264_v39 = vsel %vm115_vm6, %v2263_v53, %v2262_v24  ;;  %v1999_v13 = vrot.slane %v5595_v25, 6  ;;  %v2002_v43 = vrot.slane %v5621_v49, 2  ;;  %v2000_v56 = vrot.slane %v5595_v25, 7 }
 0x1f1   :  { %v2293_v61 = vpack.c.b16 %v2264_v39, %v2250_v60  ;;  %v2003_v46 = vrot.slane %v5621_v49, 3  ;;  %v2057_v57 = vmul.f32 %v1994_v21, %v4900_v22  ;;  %v2004_v33 = vrot.slane %v5621_v49, 4  ;;  %v6323_v22 = vld [vmem:[#allocation49_spill] sm:$0xff] }
 0x1f2   :  { %v2005_v40 = vrot.slane %v5621_v49, 5  ;;  %v2006_v62 = vrot.slane %v5621_v49, 6  ;;  %v2058_v32 = vmul.f32 %v1995_v18, %v6320_v27  ;;  %v2007_v34 = vrot.slane %v5621_v49, 7 }
 0x1f3   :  { %3408 = vmatprep.mubr.msk.bf16.mxu0 %vm163_vm7, %v2293_v61  ;;  %v2056_v10 = vmul.f32 %v5595_v25, %v6321_v11  ;;  %v2059_v0 = vmul.f32 %v1996_v29, %v6322_v35  ;;  %v2065_v2 = vmul.f32 %v2001_v54, %v4973_v52  ;;  %v2060_v14 = vmul.f32 %v1997_v20, %v6323_v22  ;;  %v6331_v52 = vld [vmem:[#allocation57_spill] sm:$0xff] }
 0x1f4   :  { %v2061_v48 = vmul.f32 %v1998_v45, %v6324_v63  ;;  %v2062_v37 = vmul.f32 %v1999_v13, %v6325_v26  ;;  %v2066_v12 = vmul.f32 %v2002_v43, %v6326_v4  ;;  %v2063_v31 = vmul.f32 %v2000_v56, %v6327_v55 }
 0x1f5   :  { %v2064_v59 = vmul.f32 %v5621_v49, %v6328_v23  ;;  %v2067_v1 = vmul.f32 %v2003_v46, %v6329_v6  ;;  %v2089_v25 = vmul.f32 %v5663_v5, %v2057_v57  ;;  %v2068_v58 = vmul.f32 %v2004_v33, %v6330_v16 }
 0x1f6   :  { %v2069_v28 = vmul.f32 %v2005_v40, %v6331_v52  ;;  %v2070_v44 = vmul.f32 %v2006_v62, %v6332_v7  ;;  %v2090_v8 = vmul.f32 %v5663_v5, %v2058_v32  ;;  %v2071_v42 = vmul.f32 %v2007_v34, %v6333_v15 }
 0x1f7   :  { %v2088_v36 = vmul.f32 %v5663_v5, %v2056_v10  ;;  %v2091_v17 = vmul.f32 %v5663_v5, %v2059_v0  ;;  %v2097_v49 = vmul.f32 %v5663_v5, %v2065_v2  ;;  %v2092_v47 = vmul.f32 %v5663_v5, %v2060_v14 }
 0x1f8   :  { %v2093_v30 = vmul.f32 %v5663_v5, %v2061_v48  ;;  %v2094_v19 = vmul.f32 %v5663_v5, %v2062_v37  ;;  %v2098_v21 = vmul.f32 %v5663_v5, %v2066_v12  ;;  %v2095_v50 = vmul.f32 %v5663_v5, %v2063_v31 }
 0x1f9   :  { %v2096_v53 = vmul.f32 %v5663_v5, %v2064_v59  ;;  %v2099_v18 = vmul.f32 %v5663_v5, %v2067_v1  ;;  %v2121_v29 = vadd.f32 %v5670_v51, %v2089_v25  ;;  %v2100_v24 = vmul.f32 %v5663_v5, %v2068_v58 }
 0x1fa   :  { %v2101_v20 = vmul.f32 %v5663_v5, %v2069_v28  ;;  %v2102_v45 = vmul.f32 %v5663_v5, %v2070_v44  ;;  %v2122_v54 = vadd.f32 %v5670_v51, %v2090_v8  ;;  %v2103_v60 = vmul.f32 %v5663_v5, %v2071_v42 }
 0x1fb   :  { %v2120_v39 = vadd.f32 %v5670_v51, %v2088_v36  ;;  %v2123_v13 = vadd.f32 %v5670_v51, %v2091_v17  ;;  %v2129_v43 = vadd.f32 %v5670_v51, %v2097_v49  ;;  %v2124_v61 = vadd.f32 %v5670_v51, %v2092_v47 }
 0x1fc   :  { %v2125_v56 = vadd.f32 %v5670_v51, %v2093_v30  ;;  %v2126_v46 = vadd.f32 %v5670_v51, %v2094_v19  ;;  %v2130_v57 = vadd.f32 %v5670_v51, %v2098_v21  ;;  %v2127_v33 = vadd.f32 %v5670_v51, %v2095_v50 }
 0x1fd   :  { %v2128_v40 = vadd.f32 %v5670_v51, %v2096_v53  ;;  %v2131_v62 = vadd.f32 %v5670_v51, %v2099_v18  ;;  %v2153_v27 = vpack.c.bf16 %v2121_v29, %v2121_v29  ;;  %v2132_v32 = vadd.f32 %v5670_v51, %v2100_v24 }
 0x1fe   :  { %v2133_v34 = vadd.f32 %v5670_v51, %v2101_v20  ;;  %v2134_v11 = vadd.f32 %v5670_v51, %v2102_v45  ;;  %v2154_v10 = vpack.c.bf16 %v2122_v54, %v2122_v54  ;;  %v2135_v35 = vadd.f32 %v5670_v51, %v2103_v60 }
 0x1ff   :  { %v2152_v0 = vpack.c.bf16 %v2120_v39, %v2120_v39  ;;  %v2155_v2 = vpack.c.bf16 %v2123_v13, %v2123_v13  ;;  %v2161_v22 = vpack.c.bf16 %v2129_v43, %v2129_v43  ;;  %v2156_v14 = vpack.c.bf16 %v2124_v61, %v2124_v61 }
 0x200   :  { %v2157_v63 = vpack.c.bf16 %v2125_v56, %v2125_v56  ;;  %v2158_v48 = vpack.c.bf16 %v2126_v46, %v2126_v46  ;;  %v2162_v26 = vpack.c.bf16 %v2130_v57, %v2130_v57  ;;  %v2159_v37 = vpack.c.bf16 %v2127_v33, %v2127_v33 }
 0x201   :  { %v2160_v4 = vpack.c.bf16 %v2128_v40, %v2128_v40  ;;  %v2163_v12 = vpack.c.bf16 %v2131_v62, %v2131_v62  ;;  %v2222_v55 = vunpack.c.l.b16 %v2153_v27  ;;  %v2164_v31 = vpack.c.bf16 %v2132_v32, %v2132_v32 }
 0x202   :  { %v2165_v23 = vpack.c.bf16 %v2133_v34, %v2133_v34  ;;  %v2166_v59 = vpack.c.bf16 %v2134_v11, %v2134_v11  ;;  %v2223_v6 = vunpack.c.l.b16 %v2154_v10  ;;  %v2167_v1 = vpack.c.bf16 %v2135_v35, %v2135_v35 }
 0x203   :  { %v2221_v25 = vunpack.c.l.b16 %v2152_v0  ;;  %v2224_v16 = vunpack.c.l.b16 %v2155_v2  ;;  %v2230_v58 = vunpack.c.l.b16 %v2161_v22  ;;  %v2225_v52 = vunpack.c.l.b16 %v2156_v14 }
 0x204   :  { %v2226_v28 = vunpack.c.l.b16 %v2157_v63  ;;  %v2227_v7 = vunpack.c.l.b16 %v2158_v48  ;;  %v2231_v44 = vunpack.c.l.b16 %v2162_v26  ;;  %v2228_v8 = vunpack.c.l.b16 %v2159_v37 }
 0x205   :  { %v2232_v15 = vunpack.c.l.b16 %v2163_v12  ;;  %v2265_v42 = vrot.slane %v2222_v55, 7  ;;  %v2267_v36 = vrot.slane %v2223_v6, 6  ;;  %v2229_v17 = vunpack.c.l.b16 %v2160_v4 }
 0x206   :  { %v2233_v49 = vunpack.c.l.b16 %v2164_v31  ;;  %v2234_v47 = vunpack.c.l.b16 %v2165_v23  ;;  %v2235_v30 = vunpack.c.l.b16 %v2166_v59  ;;  %v2269_v21 = vrot.slane %v2224_v16, 5  ;;  %v6334_v31 = vld [vmem:[#allocation61_spill] sm:$0xff]  ;;  %v6335_v59 = vld [vmem:[#allocation62_spill] sm:$0xff] }
 0x207   :  { %v2266_v19 = vsel %vm97_vm0, %v2265_v42, %v2221_v25  ;;  %v2279_v50 = vrot.slane %v2230_v58, 7  ;;  %v2281_v53 = vrot.slane %v2231_v44, 6  ;;  %v2236_v18 = vunpack.c.l.b16 %v2167_v1  ;;  %v6339_v42 = vld [vmem:[#allocation70_spill] sm:$0xff] }
 0x208   :  { %v2268_v29 = vsel %vm100_vm1, %v2267_v36, %v2266_v19  ;;  %v2271_v24 = vrot.slane %v2225_v52, 4  ;;  %v2273_v20 = vrot.slane %v2226_v28, 3  ;;  %v2275_v54 = vrot.slane %v2227_v7, 2  ;;  %v6336_v52 = vld [vmem:[#allocation60_spill] sm:$0xff]  ;;  %v6337_v7 = vld [vmem:[#allocation63_spill] sm:$0xff]  ;;  %v6342_v19 = vld [vmem:[#allocation66_spill] sm:$0xff] }
 0x209   :  { %v2270_v45 = vsel %vm103_vm2, %v2269_v21, %v2268_v29  ;;  %v2280_v60 = vsel %vm97_vm0, %v2279_v50, %v2229_v17  ;;  %v2283_v39 = vrot.slane %v2232_v15, 5  ;;  %v2277_v43 = vrot.slane %v2228_v8, 1  ;;  %v6338_v8 = vld [vmem:[#allocation69_spill] sm:$0xff]  ;;  %v6340_v17 = vld [vmem:[#allocation64_spill] sm:$0xff]  ;;  %v6343_v50 = vld [vmem:[#allocation67_spill] sm:$0xff] }
 0x20a   :  { %v2272_v13 = vsel %vm106_vm3, %v2271_v24, %v2270_v45  ;;  %v2282_v61 = vsel %vm100_vm1, %v2281_v53, %v2280_v60  ;;  %v2285_v56 = vrot.slane %v2233_v49, 4  ;;  %v2287_v33 = vrot.slane %v2234_v47, 3  ;;  %v6341_v47 = vld [vmem:[#allocation65_spill] sm:$0xff]  ;;  %v6345_v24 = vld [vmem:[#allocation71_spill] sm:$0xff] }
 0x20b   :  { %v2274_v46 = vsel %vm109_vm4, %v2273_v20, %v2272_v13  ;;  %v2284_v57 = vsel %vm103_vm2, %v2283_v39, %v2282_v61  ;;  %v2289_v40 = vrot.slane %v2235_v30, 2  ;;  %v2754_v32 = vrot.slane %v5673_v3, 1  ;;  %v6347_v39 = vld [vmem:[#allocation73_spill] sm:$0xff] }
 0x20c   :  { %v2276_v62 = vsel %vm112_vm5, %v2275_v54, %v2274_v46  ;;  %v2286_v27 = vsel %vm106_vm3, %v2285_v56, %v2284_v57  ;;  %v2755_v34 = vrot.slane %v5673_v3, 2  ;;  %v2291_v10 = vrot.slane %v2236_v18, 1  ;;  %v6344_v18 = vld [vmem:[#allocation68_spill] sm:$0xff]  ;;  %v6349_v56 = vld [vmem:[#allocation75_spill] sm:$0xff] }
 0x20d   :  { %v2288_v11 = vsel %vm109_vm4, %v2287_v33, %v2286_v27  ;;  %v2756_v35 = vrot.slane %v5673_v3, 3  ;;  %v2757_v0 = vrot.slane %v5673_v3, 4  ;;  %v2758_v22 = vrot.slane %v5673_v3, 5  ;;  %v6346_v54 = vld [vmem:[#allocation72_spill] sm:$0xff] }
 0x20e   :  { %v2290_v2 = vsel %vm112_vm5, %v2289_v40, %v2288_v11  ;;  %v2761_v14 = vrot.slane %v5690_v9, 1  ;;  %v2762_v63 = vrot.slane %v5690_v9, 2  ;;  %v2278_v48 = vsel %vm115_vm6, %v2277_v43, %v2276_v62  ;;  %v6348_v43 = vld [vmem:[#allocation74_spill] sm:$0xff] }
 0x20f   :  { %v2292_v26 = vsel %vm115_vm6, %v2291_v10, %v2290_v2  ;;  %v2759_v37 = vrot.slane %v5673_v3, 6  ;;  %v2760_v4 = vrot.slane %v5673_v3, 7  ;;  %v2763_v55 = vrot.slane %v5690_v9, 3 }
 0x210   :  { %v2294_v12 = vpack.c.b16 %v2292_v26, %v2278_v48  ;;  %v2815_v23 = vmul.f32 %v2754_v32, %v6334_v31  ;;  %v2816_v6 = vmul.f32 %v2755_v34, %v6335_v59  ;;  %v2764_v1 = vrot.slane %v5690_v9, 4 }
 0x211   :  { %v2765_v25 = vrot.slane %v5690_v9, 5  ;;  %v2766_v16 = vrot.slane %v5690_v9, 6  ;;  %v2767_v58 = vrot.slane %v5690_v9, 7  ;;  %v2814_v28 = vmul.f32 %v5673_v3, %v6336_v52 }
 0x212   :  { %3409 = vmatmul.mubr.msk.bf16.vlgmr.msra.gmra.mxu0 %vm163_vm7, %v2294_v12  ;;  %v2817_v44 = vmul.f32 %v2756_v35, %v6337_v7  ;;  %v2823_v15 = vmul.f32 %v2761_v14, %v6338_v8  ;;  %v2824_v36 = vmul.f32 %v2762_v63, %v6339_v42  ;;  %v2818_v49 = vmul.f32 %v2757_v0, %v6340_v17 }
 0x213   :  { %v2819_v30 = vmul.f32 %v2758_v22, %v6341_v47  ;;  %v2820_v21 = vmul.f32 %v2759_v37, %v6342_v19  ;;  %v2821_v53 = vmul.f32 %v2760_v4, %v6343_v50  ;;  %v2822_v29 = vmul.f32 %v5690_v9, %v6344_v18 }
 0x214   :  { %v2825_v20 = vmul.f32 %v2763_v55, %v6345_v24  ;;  %v2847_v3 = vmul.f32 %v5663_v5, %v2815_v23  ;;  %v2848_v45 = vmul.f32 %v5663_v5, %v2816_v6  ;;  %v2826_v60 = vmul.f32 %v2764_v1, %v6346_v54 }
 0x215   :  { %v2827_v13 = vmul.f32 %v2765_v25, %v6347_v39  ;;  %v2828_v61 = vmul.f32 %v2766_v16, %v6348_v43  ;;  %v2829_v46 = vmul.f32 %v2767_v58, %v6349_v56  ;;  %v2846_v57 = vmul.f32 %v5663_v5, %v2814_v28 }
 0x216   :  { %v2849_v33 = vmul.f32 %v5663_v5, %v2817_v44  ;;  %v2855_v9 = vmul.f32 %v5663_v5, %v2823_v15  ;;  %v2856_v40 = vmul.f32 %v5663_v5, %v2824_v36  ;;  %v2850_v62 = vmul.f32 %v5663_v5, %v2818_v49 }
 0x217   :  { %v2851_v27 = vmul.f32 %v5663_v5, %v2819_v30  ;;  %v2852_v32 = vmul.f32 %v5663_v5, %v2820_v21  ;;  %v2853_v34 = vmul.f32 %v5663_v5, %v2821_v53  ;;  %v2854_v11 = vmul.f32 %v5663_v5, %v2822_v29 }
 0x218   :  { %v2857_v10 = vmul.f32 %v5663_v5, %v2825_v20  ;;  %v2879_v35 = vadd.f32 %v5670_v51, %v2847_v3  ;;  %v2880_v0 = vadd.f32 %v5670_v51, %v2848_v45  ;;  %v2858_v2 = vmul.f32 %v5663_v5, %v2826_v60 }
 0x219   :  { %v2859_v22 = vmul.f32 %v5663_v5, %v2827_v13  ;;  %v2860_v14 = vmul.f32 %v5663_v5, %v2828_v61  ;;  %v2861_v63 = vmul.f32 %v5663_v5, %v2829_v46  ;;  %v2878_v48 = vadd.f32 %v5670_v51, %v2846_v57 }
 0x21a   :  { %v2881_v26 = vadd.f32 %v5670_v51, %v2849_v33  ;;  %v2887_v37 = vadd.f32 %v5670_v51, %v2855_v9  ;;  %v2888_v4 = vadd.f32 %v5670_v51, %v2856_v40  ;;  %v2882_v12 = vadd.f32 %v5670_v51, %v2850_v62 }
 0x21b   :  { %v2883_v55 = vadd.f32 %v5670_v51, %v2851_v27  ;;  %v2884_v31 = vadd.f32 %v5670_v51, %v2852_v32  ;;  %v2885_v23 = vadd.f32 %v5670_v51, %v2853_v34  ;;  %v2886_v59 = vadd.f32 %v5670_v51, %v2854_v11 }
 0x21c   :  { %v2889_v6 = vadd.f32 %v5670_v51, %v2857_v10  ;;  %v2911_v1 = vpack.c.bf16 %v2879_v35, %v2879_v35  ;;  %v2912_v25 = vpack.c.bf16 %v2880_v0, %v2880_v0  ;;  %v2890_v16 = vadd.f32 %v5670_v51, %v2858_v2 }
 0x21d   :  { %v2891_v58 = vadd.f32 %v5670_v51, %v2859_v22  ;;  %v2892_v52 = vadd.f32 %v5670_v51, %v2860_v14  ;;  %v2893_v28 = vadd.f32 %v5670_v51, %v2861_v63  ;;  %v2910_v7 = vpack.c.bf16 %v2878_v48, %v2878_v48 }
 0x21e   :  { %v2913_v44 = vpack.c.bf16 %v2881_v26, %v2881_v26  ;;  %v2919_v8 = vpack.c.bf16 %v2887_v37, %v2887_v37  ;;  %v2920_v15 = vpack.c.bf16 %v2888_v4, %v2888_v4  ;;  %v2914_v42 = vpack.c.bf16 %v2882_v12, %v2882_v12 }
 0x21f   :  { %v2915_v36 = vpack.c.bf16 %v2883_v55, %v2883_v55  ;;  %v2916_v17 = vpack.c.bf16 %v2884_v31, %v2884_v31  ;;  %v2917_v49 = vpack.c.bf16 %v2885_v23, %v2885_v23  ;;  %v2918_v47 = vpack.c.bf16 %v2886_v59, %v2886_v59 }
 0x220   :  { %v2921_v30 = vpack.c.bf16 %v2889_v6, %v2889_v6  ;;  %v2980_v19 = vunpack.c.l.b16 %v2911_v1  ;;  %v2981_v21 = vunpack.c.l.b16 %v2912_v25  ;;  %v2922_v50 = vpack.c.bf16 %v2890_v16, %v2890_v16 }
 0x221   :  { %v2923_v53 = vpack.c.bf16 %v2891_v58, %v2891_v58  ;;  %v2924_v18 = vpack.c.bf16 %v2892_v52, %v2892_v52  ;;  %v2925_v29 = vpack.c.bf16 %v2893_v28, %v2893_v28  ;;  %v2979_v24 = vunpack.c.l.b16 %v2910_v7 }
 0x222   :  { %v2982_v20 = vunpack.c.l.b16 %v2913_v44  ;;  %v2988_v3 = vunpack.c.l.b16 %v2919_v8  ;;  %v2989_v45 = vunpack.c.l.b16 %v2920_v15  ;;  %v2983_v54 = vunpack.c.l.b16 %v2914_v42 }
 0x223   :  { %v2984_v60 = vunpack.c.l.b16 %v2915_v36  ;;  %v2985_v39 = vunpack.c.l.b16 %v2916_v17  ;;  %v2986_v13 = vunpack.c.l.b16 %v2917_v49  ;;  %v2987_v43 = vunpack.c.l.b16 %v2918_v47 }
 0x224   :  { %v2990_v61 = vunpack.c.l.b16 %v2921_v30  ;;  %v3011_v56 = vrot.slane %v2980_v19, 7  ;;  %v3013_v46 = vrot.slane %v2981_v21, 6  ;;  %v2991_v57 = vunpack.c.l.b16 %v2922_v50  ;;  %v6350_v19 = vld [vmem:[#allocation77_spill] sm:$0xff]  ;;  %v6351_v50 = vld [vmem:[#allocation78_spill] sm:$0xff] }
 0x225   :  { %v2992_v33 = vunpack.c.l.b16 %v2923_v53  ;;  %v2993_v9 = vunpack.c.l.b16 %v2924_v18  ;;  %v2994_v40 = vunpack.c.l.b16 %v2925_v29  ;;  %v3015_v27 = vrot.slane %v2982_v20, 5  ;;  %v6352_v20 = vld [vmem:[#allocation76_spill] sm:$0xff] }
 0x226   :  { %v3012_v62 = vsel %vm97_vm0, %v3011_v56, %v2979_v24  ;;  %v3025_v32 = vrot.slane %v2988_v3, 7  ;;  %v3027_v34 = vrot.slane %v2989_v45, 6  ;;  %v3017_v10 = vrot.slane %v2983_v54, 4  ;;  %v6353_v45 = vld [vmem:[#allocation79_spill] sm:$0xff] }
 0x227   :  { %v3014_v11 = vsel %vm100_vm1, %v3013_v46, %v3012_v62  ;;  %v3019_v35 = vrot.slane %v2984_v60, 3  ;;  %v3021_v0 = vrot.slane %v2985_v39, 2  ;;  %v3023_v22 = vrot.slane %v2986_v13, 1  ;;  %v6354_v60 = vld [vmem:[#allocation85_spill] sm:$0xff]  ;;  %v6355_v13 = vld [vmem:[#allocation86_spill] sm:$0xff] }
 0x228   :  { %v3016_v2 = vsel %vm103_vm2, %v3015_v27, %v3014_v11  ;;  %v3026_v14 = vsel %vm97_vm0, %v3025_v32, %v2987_v43  ;;  %v3029_v63 = vrot.slane %v2990_v61, 5  ;;  %v3031_v37 = vrot.slane %v2991_v57, 4  ;;  %v6356_v61 = vld [vmem:[#allocation80_spill] sm:$0xff]  ;;  %v6357_v46 = vld [vmem:[#allocation81_spill] sm:$0xff]  ;;  %v6360_v27 = vld [vmem:[#allocation83_spill] sm:$0xff] }
 0x229   :  { %v3018_v48 = vsel %vm106_vm3, %v3017_v10, %v3016_v2  ;;  %v3028_v26 = vsel %vm100_vm1, %v3027_v34, %v3026_v14  ;;  %v3033_v4 = vrot.slane %v2992_v33, 3  ;;  %v3035_v31 = vrot.slane %v2993_v9, 2  ;;  %v6358_v33 = vld [vmem:[#allocation82_spill] sm:$0xff]  ;;  %v6361_v34 = vld [vmem:[#allocation88_spill] sm:$0xff]  ;;  %v6363_v2 = vld [vmem:[#allocation89_spill] sm:$0xff] }
 0x22a   :  { %v3020_v12 = vsel %vm109_vm4, %v3019_v35, %v3018_v48  ;;  %v3030_v55 = vsel %vm103_vm2, %v3029_v63, %v3028_v26  ;;  %v3037_v23 = vrot.slane %v2994_v40, 1  ;;  %v2768_v1 = vrot.slane %v5700_v41, 1  ;;  %v6359_v40 = vld [vmem:[#allocation87_spill] sm:$0xff]  ;;  %v6362_v35 = vld [vmem:[#allocation84_spill] sm:$0xff]  ;;  %v6364_v14 = vld [vmem:[#allocation90_spill] sm:$0xff] }
 0x22b   :  { %v3022_v59 = vsel %vm112_vm5, %v3021_v0, %v3020_v12  ;;  %v3032_v6 = vsel %vm106_vm3, %v3031_v37, %v3030_v55  ;;  %v2769_v25 = vrot.slane %v5700_v41, 2  ;;  %v2770_v58 = vrot.slane %v5700_v41, 3  ;;  %v6365_v48 = vld [vmem:[#allocation91_spill] sm:$0xff] }
 0x22c   :  { %v3034_v16 = vsel %vm109_vm4, %v3033_v4, %v3032_v6  ;;  %v2771_v52 = vrot.slane %v5700_v41, 4  ;;  %v2772_v28 = vrot.slane %v5700_v41, 5  ;;  %v2773_v44 = vrot.slane %v5700_v41, 6 }
 0x22d   :  { %v3036_v7 = vsel %vm112_vm5, %v3035_v31, %v3034_v16  ;;  %v2775_v8 = vrot.slane %v5757_v38, 1  ;;  %v2776_v15 = vrot.slane %v5757_v38, 2  ;;  %v3024_v42 = vsel %vm115_vm6, %v3023_v22, %v3022_v59 }
 0x22e   :  { %v3038_v36 = vsel %vm115_vm6, %v3037_v23, %v3036_v7  ;;  %v2774_v17 = vrot.slane %v5700_v41, 7  ;;  %v2777_v49 = vrot.slane %v5757_v38, 3  ;;  %v2778_v30 = vrot.slane %v5757_v38, 4 }
 0x22f   :  { %v3067_v47 = vpack.c.b16 %v3038_v36, %v3024_v42  ;;  %v2831_v21 = vmul.f32 %v2768_v1, %v6350_v19  ;;  %v2832_v53 = vmul.f32 %v2769_v25, %v6351_v50  ;;  %v2779_v18 = vrot.slane %v5757_v38, 5 }
 0x230   :  { %v2780_v29 = vrot.slane %v5757_v38, 6  ;;  %v2781_v24 = vrot.slane %v5757_v38, 7  ;;  %v2830_v3 = vmul.f32 %v5700_v41, %v6352_v20  ;;  %v2833_v54 = vmul.f32 %v2770_v58, %v6353_v45 }
 0x231   :  { %3416 = vmatprep.mubr.msk.bf16.mxu1 %vm163_vm7, %v3067_v47  ;;  %v2839_v39 = vmul.f32 %v2775_v8, %v6354_v60  ;;  %v2840_v43 = vmul.f32 %v2776_v15, %v6355_v13  ;;  %v2834_v56 = vmul.f32 %v2771_v52, %v6356_v61  ;;  %v2835_v57 = vmul.f32 %v2772_v28, %v6357_v46  ;;  %v3560_v52 = vld [vmem:[%s6058_s1] ss:$0 sm:$0xff] }
 0x232   :  { %v2836_v9 = vmul.f32 %v2773_v44, %v6358_v33  ;;  %v2841_v62 = vmul.f32 %v2777_v49, %v6359_v40  ;;  %v2837_v32 = vmul.f32 %v2774_v17, %v6360_v27  ;;  %v2842_v11 = vmul.f32 %v2778_v30, %v6361_v34  ;;  %v3561_v8 = vld [vmem:[%s6059_s2] ss:$0 sm:$0xff] }
 0x233   :  { %v2863_v41 = vmul.f32 %v5663_v5, %v2831_v21  ;;  %v2864_v10 = vmul.f32 %v5663_v5, %v2832_v53  ;;  %v2838_v0 = vmul.f32 %v5757_v38, %v6362_v35  ;;  %v2843_v22 = vmul.f32 %v2779_v18, %v6363_v2 }
 0x234   :  { %v2844_v63 = vmul.f32 %v2780_v29, %v6364_v14  ;;  %v2845_v26 = vmul.f32 %v2781_v24, %v6365_v48  ;;  %v2862_v37 = vmul.f32 %v5663_v5, %v2830_v3  ;;  %v2865_v4 = vmul.f32 %v5663_v5, %v2833_v54 }
 0x235   :  { %v2871_v12 = vmul.f32 %v5663_v5, %v2839_v39  ;;  %v2872_v55 = vmul.f32 %v5663_v5, %v2840_v43  ;;  %v2866_v31 = vmul.f32 %v5663_v5, %v2834_v56  ;;  %v2867_v23 = vmul.f32 %v5663_v5, %v2835_v57 }
 0x236   :  { %v2868_v38 = vmul.f32 %v5663_v5, %v2836_v9  ;;  %v2873_v59 = vmul.f32 %v5663_v5, %v2841_v62  ;;  %v2869_v6 = vmul.f32 %v5663_v5, %v2837_v32  ;;  %v2874_v1 = vmul.f32 %v5663_v5, %v2842_v11 }
 0x237   :  { %v2895_v25 = vadd.f32 %v5670_v51, %v2863_v41  ;;  %v2896_v16 = vadd.f32 %v5670_v51, %v2864_v10  ;;  %v2870_v58 = vmul.f32 %v5663_v5, %v2838_v0  ;;  %v2875_v28 = vmul.f32 %v3560_v52, %v2843_v22 }
 0x238   :  { %v2876_v7 = vmul.f32 %v3560_v52, %v2844_v63  ;;  %v2877_v44 = vmul.f32 %v3560_v52, %v2845_v26  ;;  %v2894_v15 = vadd.f32 %v3561_v8, %v2862_v37  ;;  %v2897_v42 = vadd.f32 %v3561_v8, %v2865_v4 }
 0x239   :  { %v2903_v36 = vadd.f32 %v3561_v8, %v2871_v12  ;;  %v2904_v17 = vadd.f32 %v3561_v8, %v2872_v55  ;;  %v2898_v49 = vadd.f32 %v3561_v8, %v2866_v31  ;;  %v2899_v47 = vadd.f32 %v3561_v8, %v2867_v23 }
 0x23a   :  { %v2900_v51 = vadd.f32 %v3561_v8, %v2868_v38  ;;  %v2905_v30 = vadd.f32 %v3561_v8, %v2873_v59  ;;  %v2901_v5 = vadd.f32 %v3561_v8, %v2869_v6  ;;  %v2906_v19 = vadd.f32 %v3561_v8, %v2874_v1 }
 0x23b   :  { %v2927_v21 = vpack.c.bf16 %v2895_v25, %v2895_v25  ;;  %v2928_v50 = vpack.c.bf16 %v2896_v16, %v2896_v16  ;;  %v2902_v53 = vadd.f32 %v3561_v8, %v2870_v58  ;;  %v2907_v18 = vadd.f32 %v3561_v8, %v2875_v28 }
 0x23c   :  { %v2908_v29 = vadd.f32 %v3561_v8, %v2876_v7  ;;  %v2909_v24 = vadd.f32 %v3561_v8, %v2877_v44  ;;  %v2926_v20 = vpack.c.bf16 %v2894_v15, %v2894_v15  ;;  %v2929_v3 = vpack.c.bf16 %v2897_v42, %v2897_v42 }
 0x23d   :  { %v2935_v45 = vpack.c.bf16 %v2903_v36, %v2903_v36  ;;  %v2936_v54 = vpack.c.bf16 %v2904_v17, %v2904_v17  ;;  %v2930_v60 = vpack.c.bf16 %v2898_v49, %v2898_v49  ;;  %v2931_v39 = vpack.c.bf16 %v2899_v47, %v2899_v47 }
 0x23e   :  { %v2932_v13 = vpack.c.bf16 %v2900_v51, %v2900_v51  ;;  %v2937_v43 = vpack.c.bf16 %v2905_v30, %v2905_v30  ;;  %v2933_v61 = vpack.c.bf16 %v2901_v5, %v2901_v5  ;;  %v2938_v56 = vpack.c.bf16 %v2906_v19, %v2906_v19 }
 0x23f   :  { %v2996_v46 = vunpack.c.l.b16 %v2927_v21  ;;  %v2997_v57 = vunpack.c.l.b16 %v2928_v50  ;;  %v2934_v33 = vpack.c.bf16 %v2902_v53, %v2902_v53  ;;  %v2939_v9 = vpack.c.bf16 %v2907_v18, %v2907_v18 }
 0x240   :  { %v2940_v40 = vpack.c.bf16 %v2908_v29, %v2908_v29  ;;  %v2941_v62 = vpack.c.bf16 %v2909_v24, %v2909_v24  ;;  %v2995_v27 = vunpack.c.l.b16 %v2926_v20  ;;  %v2998_v32 = vunpack.c.l.b16 %v2929_v3 }
 0x241   :  { %v3004_v34 = vunpack.c.l.b16 %v2935_v45  ;;  %v3005_v11 = vunpack.c.l.b16 %v2936_v54  ;;  %v2999_v41 = vunpack.c.l.b16 %v2930_v60  ;;  %v3000_v10 = vunpack.c.l.b16 %v2931_v39 }
 0x242   :  { %v3001_v35 = vunpack.c.l.b16 %v2932_v13  ;;  %v3006_v0 = vunpack.c.l.b16 %v2937_v43  ;;  %v3002_v2 = vunpack.c.l.b16 %v2933_v61  ;;  %v3007_v22 = vunpack.c.l.b16 %v2938_v56 }
 0x243   :  { %v3039_v14 = vrot.slane %v2996_v46, 7  ;;  %v3041_v63 = vrot.slane %v2997_v57, 6  ;;  %v3003_v48 = vunpack.c.l.b16 %v2934_v33  ;;  %v3008_v26 = vunpack.c.l.b16 %v2939_v9 }
 0x244   :  { %v3009_v37 = vunpack.c.l.b16 %v2940_v40  ;;  %v3053_v4 = vrot.slane %v3004_v34, 7  ;;  %v3010_v12 = vunpack.c.l.b16 %v2941_v62  ;;  %v3043_v31 = vrot.slane %v2998_v32, 5  ;;  %v3353_v34 = vld [vmem:[%s6061_s4] ss:$0 sm:$0xff] }
 0x245   :  { %v3040_v55 = vsel %vm97_vm0, %v3039_v14, %v2995_v27  ;;  %v3055_v23 = vrot.slane %v3005_v11, 6  ;;  %v3045_v59 = vrot.slane %v2999_v41, 4  ;;  %v3057_v1 = vrot.slane %v3006_v0, 5 }
 0x246   :  { %v3042_v38 = vsel %vm100_vm1, %v3041_v63, %v3040_v55  ;;  %v3054_v6 = vsel %vm97_vm0, %v3053_v4, %v3003_v48  ;;  %v3047_v16 = vrot.slane %v3000_v10, 3  ;;  %v3059_v52 = vrot.slane %v3007_v22, 4 }
 0x247   :  { %v3044_v25 = vsel %vm103_vm2, %v3043_v31, %v3042_v38  ;;  %v3056_v58 = vsel %vm100_vm1, %v3055_v23, %v3054_v6  ;;  %v3049_v7 = vrot.slane %v3001_v35, 2  ;;  %v3061_v8 = vrot.slane %v3008_v26, 3 }
 0x248   :  { %v3046_v28 = vsel %vm106_vm3, %v3045_v59, %v3044_v25  ;;  %v3058_v44 = vsel %vm103_vm2, %v3057_v1, %v3056_v58  ;;  %v3063_v36 = vrot.slane %v3009_v37, 2  ;;  %v3051_v49 = vrot.slane %v3002_v2, 1 }
 0x249   :  { %v3048_v15 = vsel %vm109_vm4, %v3047_v16, %v3046_v28  ;;  %v3060_v42 = vsel %vm106_vm3, %v3059_v52, %v3058_v44  ;;  %v3065_v51 = vrot.slane %v3010_v12, 1 }
 0x24a   :  { %v3050_v17 = vsel %vm112_vm5, %v3049_v7, %v3048_v15  ;;  %v3062_v47 = vsel %vm109_vm4, %v3061_v8, %v3060_v42 }
 0x24b   :  { %v3064_v30 = vsel %vm112_vm5, %v3063_v36, %v3062_v47  ;;  %v3052_v5 = vsel %vm115_vm6, %v3051_v49, %v3050_v17  ;;  %v3436_v49 = vld [vmem:[%s6062_s7 + $0x8] sm:$0xff]   ;;  %v3437_v47 = vld [vmem:[%s6062_s7] sm:$0xff]  }
 0x24c   :  { %v3066_v19 = vsel %vm115_vm6, %v3065_v51, %v3064_v30  ;;  %3420 = vmatprep.subr.bf16.mxu0 %v3436_v49 }
 0x24d   :  { %v3068_v21 = vpack.c.b16 %v3066_v19, %v3052_v5  ;;  %3421 = vmatpush3.bf16.msra.mxu0 %v3436_v49 }
 0x24e   :  { %3422 = vmatprep.subr.bf16.mxu0 %v3437_v47 }
 0x24f   :  { %3417 = vmatmul.mubr.msk.bf16.vlgmr.msra.gmra.mxu1 %vm163_vm7, %v3068_v21 }
 0x251   :  { %3423 = vmatpush3.bf16.msra.mxu0 %v3437_v47 }
 0x252   :  { %v3394_v50 = vpop.f32.mrf.mxu0 }
 0x254   :  { %v1388_v53 = vpop.f32.mrf.mxu0 }
 0x256   :  { %v3395_v18 = vpop.f32.mrf.mxu0 }
 0x258   :  { %v1391_v24 = vpop.f32.mrf.mxu0 }
 0x294   :  { %v3402_v29 = vpop.f32.mrf.mxu1 }
 0x295   :  { %v1586_v13 = vadd.f32 %v3402_v29, %v3394_v50 }
 0x296   :  { %v1577_v20 = vpop.f32.mrf.mxu1 }
 0x297   :  { %v1578_v43 = vadd.f32 %v1577_v20, %v1388_v53 }
 0x298   :  { %v3403_v45 = vpop.f32.mrf.mxu1 }
 0x299   :  { %v1589_v9 = vadd.f32 %v3403_v45, %v3395_v18 }
 0x29a   :  { %v1580_v60 = vpop.f32.mrf.mxu1 }
 0x29b   :  { %v1581_v40 = vadd.f32 %v1580_v60, %v1391_v24  ;;  %v3354_v60 = vld [vmem:[%s6063_s5] ss:$0 sm:$0xff] }
 0x2d2   :  { %v3410_v3 = vpop.f32.mrf.mxu0 }
 0x2d3   :  { %v2364_v56 = vadd.f32 %v3410_v3, %v1586_v13 }
 0x2d4   :  { %v2347_v54 = vpop.f32.mrf.mxu0 }
 0x2d5   :  { %v2362_v46 = vadd.f32 %v2347_v54, %v1578_v43 }
 0x2d6   :  { %v3411_v39 = vpop.f32.mrf.mxu0 }
 0x2d7   :  { %v2365_v11 = vadd.f32 %v3411_v39, %v1589_v9 }
 0x2d8   :  { %v2350_v57 = vpop.f32.mrf.mxu0 }
 0x2d9   :  { %v2363_v41 = vadd.f32 %v2350_v57, %v1581_v40 }
 0x30f   :  { %v3418_v61 = vpop.f32.mrf.mxu1 }
 0x310   :  { %v3138_v62 = vadd.f32 %v3418_v61, %v2364_v56 }
 0x311   :  { %v3121_v33 = vpop.f32.mrf.mxu1 }
 0x312   :  { %v3136_v27 = vadd.f32 %v3121_v33, %v2362_v46  ;;  %v3149_v14 = vadd.f32 %v3353_v34, %v3138_v62  ;;  %v3355_v46 = vld [vmem:[%s6064_s6] ss:$0 sm:$0xff] }
 0x313   :  { %v3419_v32 = vpop.f32.mrf.mxu1 }
 0x314   :  { %v3147_v10 = vadd.f32 %v3353_v34, %v3136_v27  ;;  %v3139_v0 = vadd.f32 %v3419_v32, %v2365_v11  ;;  %v3159_v48 = vsel %vm163_vm7, %v3149_v14, 0.0 }
 0x315   :  { %v3124_v35 = vpop.f32.mrf.mxu1 }
 0x316   :  { %v3137_v2 = vadd.f32 %v3124_v35, %v2363_v41  ;;  %v3153_v22 = vsel %vm163_vm7, %v3147_v10, 0.0  ;;  %v3150_v37 = vadd.f32 %v3353_v34, %v3139_v0 }
 0x317   :  { %3154 = vadd.xlane.f32.xlu0 %v3153_v22 }
 0x318   :  { %v3148_v63 = vadd.f32 %v3353_v34, %v3137_v2  ;;  %v3162_v4 = vsel %vm163_vm7, %v3150_v37, 0.0 }
 0x31a   :  { %v3156_v26 = vsel %vm163_vm7, %v3148_v63, 0.0 }
 0x31b   :  { %3160 = vadd.xlane.f32.xlu0 %v3159_v48  ;;  %3157 = vadd.xlane.f32.xlu1 %v3156_v26 }
 0x31f   :  { %3163 = vadd.xlane.f32.xlu1 %v3162_v4 }
 0x3a0   :  { %v3155_v12 = vpop.xlane.xlu0 %3154 }
 0x3a1   :  { %v3165_v55 = vmul.f32 0.03125, %v3155_v12 }
 0x3a3   :  { %v3169_v31 = vsub.f32 %v3147_v10, %v3165_v55 }
 0x3a4   :  { %v3161_v23 = vpop.xlane.xlu0 %3160  ;;  %v3158_v38 = vpop.xlane.xlu1 %3157 }
 0x3a5   :  { %v3167_v59 = vmul.f32 0.03125, %v3161_v23  ;;  %v3166_v6 = vmul.f32 0.03125, %v3158_v38  ;;  %v3173_v1 = vmul.f32 %v3169_v31, %v3169_v31 }
 0x3a7   :  { %v3171_v25 = vsub.f32 %v3149_v14, %v3167_v59  ;;  %v3170_v16 = vsub.f32 %v3148_v63, %v3166_v6  ;;  %v3177_v58 = vsel %vm163_vm7, %v3173_v1, 0.0 }
 0x3a8   :  { %3178 = vadd.xlane.f32.xlu0 %v3177_v58  ;;  %v3164_v52 = vpop.xlane.xlu1 %3163 }
 0x3a9   :  { %v3168_v28 = vmul.f32 0.03125, %v3164_v52  ;;  %v3175_v7 = vmul.f32 %v3171_v25, %v3171_v25  ;;  %v3174_v44 = vmul.f32 %v3170_v16, %v3170_v16 }
 0x3ab   :  { %v3172_v8 = vsub.f32 %v3150_v37, %v3168_v28  ;;  %v3183_v15 = vsel %vm163_vm7, %v3175_v7, 0.0  ;;  %v3180_v42 = vsel %vm163_vm7, %v3174_v44, 0.0 }
 0x3ac   :  { %3184 = vadd.xlane.f32.xlu0 %v3183_v15  ;;  %3181 = vadd.xlane.f32.xlu1 %v3180_v42 }
 0x3ad   :  { %v3176_v36 = vmul.f32 %v3172_v8, %v3172_v8 }
 0x3af   :  { %v3186_v17 = vsel %vm163_vm7, %v3176_v36, 0.0 }
 0x3b0   :  { %3187 = vadd.xlane.f32.xlu1 %v3186_v17 }
 0x431   :  { %v3179_v51 = vpop.xlane.xlu0 %3178 }
 0x432   :  { %v3189_v30 = vmul.f32 0.03125, %v3179_v51 }
 0x434   :  { %v3193_v5 = vadd.f32 1e-05, %v3189_v30 }
 0x435   :  { %v3185_v19 = vpop.xlane.xlu0 %3184  ;;  %v3182_v21 = vpop.xlane.xlu1 %3181 }
 0x436   :  { %3470 = vrsqrt.f32 %v3193_v5  ;;  %v3191_v50 = vmul.f32 0.03125, %v3185_v19  ;;  %v3190_v53 = vmul.f32 0.03125, %v3182_v21 }
 0x438   :  { %v3195_v18 = vadd.f32 1e-05, %v3191_v50  ;;  %v3194_v29 = vadd.f32 1e-05, %v3190_v53 }
 0x439   :  { %v3188_v24 = vpop.xlane.xlu1 %3187 }
 0x43a   :  { %3472 = vrsqrt.f32 %v3195_v18  ;;  %v3192_v20 = vmul.f32 0.03125, %v3188_v24 }
 0x43b   :  { %3474 = vrsqrt.f32 %v3194_v29 }
 0x43c   :  { %v3196_v3 = vadd.f32 1e-05, %v3192_v20 }
 0x43e   :  { %3476 = vrsqrt.f32 %v3196_v3 }
 0x443   :  { %v3471_v45 = vpop.eup %3470 }
 0x444   :  { %v3201_v54 = vmul.f32 %v3471_v45, %v3169_v31 }
 0x446   :  { %v3211_v56 = vmul.f32 %v3354_v60, %v3201_v54 }
 0x447   :  { %v3473_v39 = vpop.eup %3472 }
 0x448   :  { %v3475_v13 = vpop.eup %3474  ;;  %v3203_v43 = vmul.f32 %v3473_v39, %v3171_v25  ;;  %v3221_v62 = vadd.f32 %v3355_v46, %v3211_v56 }
 0x449   :  { %v3202_v61 = vmul.f32 %v3475_v13, %v3170_v16 }
 0x44a   :  { %v3213_v40 = vmul.f32 %v3354_v60, %v3203_v43 }
 0x44b   :  { %v3477_v57 = vpop.eup %3476  ;;  %v3212_v33 = vmul.f32 %v3354_v60, %v3202_v61 }
 0x44c   :  { %v3204_v9 = vmul.f32 %v3477_v57, %v3172_v8  ;;  %v3223_v11 = vadd.f32 %v3355_v46, %v3213_v40 }
 0x44d   :  { %v3222_v27 = vadd.f32 %v3355_v46, %v3212_v33 }
 0x44e   :  { %v3214_v32 = vmul.f32 %v3354_v60, %v3204_v9 }
 0x44f   :  { %v3225_v34 = vpack.c.bf16 %v3222_v27, %v3221_v62 }
 0x450   :  { %v3224_v41 = vadd.f32 %v3355_v46, %v3214_v32 }
 0x451   :  { %3424 = vmatprep.mubr.msk.bf16.mxu0 %vm163_vm7, %v3225_v34 }
 0x452   :  { %v3226_v10 = vpack.c.bf16 %v3224_v41, %v3223_v11 }
 0x454   :  { %3425 = vmatmul.mubr.msk.bf16.vlgmr.msra.gmra.mxu0 %vm163_vm7, %v3226_v10 }
 0x514   :  { %v3426_v35 = vpop.f32.mrf.mxu0 }
 0x515   :  { %v3366_v0 = vpack.c.bf16 %v3426_v35, %v3426_v35 }
 0x516   :  { %v3283_v2 = vpop.f32.mrf.mxu0 }
 0x517   :  { %3317 = vst.msk [vmem:[%s6065_s8 + $0x8] sm:$0xf] %vm3314_vm8, %v3366_v0  ;;  %v3364_v22 = vpack.c.bf16 %v3283_v2, %v3283_v2 }
 0x518   :  { %v3427_v14 = vpop.f32.mrf.mxu0 }
 0x519   :  { %3315 = vst.msk [vmem:[%s6065_s8] sm:$0xf] %vm3314_vm8, %v3364_v22  ;;  %v3367_v63 = vpack.c.bf16 %v3427_v14, %v3427_v14 }
 0x51a   :  { %v3286_v48 = vpop.f32.mrf.mxu0 }
 0x51b   :  { %3318 = vst.msk [vmem:[%s6065_s8 + $0xc] sm:$0xf] %vm3314_vm8, %v3367_v63  ;;  %v3365_v26 = vpack.c.bf16 %v3286_v48, %v3286_v48 }
 0x51d   :  { %3316 = vst.msk [vmem:[%s6065_s8 + $0x4] sm:$0xf] %vm3314_vm8, %v3365_v26 }

</bundles_post_ra>
